<compile_context>
chip_gen: v7x
topology: tpu7x:2x2x1
jax: 0.10.0
libtpu: 0.0.40
codegen_flags: <defaults>
</compile_context>

<pallas_src>
import functools

import jax
import jax.numpy as jnp
import numpy as np
from jax import lax
from jax.experimental import pallas as pl
from jax.experimental.pallas import tpu as pltpu


# -----------------------------------------------------------------------------
# Pallas kernel: G bucket-chunks of one batch element per grid step
# -----------------------------------------------------------------------------
def _lsh_attend_kernel(bq_ref, bk_ref, bv_ref, qm_ref, kvm_ref,
                       ot_ref, lse_ref, *, causal, n_dup):
    G, cs, D = bq_ref.shape
    dv = bv_ref.shape[-1]

    bq = bq_ref[...]            # (G, cs, D)    bf16
    bk = bk_ref[...]            # (G, 2cs, D)   bf16 (unit length)
    bv = bv_ref[...]            # (G, 2cs, dv)  bf16

    scale = D ** (-0.5)
    # dots[g, i, j] = <q_i, k_j> * scale   (batched MXU matmul, f32 accumulate)
    dots = lax.dot_general(
        bq, bk, (((2,), (2,)), ((0,), (0,))),
        preferred_element_type=jnp.float32) * scale            # (G, cs, 2cs) f32

    qm = qm_ref[...]            # (G, cs, 2+n_dup) i32 : [t, bucket, locs...]
    kvm = kvm_ref[...]          # (G, 2+n_dup, 2cs) i32: [t, bucket, locs...]
    qt = qm[:, :, 0:1]          # (G, cs, 1)
    qb = qm[:, :, 1:2]
    kvt = kvm[:, 0:1, :]        # (G, 1, 2cs)
    kvb = kvm[:, 1:2, :]

    # All score / penalty / softmax math stays in f32 (bf16 only for q/k/v).
    # Single fused penalty (one subtract from dots instead of four passes).
    # NOTE: the self-attention mask is a soft -1e5 on purpose (Reformer
    # convention, matches the reference); do not "fix" it to -inf.
    pen = (qt == kvt).astype(jnp.float32) * 1e5                # self mask
    pen = pen + (qb != kvb).astype(jnp.float32) * 1e7          # cross-bucket mask
    if causal:
        pen = pen + (qt < kvt).astype(jnp.float32) * 1e9

    # duplicate-attention correction (allow_duplicate_attention=False):
    # dup[g,i,j] = #{h : q_locs[i,h] == kv_locs[j,h]}
    dup = jnp.zeros(dots.shape, jnp.float32)
    for h in range(n_dup):                                     # static unroll
        dup = dup + (qm[:, :, 2 + h:3 + h]
                     == kvm[:, 2 + h:3 + h, :]).astype(jnp.float32)
    pen = pen + jnp.log(dup + 1e-9)

    dots = dots - pen

    # softmax with logsumexp (lse kept for the cross-hash combination)
    m = jnp.max(dots, axis=-1, keepdims=True)                  # (G, cs, 1)
    ex = jnp.exp(dots - m)
    s = jnp.sum(ex, axis=-1, keepdims=True)
    lse = m + jnp.log(s)                                       # (G, cs, 1)
    probs = ex * pl.reciprocal(s, approx=True)                 # EUP reciprocal

    o = lax.dot_general(
        probs.astype(bv.dtype), bv, (((2,), (1,)), ((0,), (0,))),
        preferred_element_type=jnp.float32)                    # (G, cs, dv) f32

    # Lane-dense output: emit o transposed as (dv, G*cs).  The transpose is an
    # exact eye-matmul on the MXU (avoids an explicit XLU transpose/reshape of
    # the minor dims).
    o_flat = o.reshape(G * cs, dv)                             # (G*cs, dv)
    eye = (lax.broadcasted_iota(jnp.int32, (dv, dv), 0)
           == lax.broadcasted_iota(jnp.int32, (dv, dv), 1)).astype(jnp.float32)
    o_t = lax.dot_general(eye, o_flat, (((1,), (1,)), ((), ())),
                          preferred_element_type=jnp.float32)  # (dv, G*cs)

    ot_ref[...] = o_t.astype(ot_ref.dtype)
    lse_ref[...] = lse.astype(lse_ref.dtype)                   # (G, cs, 1)


def _attend_pallas(bq, bk, bv, q_meta, kv_meta, *, causal, chunk_batch):
    B, NC, cs, D = bq.shape
    two_cs = bk.shape[2]
    dv = bv.shape[-1]
    M = q_meta.shape[-1]
    n_dup = M - 2

    G = chunk_batch
    assert NC % G == 0
    NCG = NC // G

    kernel = functools.partial(_lsh_attend_kernel, causal=causal, n_dup=n_dup)
    im4 = lambda b, c: (b, c, 0, 0)
    im5 = lambda b, c: (b, c, 0, 0, 0)

    in_specs = [
        pl.BlockSpec((None, G, cs, D), im4),         # bq        (G, cs, D)
        pl.BlockSpec((None, G, two_cs, D), im4),     # bk        (G, 2cs, D)
        pl.BlockSpec((None, G, two_cs, dv), im4),    # bv        (G, 2cs, dv)
        pl.BlockSpec((None, G, cs, M), im4),         # q-side metadata
        pl.BlockSpec((None, G, M, two_cs), im4),     # kv-side metadata
    ]
    out_specs = [
        pl.BlockSpec((None, None, dv, G * cs), im4),  # o, transposed (lane dense)
        pl.BlockSpec((None, None, G, cs, 1), im5),    # logsumexp
    ]
    out_shape = [
        jax.ShapeDtypeStruct((B, NCG, dv, G * cs), jnp.float32),
        jax.ShapeDtypeStruct((B, NCG, G, cs, 1), jnp.float32),
    ]

    o_t, lse = pl.pallas_call(
        kernel,
        grid=(B, NCG),
        in_specs=in_specs,
        out_specs=out_specs,
        out_shape=out_shape,
        compiler_params=pltpu.CompilerParams(
            dimension_semantics=("parallel", "parallel")),
    )(bq, bk, bv, q_meta, kv_meta)

    # Undo the in-kernel transpose (layout plumbing on the host side):
    #   (B, NCG, dv, G*cs) -> (B, NC*cs, dv),  (B, NCG, G, cs, 1) -> (B, NC*cs)
    so = jnp.transpose(o_t, (0, 1, 3, 2)).reshape(B, NC * cs, dv)
    slogits = lse.reshape(B, NC * cs)
    return so, slogits


# -----------------------------------------------------------------------------
# Pure-JAX reference for the same chunked attention (for verification)
# -----------------------------------------------------------------------------
def _attend_ref(bq, bk, bv, q_meta, kv_meta, *, causal):
    bq = bq.astype(jnp.float32)
    bk = bk.astype(jnp.float32)
    bv = bv.astype(jnp.float32)
    B, NC, cs, D = bq.shape
    dv = bv.shape[-1]
    scale = D ** (-0.5)
    dots = jnp.einsum('bhie,bhje->bhij', bq, bk) * scale
    qt = q_meta[..., 0][..., None]
    qb = q_meta[..., 1][..., None]
    kvt = kv_meta[:, :, 0, :][:, :, None, :]
    kvb = kv_meta[:, :, 1, :][:, :, None, :]
    if causal:
        dots = dots - 1e9 * (qt < kvt).astype(jnp.float32)
    dots = dots - 1e5 * (qt == kvt).astype(jnp.float32)
    dots = dots - 1e7 * (qb != kvb).astype(jnp.float32)
    qlocs = q_meta[..., 2:]                                   # (B, NC, cs, 2h)
    kvlocs = jnp.swapaxes(kv_meta[:, :, 2:, :], -1, -2)       # (B, NC, 2cs, 2h)
    dup = jnp.sum((qlocs[:, :, :, None, :] == kvlocs[:, :, None, :, :]
                   ).astype(jnp.float32), axis=-1)
    dots = dots - jnp.log(dup + 1e-9)
    lse = jax.scipy.special.logsumexp(dots, axis=-1, keepdims=True)
    probs = jnp.exp(dots - lse)
    bo = jnp.einsum('buij,buje->buie', probs, bv)
    so = bo.reshape(B, NC * cs, dv)
    slogits = lse.reshape(B, NC * cs)
    return so, slogits


# -----------------------------------------------------------------------------
# Glue: LSH hashing, sorting, chunking (data-dependent; plain JAX)
# -----------------------------------------------------------------------------
# TODO(synk): the argsort-based bucket sort / unsort (data-dependent gather)
#             has no clean static-BlockSpec Pallas equivalent; kept in JAX.
def _prepare_chunks(qk, v, rotations, *, bucket_size, n_hashes):
    B, T, D = qk.shape
    dv = v.shape[-1]
    n_buckets = T // bucket_size
    assert n_buckets % 2 == 0

    # hash_vectors (rehash_each_round=True, drop_for_hash_rate=0 -> identity)
    rotated = jnp.einsum('btf,fhi->bhti', qk, rotations)       # (B, h, T, nb/2)
    rotated = jnp.concatenate([rotated, -rotated], axis=-1)    # (B, h, T, nb)
    buckets = jnp.argmax(rotated, axis=-1)                     # (B, h, T)
    offsets = (jnp.arange(n_hashes) * n_buckets).reshape(1, -1, 1)
    buckets = (buckets + offsets).reshape(B, n_hashes * T)     # (B, h*T)

    ticker = jnp.arange(n_hashes * T)[None, :]
    buckets_and_t = T * buckets + (ticker % T)
    sticker = jnp.argsort(buckets_and_t, axis=-1)
    sbuckets_and_t = jnp.take_along_axis(buckets_and_t, sticker, axis=-1)
    undo_sort = jnp.argsort(sticker, axis=-1)

    st = sticker % T
    sqk = jnp.take_along_axis(
        qk, jnp.broadcast_to(st[..., None], (B, n_hashes * T, D)), axis=1)
    sv = jnp.take_along_axis(
        v, jnp.broadcast_to(st[..., None], (B, n_hashes * T, dv)), axis=1)

    NC = n_hashes * n_buckets
    cs = bucket_size
    bq_t = st.reshape(B, NC, cs)
    bqk = sqk.reshape(B, NC, cs, D)
    bv_ = sv.reshape(B, NC, cs, dv)
    bq_buckets = (sbuckets_and_t // T).reshape(B, NC, cs)

    bq = bqk
    bk = bqk / (jnp.sqrt(jnp.sum(bqk * bqk, axis=-1, keepdims=True)) + 1e-6)

    def look_one_back(x):
        x_extra = jnp.concatenate([x[:, -1:, ...], x[:, :-1, ...]], axis=1)
        return jnp.concatenate([x, x_extra], axis=2)

    bk = look_one_back(bk)                                     # (B, NC, 2cs, D)
    bv_ = look_one_back(bv_)                                   # (B, NC, 2cs, dv)
    bkv_t = look_one_back(bq_t)                                # (B, NC, 2cs)
    bkv_buckets = look_one_back(bq_buckets)                    # (B, NC, 2cs)

    # duplicate-attention locations (allow_duplicate_attention=False,
    # attend_across_buckets=False)
    locs1 = undo_sort // cs
    locs2 = (locs1 + 1) % NC
    locs1 = buckets * NC + locs1
    locs2 = buckets * NC + locs2
    locs = jnp.concatenate([locs1.reshape(B, n_hashes, T),
                            locs2.reshape(B, n_hashes, T)], axis=1)   # (B, 2h, T)
    locs = jnp.transpose(locs, (0, 2, 1))                             # (B, T, 2h)
    slocs = jnp.take_along_axis(
        locs, jnp.broadcast_to(st[..., None], (B, n_hashes * T, 2 * n_hashes)),
        axis=1)
    b_locs = slocs.reshape(B, NC, cs, 2 * n_hashes)
    b_locs1 = b_locs[:, :, :, None, :n_hashes]
    bq_locs = jnp.broadcast_to(
        b_locs1, b_locs.shape[:3] + (2, n_hashes)).reshape(b_locs.shape)
    bkv_locs = look_one_back(b_locs)                                  # (B, NC, 2cs, 2h)

    # Merged int32 metadata: q-side (B, NC, cs, 2+2h) = [t, bucket, locs...],
    # kv-side (B, NC, 2+2h, 2cs) = [t, bucket, locs...] (key axis on lanes).
    q_meta = jnp.concatenate(
        [bq_t[..., None], bq_buckets[..., None], bq_locs], axis=-1).astype(jnp.int32)
    kv_meta = jnp.concatenate(
        [bkv_t[:, :, None, :], bkv_buckets[:, :, None, :],
         jnp.swapaxes(bkv_locs, -1, -2)], axis=2).astype(jnp.int32)

    chunks = (
        bq.astype(jnp.bfloat16),     # bf16: halves HBM traffic; MXU-native
        bk.astype(jnp.bfloat16),
        bv_.astype(jnp.bfloat16),
        q_meta,                      # (B, NC, cs, 2+2h)
        kv_meta,                     # (B, NC, 2+2h, 2cs)
    )
    return chunks, undo_sort


def _finalize(so, slogits, undo_sort, *, n_hashes, T):
    B, _, dv = so.shape
    o = jnp.take_along_axis(
        so, jnp.broadcast_to(undo_sort[..., None], (B, n_hashes * T, dv)), axis=1)
    logits = jnp.take_along_axis(slogits, undo_sort, axis=1)
    if n_hashes == 1:
        return o
    o = o.reshape(B, n_hashes, T, dv)
    logits = logits.reshape(B, n_hashes, T, 1)
    probs = jnp.exp(logits - jax.scipy.special.logsumexp(logits, axis=1, keepdims=True))
    return jnp.sum(o * probs, axis=1)


def _pick_chunk_batch(nc, target):
    g = 1
    for cand in range(1, min(nc, target) + 1):
        if nc % cand == 0:
            g = cand
    return g


def lsh_attention(qk, v, rotations, *, bucket_size, n_hashes, causal=False,
                  chunk_batch=8):
    """Full LSHAttention forward (dropout=0, defaults of the PyTorch module)."""
    # TODO(synk): nn.Dropout with rate 0.0 is an identity; non-zero dropout not implemented.
    T = qk.shape[1]
    chunks, undo_sort = _prepare_chunks(qk, v, rotations,
                                        bucket_size=bucket_size, n_hashes=n_hashes)
    NC = chunks[0].shape[1]
    G = _pick_chunk_batch(NC, chunk_batch)
    so, slogits = _attend_pallas(*chunks, causal=causal, chunk_batch=G)
    return _finalize(so, slogits, undo_sort, n_hashes=n_hashes, T=T)


# -----------------------------------------------------------------------------
if __name__ == "__main__":
    key = jax.random.PRNGKey(0)
    B, T, D = 2, 256, 32
    # bucket_size=64 -> 2*cs = 128 keys per chunk: full lane width in the kernel.
    bucket_size, n_hashes = 64, 2
    n_buckets = T // bucket_size

    k1, k2, k3 = jax.random.split(key, 3)
    qk = jax.random.normal(k1, (B, T, D), jnp.float32)
    v = jax.random.normal(k2, (B, T, D), jnp.float32)
    # deterministic "random rotations" (the module samples these per-forward)
    rotations = jax.random.normal(k3, (D, n_hashes, n_buckets // 2), jnp.float32)

    chunks, undo_sort = _prepare_chunks(qk, v, rotations,
                                        bucket_size=bucket_size, n_hashes=n_hashes)
    NC = chunks[0].shape[1]                 # = 8
    G = _pick_chunk_batch(NC, 4)            # G=4 -> grid (B, NC//G) = (2, 2)

    # Pallas kernel path
    so, slogits = _attend_pallas(*chunks, causal=False, chunk_batch=G)
    out = _finalize(so, slogits, undo_sort, n_hashes=n_hashes, T=T)
    out = jax.block_until_ready(out)

    # Pure-JAX reference of the same chunked attention for verification
    so_r, slogits_r = _attend_ref(*chunks, causal=False)
    out_r = _finalize(so_r, slogits_r, undo_sort, n_hashes=n_hashes, T=T)

    assert out.shape == v.shape
    assert bool(jnp.all(jnp.isfinite(out)))
    # Tolerance covers bf16 probs + approximate EUP reciprocal in the kernel.
    np.testing.assert_allclose(np.asarray(out), np.asarray(out_r),
                               atol=2e-2, rtol=2e-2)

    print("KERNEL_OK")
</pallas_src>

<mosaic_0001>
module attributes {stable_mosaic.version = 11 : i64} {
  func.func @_lsh_attend_kernel(%arg0: i32, %arg1: i32, %arg2: memref<1x4x64x32xbf16, #tpu.memory_space<vmem>>, %arg3: memref<1x4x128x32xbf16, #tpu.memory_space<vmem>>, %arg4: memref<1x4x128x32xbf16, #tpu.memory_space<vmem>>, %arg5: memref<1x4x64x6xi32, #tpu.memory_space<vmem>>, %arg6: memref<1x4x6x128xi32, #tpu.memory_space<vmem>>, %arg7: memref<1x1x32x256xf32, #tpu.memory_space<vmem>>, %arg8: memref<1x1x4x64x1xf32, #tpu.memory_space<vmem>>) attributes {dimension_semantics = [#tpu.dimension_semantics<parallel>, #tpu.dimension_semantics<parallel>], iteration_bounds = array<i64: 2, 2>, scalar_prefetch = 0 : i64, scratch_operands = 0 : i64, tpu.core_type = #tpu.core_type<tc>, window_params = [{transform_indices = @transform_0, window_bounds = array<i64: 1, 4, 64, 32>}, {transform_indices = @transform_1, window_bounds = array<i64: 1, 4, 128, 32>}, {transform_indices = @transform_2, window_bounds = array<i64: 1, 4, 128, 32>}, {transform_indices = @transform_3, window_bounds = array<i64: 1, 4, 64, 6>}, {transform_indices = @transform_4, window_bounds = array<i64: 1, 4, 6, 128>}, {transform_indices = @transform_5, window_bounds = array<i64: 1, 1, 32, 256>}, {transform_indices = @transform_6, window_bounds = array<i64: 1, 1, 4, 64, 1>}]} {
    %c0 = arith.constant 0 : index
    %c0_0 = arith.constant 0 : index
    %c0_1 = arith.constant 0 : index
    %c0_2 = arith.constant 0 : index
    %0 = vector.load %arg2[%c0, %c0_0, %c0_1, %c0_2] : memref<1x4x64x32xbf16, #tpu.memory_space<vmem>>, vector<1x4x64x32xbf16>
    %1 = vector.shape_cast %0 : vector<1x4x64x32xbf16> to vector<4x64x32xbf16>
    %c0_3 = arith.constant 0 : index
    %c0_4 = arith.constant 0 : index
    %c0_5 = arith.constant 0 : index
    %c0_6 = arith.constant 0 : index
    %2 = vector.load %arg3[%c0_3, %c0_4, %c0_5, %c0_6] : memref<1x4x128x32xbf16, #tpu.memory_space<vmem>>, vector<1x4x128x32xbf16>
    %3 = vector.shape_cast %2 : vector<1x4x128x32xbf16> to vector<4x128x32xbf16>
    %c0_7 = arith.constant 0 : index
    %c0_8 = arith.constant 0 : index
    %c0_9 = arith.constant 0 : index
    %c0_10 = arith.constant 0 : index
    %4 = vector.load %arg4[%c0_7, %c0_8, %c0_9, %c0_10] : memref<1x4x128x32xbf16, #tpu.memory_space<vmem>>, vector<1x4x128x32xbf16>
    %5 = vector.shape_cast %4 : vector<1x4x128x32xbf16> to vector<4x128x32xbf16>
    %cst = arith.constant dense<0.000000e+00> : vector<4x64x128xf32>
    %6 = tpu.matmul %1, %3, %cst {dimension_numbers = #tpu.dot_dimension_numbers<[2], [2], [1], [1], [0, 0, 0, 1, 1, 1], [0], [0]>} : vector<4x64x32xbf16>, vector<4x128x32xbf16>, vector<4x64x128xf32> -> vector<4x64x128xf32>
    %cst_11 = arith.constant 0.176776692 : f32
    %7 = vector.broadcast %cst_11 : f32 to vector<4x64x128xf32>
    %8 = arith.mulf %6, %7 : vector<4x64x128xf32>
    %c0_12 = arith.constant 0 : index
    %c0_13 = arith.constant 0 : index
    %c0_14 = arith.constant 0 : index
    %c0_15 = arith.constant 0 : index
    %9 = vector.load %arg5[%c0_12, %c0_13, %c0_14, %c0_15] : memref<1x4x64x6xi32, #tpu.memory_space<vmem>>, vector<1x4x64x6xi32>
    %10 = vector.shape_cast %9 : vector<1x4x64x6xi32> to vector<4x64x6xi32>
    %c0_16 = arith.constant 0 : index
    %c0_17 = arith.constant 0 : index
    %c0_18 = arith.constant 0 : index
    %c0_19 = arith.constant 0 : index
    %11 = vector.load %arg6[%c0_16, %c0_17, %c0_18, %c0_19] : memref<1x4x6x128xi32, #tpu.memory_space<vmem>>, vector<1x4x6x128xi32>
    %12 = vector.shape_cast %11 : vector<1x4x6x128xi32> to vector<4x6x128xi32>
    %13 = vector.extract_strided_slice %10 {offsets = [0, 0, 0], sizes = [4, 64, 1], strides = [1, 1, 1]} : vector<4x64x6xi32> to vector<4x64x1xi32>
    %14 = vector.extract_strided_slice %10 {offsets = [0, 0, 1], sizes = [4, 64, 1], strides = [1, 1, 1]} : vector<4x64x6xi32> to vector<4x64x1xi32>
    %15 = vector.extract_strided_slice %12 {offsets = [0, 0, 0], sizes = [4, 1, 128], strides = [1, 1, 1]} : vector<4x6x128xi32> to vector<4x1x128xi32>
    %16 = vector.extract_strided_slice %12 {offsets = [0, 1, 0], sizes = [4, 1, 128], strides = [1, 1, 1]} : vector<4x6x128xi32> to vector<4x1x128xi32>
    %17 = vector.broadcast %13 : vector<4x64x1xi32> to vector<4x64x128xi32>
    %18 = vector.broadcast %15 : vector<4x1x128xi32> to vector<4x64x128xi32>
    %19 = arith.cmpi eq, %17, %18 : vector<4x64x128xi32>
    %20 = arith.extui %19 : vector<4x64x128xi1> to vector<4x64x128xi32>
    %21 = arith.sitofp %20 : vector<4x64x128xi32> to vector<4x64x128xf32>
    %cst_20 = arith.constant 1.000000e+05 : f32
    %22 = vector.broadcast %cst_20 : f32 to vector<4x64x128xf32>
    %23 = arith.mulf %21, %22 : vector<4x64x128xf32>
    %24 = vector.broadcast %14 : vector<4x64x1xi32> to vector<4x64x128xi32>
    %25 = vector.broadcast %16 : vector<4x1x128xi32> to vector<4x64x128xi32>
    %26 = arith.cmpi ne, %24, %25 : vector<4x64x128xi32>
    %27 = arith.extui %26 : vector<4x64x128xi1> to vector<4x64x128xi32>
    %28 = arith.sitofp %27 : vector<4x64x128xi32> to vector<4x64x128xf32>
    %cst_21 = arith.constant 1.000000e+07 : f32
    %29 = vector.broadcast %cst_21 : f32 to vector<4x64x128xf32>
    %30 = arith.mulf %28, %29 : vector<4x64x128xf32>
    %31 = arith.addf %23, %30 : vector<4x64x128xf32>
    %cst_22 = arith.constant 0.000000e+00 : f32
    %32 = vector.broadcast %cst_22 : f32 to vector<4x64x128xf32>
    %33 = vector.extract_strided_slice %10 {offsets = [0, 0, 2], sizes = [4, 64, 1], strides = [1, 1, 1]} : vector<4x64x6xi32> to vector<4x64x1xi32>
    %34 = vector.extract_strided_slice %12 {offsets = [0, 2, 0], sizes = [4, 1, 128], strides = [1, 1, 1]} : vector<4x6x128xi32> to vector<4x1x128xi32>
    %35 = vector.broadcast %33 : vector<4x64x1xi32> to vector<4x64x128xi32>
    %36 = vector.broadcast %34 : vector<4x1x128xi32> to vector<4x64x128xi32>
    %37 = arith.cmpi eq, %35, %36 : vector<4x64x128xi32>
    %38 = arith.extui %37 : vector<4x64x128xi1> to vector<4x64x128xi32>
    %39 = arith.sitofp %38 : vector<4x64x128xi32> to vector<4x64x128xf32>
    %40 = arith.addf %32, %39 : vector<4x64x128xf32>
    %41 = vector.extract_strided_slice %10 {offsets = [0, 0, 3], sizes = [4, 64, 1], strides = [1, 1, 1]} : vector<4x64x6xi32> to vector<4x64x1xi32>
    %42 = vector.extract_strided_slice %12 {offsets = [0, 3, 0], sizes = [4, 1, 128], strides = [1, 1, 1]} : vector<4x6x128xi32> to vector<4x1x128xi32>
    %43 = vector.broadcast %41 : vector<4x64x1xi32> to vector<4x64x128xi32>
    %44 = vector.broadcast %42 : vector<4x1x128xi32> to vector<4x64x128xi32>
    %45 = arith.cmpi eq, %43, %44 : vector<4x64x128xi32>
    %46 = arith.extui %45 : vector<4x64x128xi1> to vector<4x64x128xi32>
    %47 = arith.sitofp %46 : vector<4x64x128xi32> to vector<4x64x128xf32>
    %48 = arith.addf %40, %47 : vector<4x64x128xf32>
    %49 = vector.extract_strided_slice %10 {offsets = [0, 0, 4], sizes = [4, 64, 1], strides = [1, 1, 1]} : vector<4x64x6xi32> to vector<4x64x1xi32>
    %50 = vector.extract_strided_slice %12 {offsets = [0, 4, 0], sizes = [4, 1, 128], strides = [1, 1, 1]} : vector<4x6x128xi32> to vector<4x1x128xi32>
    %51 = vector.broadcast %49 : vector<4x64x1xi32> to vector<4x64x128xi32>
    %52 = vector.broadcast %50 : vector<4x1x128xi32> to vector<4x64x128xi32>
    %53 = arith.cmpi eq, %51, %52 : vector<4x64x128xi32>
    %54 = arith.extui %53 : vector<4x64x128xi1> to vector<4x64x128xi32>
    %55 = arith.sitofp %54 : vector<4x64x128xi32> to vector<4x64x128xf32>
    %56 = arith.addf %48, %55 : vector<4x64x128xf32>
    %57 = vector.extract_strided_slice %10 {offsets = [0, 0, 5], sizes = [4, 64, 1], strides = [1, 1, 1]} : vector<4x64x6xi32> to vector<4x64x1xi32>
    %58 = vector.extract_strided_slice %12 {offsets = [0, 5, 0], sizes = [4, 1, 128], strides = [1, 1, 1]} : vector<4x6x128xi32> to vector<4x1x128xi32>
    %59 = vector.broadcast %57 : vector<4x64x1xi32> to vector<4x64x128xi32>
    %60 = vector.broadcast %58 : vector<4x1x128xi32> to vector<4x64x128xi32>
    %61 = arith.cmpi eq, %59, %60 : vector<4x64x128xi32>
    %62 = arith.extui %61 : vector<4x64x128xi1> to vector<4x64x128xi32>
    %63 = arith.sitofp %62 : vector<4x64x128xi32> to vector<4x64x128xf32>
    %64 = arith.addf %56, %63 : vector<4x64x128xf32>
    %cst_23 = arith.constant 9.99999971E-10 : f32
    %65 = vector.broadcast %cst_23 : f32 to vector<4x64x128xf32>
    %66 = arith.addf %64, %65 : vector<4x64x128xf32>
    %67 = math.log %66 : vector<4x64x128xf32>
    %68 = arith.addf %31, %67 : vector<4x64x128xf32>
    %69 = arith.subf %8, %68 : vector<4x64x128xf32>
    %cst_24 = arith.constant dense<0xFF800000> : vector<4x64xf32>
    %70 = vector.multi_reduction <maximumf>, %69, %cst_24 [2] : vector<4x64x128xf32> to vector<4x64xf32>
    %71 = vector.shape_cast %70 : vector<4x64xf32> to vector<4x64x1xf32>
    %72 = vector.broadcast %71 : vector<4x64x1xf32> to vector<4x64x128xf32>
    %73 = arith.subf %69, %72 : vector<4x64x128xf32>
    %74 = math.exp %73 : vector<4x64x128xf32>
    %cst_25 = arith.constant dense<0.000000e+00> : vector<4x64xf32>
    %75 = vector.multi_reduction <add>, %74, %cst_25 [2] : vector<4x64x128xf32> to vector<4x64xf32>
    %76 = vector.shape_cast %75 : vector<4x64xf32> to vector<4x64x1xf32>
    %77 = math.log %76 : vector<4x64x1xf32>
    %78 = arith.addf %71, %77 : vector<4x64x1xf32>
    %79 = tpu.reciprocal %76 {approx = true} : vector<4x64x1xf32> -> vector<4x64x1xf32>
    %80 = vector.broadcast %79 : vector<4x64x1xf32> to vector<4x64x128xf32>
    %81 = arith.mulf %74, %80 : vector<4x64x128xf32>
    %82 = arith.truncf %81 : vector<4x64x128xf32> to vector<4x64x128xbf16>
    %cst_26 = arith.constant dense<0.000000e+00> : vector<4x64x32xf32>
    %83 = tpu.matmul %82, %5, %cst_26 {dimension_numbers = #tpu.dot_dimension_numbers<[2], [1], [1], [2], [0, 0, 0, 1, 1, 2], [0], [0]>} : vector<4x64x128xbf16>, vector<4x128x32xbf16>, vector<4x64x32xf32> -> vector<4x64x32xf32>
    %84 = vector.shape_cast %83 : vector<4x64x32xf32> to vector<256x32xf32>
    %85 = tpu.iota {dimensions = array<i32: 0>} : vector<32x32xi32>
    %86 = tpu.iota {dimensions = array<i32: 1>} : vector<32x32xi32>
    %87 = arith.cmpi eq, %85, %86 : vector<32x32xi32>
    %88 = arith.extui %87 : vector<32x32xi1> to vector<32x32xi32>
    %89 = arith.sitofp %88 : vector<32x32xi32> to vector<32x32xf32>
    %cst_27 = arith.constant dense<0.000000e+00> : vector<32x256xf32>
    %90 = tpu.matmul %89, %84, %cst_27 {dimension_numbers = #tpu.dot_dimension_numbers<[1], [1], [0], [0], [0, 0, 1, 0], [], []>} : vector<32x32xf32>, vector<256x32xf32>, vector<32x256xf32> -> vector<32x256xf32>
    %c0_28 = arith.constant 0 : index
    %c0_29 = arith.constant 0 : index
    %c0_30 = arith.constant 0 : index
    %c0_31 = arith.constant 0 : index
    %91 = vector.load %arg7[%c0_28, %c0_29, %c0_30, %c0_31] : memref<1x1x32x256xf32, #tpu.memory_space<vmem>>, vector<1x1x32x256xf32>
    %92 = vector.shape_cast %91 : vector<1x1x32x256xf32> to vector<32x256xf32>
    %93 = vector.shape_cast %90 : vector<32x256xf32> to vector<1x1x32x256xf32>
    tpu.vector_store %arg7[%c0_28, %c0_29, %c0_30, %c0_31], %93 {strides = array<i32>} : memref<1x1x32x256xf32, #tpu.memory_space<vmem>>, vector<1x1x32x256xf32>,
    %c0_32 = arith.constant 0 : index
    %c0_33 = arith.constant 0 : index
    %c0_34 = arith.constant 0 : index
    %c0_35 = arith.constant 0 : index
    %c0_36 = arith.constant 0 : index
    %94 = vector.load %arg8[%c0_32, %c0_33, %c0_34, %c0_35, %c0_36] : memref<1x1x4x64x1xf32, #tpu.memory_space<vmem>>, vector<1x1x4x64x1xf32>
    %95 = vector.shape_cast %94 : vector<1x1x4x64x1xf32> to vector<4x64x1xf32>
    %96 = vector.shape_cast %78 : vector<4x64x1xf32> to vector<1x1x4x64x1xf32>
    tpu.vector_store %arg8[%c0_32, %c0_33, %c0_34, %c0_35, %c0_36], %96 {strides = array<i32>} : memref<1x1x4x64x1xf32, #tpu.memory_space<vmem>>, vector<1x1x4x64x1xf32>,
    return
  }
  func.func @transform_0(%arg0: i32, %arg1: i32) -> (i32, i32, i32, i32) {
    %c0_i32 = arith.constant 0 : i32
    %c0_i32_0 = arith.constant 0 : i32
    %c0_i32_1 = arith.constant 0 : i32
    return %arg0, %arg1, %c0_i32, %c0_i32_0 : i32, i32, i32, i32
  }
  func.func @transform_1(%arg0: i32, %arg1: i32) -> (i32, i32, i32, i32) {
    %c0_i32 = arith.constant 0 : i32
    %c0_i32_0 = arith.constant 0 : i32
    %c0_i32_1 = arith.constant 0 : i32
    return %arg0, %arg1, %c0_i32, %c0_i32_0 : i32, i32, i32, i32
  }
  func.func @transform_2(%arg0: i32, %arg1: i32) -> (i32, i32, i32, i32) {
    %c0_i32 = arith.constant 0 : i32
    %c0_i32_0 = arith.constant 0 : i32
    %c0_i32_1 = arith.constant 0 : i32
    return %arg0, %arg1, %c0_i32, %c0_i32_0 : i32, i32, i32, i32
  }
  func.func @transform_3(%arg0: i32, %arg1: i32) -> (i32, i32, i32, i32) {
    %c0_i32 = arith.constant 0 : i32
    %c0_i32_0 = arith.constant 0 : i32
    %c0_i32_1 = arith.constant 0 : i32
    return %arg0, %arg1, %c0_i32, %c0_i32_0 : i32, i32, i32, i32
  }
  func.func @transform_4(%arg0: i32, %arg1: i32) -> (i32, i32, i32, i32) {
    %c0_i32 = arith.constant 0 : i32
    %c0_i32_0 = arith.constant 0 : i32
    %c0_i32_1 = arith.constant 0 : i32
    return %arg0, %arg1, %c0_i32, %c0_i32_0 : i32, i32, i32, i32
  }
  func.func @transform_5(%arg0: i32, %arg1: i32) -> (i32, i32, i32, i32) {
    %c0_i32 = arith.constant 0 : i32
    %c0_i32_0 = arith.constant 0 : i32
    %c0_i32_1 = arith.constant 0 : i32
    return %arg0, %arg1, %c0_i32, %c0_i32_0 : i32, i32, i32, i32
  }
  func.func @transform_6(%arg0: i32, %arg1: i32) -> (i32, i32, i32, i32, i32) {
    %c0_i32 = arith.constant 0 : i32
    %c0_i32_0 = arith.constant 0 : i32
    %c0_i32_1 = arith.constant 0 : i32
    %c0_i32_2 = arith.constant 0 : i32
    return %arg0, %arg1, %c0_i32, %c0_i32_0, %c0_i32_1 : i32, i32, i32, i32, i32
  }
}

</mosaic_0001>

<bundles_post_ra>
// kernel: tpu_custom_call.1
= control target key start
LH: loop header
LB: loop body
LE: loop exit
PB: predicated region body
PF: predicated region fallthrough
CT: control target
= control target key end

     0   :  { %12 = vsyncpa [#allocation3], 0  ;;  %s8444_s0 = inlined_call_operand.vmem [shape: bf16[2,8,64,32], index: 0, kind: input, shape index: {}]   ;;  %s8445_s1 = inlined_call_operand.vmem [shape: bf16[2,8,128,32], index: 1, kind: input, shape index: {}]   ;;  %s8446_s2 = inlined_call_operand.vmem [shape: bf16[2,8,128,32], index: 2, kind: input, shape index: {}]   ;;  %s8447_s3 = inlined_call_operand.vmem [shape: s32[2,8,64,6], index: 3, kind: input, shape index: {}]   ;;  %s8448_s4 = inlined_call_operand.vmem [shape: s32[2,8,6,128], index: 4, kind: input, shape index: {}]   ;;  %s8449_s5 = inlined_call_operand.hbm [shape: f32[2,2,32,256], index: 5, kind: output, shape index: {0}]   ;;  %s8450_s6 = inlined_call_operand.vmem [shape: f32[2,2,4,64,1], index: 6, kind: output, shape index: {1}]  }
   0x1   :  { %14 = vsyncpa [#allocation3 + $0x1], 0  ;;  %s5733_s21 = smov 0   ;;  %s5735_s22 = smov 0  }
   0x2   :  { %s5737_s23 = smov 0   ;;  %s5739_s24 = smov 0  }
   0x3   :  { %s5741_s25 = smov 0   ;;  %s5743_s26 = smov 0  }
   0x4   :  { %s5745_s27 = smov 0   ;;  %s5747_s28 = smov 0  }
   0x5 LB: > { %8549 = sst [smem:[#allocation5_spill]] %s5678_s26  ;;  %s4309_s29 = sadd.s32 4294967295, %s5686_s28   ;;  %s5686_s28 = sphi %s5747_s28, %s20_s28   ;;  %s5682_s27 = sphi %s5745_s27, %s8958_s27   ;;  %s5678_s26 = sphi %s5743_s26, %s8957_s26   ;;  %s5674_s25 = sphi %s5741_s25, %s8956_s25   ;;  %s5670_s24 = sphi %s5739_s24, %s8955_s24   ;;  %s5666_s23 = sphi %s5737_s23, %s8961_s23   ;;  %s5662_s22 = sphi %s5735_s22, %s8960_s22   ;;  %s5658_s21 = sphi %s5733_s21, %s8959_s21  }
   0x6   : > { %8550 = sst [smem:[#allocation6_spill]] %s5682_s27  ;;  %s4310_s30 = sadd.s32 4294967294, %s5686_s28  }
   0x7   : > { %s29_s7 = sadd.s32 1, %s5678_s26  ;;  %s32_s8 = sadd.s32 1, %s5682_s27 }
   0x8   : > { %p30_p0 = scmp.ge.s32.totalorder %s29_s7, 2  ;;  %p191_p1 = scmp.ne.s32.totalorder %s5666_s23, %s5662_s22 }
   0x9   : > { %p192_p2 = scmp.eq.s32.totalorder %s4309_s29, 3  ;;  %p197_p5 = scmp.ne.s32.totalorder %s5662_s22, %s5658_s21 }
   0xa   : > { %s8963_s7 = smov (%p30_p0, %s29_s7), 0  ;;  %s8965_s8 = smov (!%p30_p0, %s32_s8), %s5682_s27 }
   0xb   : > { %8551 = sst [smem:[#allocation7_spill]] %s8963_s7  ;;  %s177_s9 = ssub.s32 %s5678_s26, %s8963_s7 }
   0xc   : > { %p5784_p3 = por %p192_p2, %p191_p1  ;;  %p34_p4 = scmp.ge.s32.totalorder %s8965_s8, 2 }
   0xd   : > { %p198_p6 = scmp.eq.s32.totalorder %s4310_s30, 3  ;;  %p4313_p7 = scmp.ge.s32.totalorder %s5686_s28, 1 }
   0xe   : > { %s8967_s8 = smov (%p34_p4, %s8965_s8), 0  ;;  %p313_p9 = scmp.lt.s32.totalorder %s5686_s28, 5 }
   0xf   : > { %8553 = sst [smem:[#allocation8_spill]] %s8967_s8  ;;  %p5793_p8 = por %p198_p6, %p197_p5 }
  0x10   : > { %s176_s12 = ssub.s32 %s5682_s27, %s8967_s8  ;;  %s181_s13 = sadd.s32 1, %s5666_s23 }
  0x11   : > { %s178_s14 = sor.u32 %s177_s9, %s176_s12  ;;  %p314_p10 = pnand %p4313_p7, %p313_p9 }
  0x12   : > { %p179_p11 = scmp.eq.s32.totalorder %s178_s14, 0 }
  0x13   : > { %317 = sbr.rel (%p314_p10) target bundleno = 1711 (0x6af), region = 40 }
  0x14   : > { %s5802_s15 = scalar_select %p179_p11, %s5666_s23, %s181_s13  }
  0x1a   : > { %s4315_s16 = sshll.u32 %s5670_s24, 2  ;;  %p397_p12 = scmp.lt.s32.totalorder %s5674_s25, 1  ;;  %v8462_v0 = vmov 2   ;;  %vm680_vm0 = vcmask 261120   ;;  %v8466_v6 = vmov 3   ;;  %v8455_v7 = vlaneseq }
  0x1b   : > { %5160 = vset.pattern.permute.xlu0 %v8462_v0  ;;  %5159 = vset.pattern.permute.xlu1 %v8462_v0  ;;  %p399_p13 = scmp.lt.s32.totalorder %s4315_s16, 7  ;;  %v8458_v26 = vmov 4   ;;  %v8456_v36 = vmov 5   ;;  %v8460_v45 = vmov 1   ;;  %p452_p0 = scmp.lt.s32.totalorder %s5670_s24, 1 }
  0x1c   : > { %s5809_s17 = scalar_select %p397_p12, %s5674_s25, 1  ;;  %v5860_v11 = vshrl.u32 %v8455_v7, 7 }
  0x1d   : > { %s8969_s16 = smov (!%p399_p13, %s4315_s16), 7 }
  0x1e   : > { %s4317_s18 = sshll.u32 %s5809_s17, 6  ;;  %s4321_s19 = sshll.u32 %s5809_s17, 7  ;;  %8555 = vst [vmem:[#allocation9_spill] sm:$0xff] %v5860_v11  ;;  %v5884_v16 = vsub.s32 2, %v5860_v11 }
  0x1f   : > { %s4316_s20 = sshll.u32 %s8969_s16, 3  ;;  %s4320_s29 = sshll.u32 %s8969_s16, 4 }
  0x20   : > { %s5815_s30 = sadd.s32 %s4317_s18, %s4316_s20  ;;  %s5817_s9 = sadd.s32 %s4321_s19, %s4320_s29 }
  0x21   : > { %s4322_s12 = sshll.u32 %s5817_s9, 2  ;;  %s4330_s13 = sshll.u32 %s5815_s30, 3 }
  0x22   : > { %s5826_s7 = scalar_lea.vmem %s8445_s1, %s4322_s12  ;;  %s5831_s20 = scalar_lea.vmem %s8447_s3, %s4330_s13 }
  0x23   : > { %v5225_v1 = vld [vmem:[%s5826_s7] sm:$0xff]   ;;  %s4332_s19 = sshll.u32 %s5809_s17, 3  ;;  %v5836_v2 = vld [vmem:[%s5831_s20 + $0x8] sm:$0xff]  ;;  %v5847_v5 = vld [vmem:[%s5831_s20 + $0x10] sm:$0xff]  ;;  %s4318_s13 = sshll.u32 %s5815_s30, 2 }
  0x24   : > { %v5839_v3 = vld [vmem:[%s5831_s20] sm:$0xff]  ;;  %s5841_s8 = sadd.s32 %s4332_s19, %s8969_s16  ;;  %1849 = vperm.xlu0 %5160, %v5836_v2   ;;  %v694_v4 = vsel %vm680_vm0, %v5225_v1, 0  ;;  %5047 = vmatprep.subr.msk.bf16.mxu0 %vm680_vm0, %v5225_v1  ;;  %v5226_v9 = vld [vmem:[%s5826_s7 + $0x8] sm:$0xff]   ;;  %v5227_v10 = vld [vmem:[%s5826_s7 + $0x10] sm:$0xff]   ;;  %s5966_s27 = scalar_lea.vmem %s8446_s2, %s4322_s12 }
  0x25   : > { %1846 = vperm.xlu1 %5159, %v5839_v3   ;;  %4808 = vmatpush3.bf16.xpose.msra.mxu0 %v694_v4  ;;  %v5854_v8 = vld [vmem:[%s5831_s20 + $0x20] sm:$0xff]  ;;  %v697_v13 = vsel %vm680_vm0, %v5226_v9, 0  ;;  %s4333_s26 = sshll.u32 %s5841_s8, 3  ;;  %v5870_v14 = vld [vmem:[%s5831_s20 + $0x18] sm:$0xff]  ;;  %v5876_v15 = vld [vmem:[%s5831_s20 + $0x90] sm:$0xff]  ;;  %v700_v18 = vsel %vm680_vm0, %v5227_v10, 0  ;;  %s5913_s8 = scalar_lea.vmem %s8444_s0, %s4318_s13 }
  0x26   : > { %v5864_v12 = vld [vmem:[%s5831_s20 + $0x80] sm:$0xff]  ;;  %5048 = vmatprep.subr.msk.bf16.mxu0 %vm680_vm0, %v5226_v9  ;;  %s5881_s29 = scalar_lea.vmem %s8448_s4, %s4333_s26  ;;  %v5228_v19 = vld [vmem:[%s5826_s7 + $0x18] sm:$0xff]   ;;  %v5895_v21 = vld [vmem:[%s5831_s20 + $0x50] sm:$0xff]  ;;  %s4666_s19 = sshll.u32 %s5670_s24, 3 }
  0x27   : > { %v1331_v17 = vld [vmem:[%s5881_s29 + $0x10] sm:$0x3f]  ;;  %v5229_v22 = vld [vmem:[%s5826_s7 + $0x20] sm:$0xff]   ;;  %v5903_v23 = vld [vmem:[%s5831_s20 + $0xa8] sm:$0xff]  ;;  %v703_v27 = vsel %vm680_vm0, %v5228_v19, 0 }
  0x28   : > { %1852 = vperm.xlu0 %5160, %v5847_v5   ;;  %v5891_v20 = vrot.slane %v1331_v17, %v5884_v16  ;;  %v1330_v24 = vld [vmem:[%s5881_s29 + $0x8] sm:$0x3f]  ;;  %v5233_v28 = vld [vmem:[%s5913_s8] sm:$0xff]   ;;  %v5921_v29 = vld [vmem:[%s5831_s20 + $0xb8] sm:$0xff]  ;;  %v706_v30 = vsel %vm680_vm0, %v5229_v22, 0 }
  0x29   : > { %5161 = vset.pattern.permute.xlu1 %v8466_v6  ;;  %v5908_v25 = vrot.slane %v1330_v24, %v5884_v16  ;;  %4823 = vmatprep.mubr.msk.bf16.mxu0 %vm680_vm0, %v5233_v28  ;;  %v5926_v31 = vld [vmem:[%s5831_s20 + $0x68] sm:$0xff]  ;;  %v5935_v33 = vld [vmem:[%s5831_s20 + $0x70] sm:$0xff]  ;;  %v5232_v38 = vld [vmem:[%s5826_s7 + $0x38] sm:$0xff]  }
  0x2a   : > { %2086 = vperm.xlu1 %5161, %v5839_v3   ;;  %8556 = vst [vmem:[#allocation10_spill] sm:$0xff] %v5891_v20  ;;  %v5230_v32 = vld [vmem:[%s5826_s7 + $0x28] sm:$0xff]   ;;  %v5231_v37 = vld [vmem:[%s5826_s7 + $0x30] sm:$0xff]   ;;  %v5948_v39 = vld [vmem:[%s5831_s20 + $0xd8] sm:$0xff]  ;;  %v715_v43 = vsel %vm680_vm0, %v5232_v38, 0 }
  0x2b   : > { %v709_v34 = vsel %vm680_vm0, %v5230_v32, 0  ;;  %v5939_v35 = vld [vmem:[%s5831_s20 + $0xc8] sm:$0xff]  ;;  %v1332_v40 = vld [vmem:[%s5881_s29 + $0x18] sm:$0x3f]  ;;  %v712_v42 = vsel %vm680_vm0, %v5231_v37, 0  ;;  %v1325_v44 = vld [vmem:[%s5831_s20 + $0xe0] sm:$0xff] }
  0x2c   : > { %1858 = vperm.xlu0 %5160, %v5854_v8   ;;  %v5953_v41 = vrot.slane %v1332_v40, %v5884_v16  ;;  %v5971_v46 = vld [vmem:[%s5831_s20 + $0xf0] sm:$0xff]  ;;  %v5978_v47 = vld [vmem:[%s5831_s20 + $0x28] sm:$0xff]  ;;  %v1304_v52 = vld [vmem:[%s5831_s20 + $0x38] sm:$0xff] }
  0x2d   : > { %4810 = vmatpush3.bf16.xpose.msra.mxu0 %v697_v13  ;;  %v5234_v48 = vld [vmem:[%s5913_s8 + $0x8] sm:$0xff]   ;;  %v5986_v49 = vld [vmem:[%s5831_s20 + $0x30] sm:$0xff]  ;;  %v6005_v53 = vld [vmem:[%s5831_s20 + $0x58] sm:$0xff] }
  0x2e   : > { %2089 = vperm.xlu1 %5161, %v5836_v2   ;;  %5049 = vmatprep.subr.msk.bf16.mxu0 %vm680_vm0, %v5227_v10  ;;  %8557 = vst [vmem:[#allocation11_spill] sm:$0xff] %v5953_v41  ;;  %v5992_v50 = vld [vmem:[%s5831_s20 + $0x88] sm:$0xff]  ;;  %v6017_v55 = vld [vmem:[%s5831_s20 + $0xf8] sm:$0xff]  ;;  %v6031_v56 = vld [vmem:[%s5831_s20 + $0x40] sm:$0xff] }
  0x2f   : > { %v6000_v51 = vld [vmem:[%s5831_s20 + $0x48] sm:$0xff]  ;;  %v6037_v57 = vld [vmem:[%s5831_s20 + $0x98] sm:$0xff]  ;;  %v6043_v58 = vld [vmem:[%s5831_s20 + $0xa0] sm:$0xff] }
  0x30   : > { %1894 = vperm.xlu0 %5160, %v5864_v12   ;;  %v6012_v54 = vld [vmem:[%s5831_s20 + $0xe8] sm:$0xff]  ;;  %v6048_v59 = vld [vmem:[%s5831_s20 + $0xb0] sm:$0xff] }
  0x32   : > { %5162 = vset.pattern.permute.xlu1 %v8462_v0 }
  0x33   : > { %1855 = vperm.xlu1 %5162, %v5870_v14  }
  0x34   : > { %1900 = vperm.xlu0 %5160, %v5876_v15  }
  0x35   : > { %4812 = vmatpush3.bf16.xpose.msra.mxu0 %v700_v18 }
  0x36   : > { %5050 = vmatprep.subr.msk.bf16.mxu0 %vm680_vm0, %v5228_v19 }
  0x37   : > { %5163 = vset.pattern.permute.xlu1 %v8466_v6 }
  0x38   : > { %2095 = vperm.xlu1 %5163, %v5870_v14   ;;  %1876 = vperm.xlu0 %5160, %v5895_v21  }
  0x3c   : > { %5164 = vset.pattern.permute.xlu1 %v8458_v26  ;;  %1909 = vperm.xlu0 %5160, %v5903_v23  }
  0x3d   : > { %2326 = vperm.xlu1 %5164, %v5839_v3   ;;  %4814 = vmatpush3.bf16.xpose.msra.mxu0 %v703_v27 }
  0x3e   : > { %5051 = vmatprep.subr.msk.bf16.mxu0 %vm680_vm0, %v5229_v22 }
  0x40   : > { %1915 = vperm.xlu0 %5160, %v5921_v29  }
  0x41   : > { %2332 = vperm.xlu1 %5164, %v5847_v5  }
  0x44   : > { %1885 = vperm.xlu0 %5160, %v5926_v31  }
  0x45   : > { %2335 = vperm.xlu1 %5164, %v5870_v14   ;;  %4816 = vmatpush3.bf16.xpose.msra.mxu0 %v706_v30 }
  0x46   : > { %5052 = vmatprep.subr.msk.bf16.mxu0 %vm680_vm0, %v5230_v32 }
  0x48   : > { %1888 = vperm.xlu0 %5160, %v5935_v33  }
  0x49   : > { %5165 = vset.pattern.permute.xlu1 %v8456_v36 }
  0x4a   : > { %2569 = vperm.xlu1 %5165, %v5836_v2  }
  0x4c   : > { %1921 = vperm.xlu0 %5160, %v5939_v35  }
  0x4d   : > { %4818 = vmatpush3.bf16.xpose.msra.mxu0 %v709_v34 }
  0x4e   : > { %2572 = vperm.xlu1 %5165, %v5847_v5   ;;  %5053 = vmatprep.subr.msk.bf16.mxu0 %vm680_vm0, %v5231_v37 }
  0x50   : > { %1927 = vperm.xlu0 %5160, %v5948_v39  }
  0x52   : > { %5166 = vset.pattern.permute.xlu1 %v8460_v45 }
  0x53   : > { %1574 = vperm.xlu1 %5166, %v5839_v3  }
  0x54   : > { %1930 = vperm.xlu0 %5160, %v1325_v44  }
  0x55   : > { %4820 = vmatpush3.bf16.xpose.msra.mxu0 %v712_v42 }
  0x56   : > { %5054 = vmatprep.subr.msk.bf16.mxu0 %vm680_vm0, %v5232_v38 }
  0x57   : > { %1580 = vperm.xlu1 %5166, %v5847_v5  }
  0x58   : > { %1936 = vperm.xlu0 %5160, %v5971_v46  }
  0x5b   : > { %1583 = vperm.xlu1 %5166, %v5870_v14  }
  0x5c   : > { %5210 = vset.pattern.permute.xlu0 %v8466_v6 }
  0x5d   : > { %2092 = vperm.xlu0 %5210, %v5847_v5   ;;  %4822 = vmatpush3.bf16.xpose.msra.mxu0 %v715_v43 }
  0x5f   : > { %5167 = vset.pattern.permute.xlu1 %v8462_v0 }
  0x60   : > { %1861 = vperm.xlu1 %5167, %v5978_v47  }
  0x61   : > { %2101 = vperm.xlu0 %5210, %v5978_v47  }
  0x64   : > { %5168 = vset.pattern.permute.xlu1 %v8466_v6  ;;  %4824 = vmatmul.mubr.msk.bf16.vlgmr.msra.gmra.mrb[0].mxu0 %vm680_vm0, %v5234_v48 }
  0x65   : > { %2098 = vperm.xlu1 %5168, %v5854_v8   ;;  %2104 = vperm.xlu0 %5210, %v5986_v49  }
  0x69   : > { %5169 = vset.pattern.permute.xlu1 %v8462_v0  ;;  %2137 = vperm.xlu0 %5210, %v5992_v50  }
  0x6a   : > { %1864 = vperm.xlu1 %5169, %v5986_v49  }
  0x6d   : > { %2113 = vperm.xlu0 %5210, %v6000_v51  }
  0x6e   : > { %1867 = vperm.xlu1 %5169, %v1304_v52  }
  0x71   : > { %2119 = vperm.xlu0 %5210, %v6005_v53  }
  0x72   : > { %5170 = vset.pattern.permute.xlu1 %v8466_v6 }
  0x73   : > { %2107 = vperm.xlu1 %5170, %v1304_v52  }
  0x75   : > { %2128 = vperm.xlu0 %5210, %v5935_v33  }
  0x77   : > { %5171 = vset.pattern.permute.xlu1 %v8458_v26 }
  0x78   : > { %2341 = vperm.xlu1 %5171, %v5978_v47  }
  0x79   : > { %2173 = vperm.xlu0 %5210, %v6012_v54  }
  0x7c   : > { %2344 = vperm.xlu1 %5171, %v5986_v49  }
  0x7d   : > { %2179 = vperm.xlu0 %5210, %v6017_v55  }
  0x80   : > { %5172 = vset.pattern.permute.xlu1 %v8456_v36 }
  0x81   : > { %2578 = vperm.xlu1 %5172, %v5854_v8   ;;  %5213 = vset.pattern.permute.xlu0 %v8460_v45 }
  0x82   : > { %1577 = vperm.xlu0 %5213, %v5836_v2  }
  0x85   : > { %2584 = vperm.xlu1 %5172, %v5986_v49  }
  0x86   : > { %1586 = vperm.xlu0 %5213, %v5854_v8  }
  0x89   : > { %2587 = vperm.xlu1 %5172, %v1304_v52  }
  0x8a   : > { %1595 = vperm.xlu0 %5213, %v1304_v52  }
  0x8d   : > { %5173 = vset.pattern.permute.xlu1 %v8462_v0 }
  0x8e   : > { %1897 = vperm.xlu1 %5173, %v5992_v50   ;;  %1622 = vperm.xlu0 %5213, %v5864_v12  }
  0x92   : > { %5174 = vset.pattern.permute.xlu1 %v8466_v6  ;;  %1598 = vperm.xlu0 %5213, %v6031_v56  }
  0x93   : > { %2134 = vperm.xlu1 %5174, %v5864_v12  }
  0x96   : > { %1631 = vperm.xlu0 %5213, %v6037_v57  }
  0x97   : > { %5175 = vset.pattern.permute.xlu1 %v8462_v0 }
  0x98   : > { %1870 = vperm.xlu1 %5175, %v6031_v56  }
  0x9a   : > { %1634 = vperm.xlu0 %5213, %v6043_v58  }
  0x9c   : > { %1873 = vperm.xlu1 %5175, %v6000_v51  }
  0x9e   : > { %1640 = vperm.xlu0 %5213, %v6048_v59  }
  0xa0   : > { %1903 = vperm.xlu1 %5175, %v6037_v57  }
  0xa2   : > { %1613 = vperm.xlu0 %5213, %v5926_v31  }
  0xa3   : > { %v6056_v61 = vpop.permute.xlu0 %1849 }
  0xa4   : > { %5176 = vset.pattern.permute.xlu1 %v8466_v6  ;;  %v6054_v60 = vpop.permute.xlu1 %1846 }
  0xa5   : > { %2110 = vperm.xlu1 %5176, %v6031_v56  }
  0xa6   : > { %1655 = vperm.xlu0 %5213, %v5948_v39  }
  0xa7   : > { %v6060_v62 = vpop.permute.xlu0 %1852 }
  0xa9   : > { %2140 = vperm.xlu1 %5176, %v5876_v15   ;;  %v6063_v63 = vpop.permute.xlu1 %2086 }
  0xaa   : > { %5215 = vset.pattern.permute.xlu0 %v8458_v26 }
  0xab   : > { %2329 = vperm.xlu0 %5215, %v5836_v2   ;;  %v6067_v1 = vpop.permute.xlu0 %1858 }
  0xad   : > { %2143 = vperm.xlu1 %5176, %v6037_v57   ;;  %v6070_v4 = vpop.permute.xlu1 %2089 }
  0xaf   : > { %2338 = vperm.xlu0 %5215, %v5854_v8   ;;  %v6073_v5 = vpop.permute.xlu0 %1894 }
  0xb1   : > { %5177 = vset.pattern.permute.xlu1 %v8462_v0 }
  0xb2   : > { %1879 = vperm.xlu1 %5177, %v6005_v53   ;;  %v6077_v9 = vpop.permute.xlu1 %1855 }
  0xb3   : > { %2347 = vperm.xlu0 %5215, %v1304_v52   ;;  %v6079_v10 = vpop.permute.xlu0 %1900 }
  0xb6   : > { %5178 = vset.pattern.permute.xlu1 %v8466_v6 }
  0xb7   : > { %2116 = vperm.xlu1 %5178, %v5895_v21   ;;  %v6083_v13 = vpop.permute.xlu1 %2095  ;;  %2350 = vperm.xlu0 %5215, %v6031_v56   ;;  %v6086_v8 = vpop.permute.xlu0 %1876 }
  0xbb   : > { %5179 = vset.pattern.permute.xlu1 %v8458_v26  ;;  %2383 = vperm.xlu0 %5215, %v6037_v57   ;;  %v6093_v18 = vpop.permute.xlu0 %1909 }
  0xbc   : > { %2374 = vperm.xlu1 %5179, %v5864_v12   ;;  %v6091_v17 = vpop.permute.xlu1 %2326 }
  0xbf   : > { %2359 = vperm.xlu0 %5215, %v6005_v53   ;;  %v6099_v22 = vpop.permute.xlu0 %1915 }
  0xc0   : > { %2377 = vperm.xlu1 %5179, %v5992_v50   ;;  %v6097_v19 = vpop.permute.xlu1 %2332 }
  0xc3   : > { %2389 = vperm.xlu0 %5215, %v5903_v23   ;;  %v6105_v27 = vpop.permute.xlu0 %1885 }
  0xc4   : > { %2353 = vperm.xlu1 %5179, %v6000_v51   ;;  %v6103_v24 = vpop.permute.xlu1 %2335 }
  0xc7   : > { %2392 = vperm.xlu0 %5215, %v6048_v59   ;;  %v6109_v28 = vpop.permute.xlu0 %1888 }
  0xc8   : > { %2380 = vperm.xlu1 %5179, %v5876_v15   ;;  %8558 = vst [vmem:[#allocation12_spill] sm:$0xff] %v6109_v28  ;;  %v6579_v28 = vld [vmem:[%s5831_s20 + $0xc8] sm:$0xff] }
  0xc9   : > { %v6111_v30 = vpop.permute.xlu1 %2569 }
  0xcb   : > { %2365 = vperm.xlu0 %5215, %v5926_v31   ;;  %v6115_v32 = vpop.permute.xlu0 %1921 }
  0xcc   : > { %2356 = vperm.xlu1 %5179, %v5895_v21   ;;  %8559 = vst [vmem:[#allocation13_spill] sm:$0xff] %v6115_v32 }
  0xcd   : > { %v6117_v34 = vpop.permute.xlu1 %2572 }
  0xcf   : > { %2401 = vperm.xlu0 %5215, %v5939_v35   ;;  %v6121_v37 = vpop.permute.xlu0 %1927 }
  0xd0   : > { %5180 = vset.pattern.permute.xlu1 %v8456_v36  ;;  %8560 = vst [vmem:[#allocation14_spill] sm:$0xff] %v6121_v37 }
  0xd1   : > { %2614 = vperm.xlu1 %5180, %v5864_v12  }
  0xd2   : > { %v6124_v38 = vpop.permute.xlu1 %1574 }
  0xd3   : > { %2416 = vperm.xlu0 %5215, %v5971_v46   ;;  %v6127_v40 = vpop.permute.xlu0 %1930 }
  0xd4   : > { %8561 = vst [vmem:[#allocation15_spill] sm:$0xff] %v6127_v40  ;;  %v8577_v40 = vmov 1  }
  0xd5   : > { %2590 = vperm.xlu1 %5180, %v6031_v56  }
  0xd6   : > { %v6130_v42 = vpop.permute.xlu1 %1580 }
  0xd7   : > { %5217 = vset.pattern.permute.xlu0 %v8456_v36  ;;  %v6133_v43 = vpop.permute.xlu0 %1936 }
  0xd8   : > { %8562 = vst [vmem:[#allocation16_spill] sm:$0xff] %v6133_v43  ;;  %2566 = vperm.xlu0 %5217, %v5839_v3   ;;  %v5235_v43 = vld [vmem:[%s5826_s7 + $0x40] sm:$0xff]  }
  0xd9   : > { %2593 = vperm.xlu1 %5180, %v6000_v51   ;;  %5055 = vmatprep.subr.msk.bf16.mxu1 %vm680_vm0, %v5235_v43 }
  0xda   : > { %v6137_v44 = vpop.permute.xlu1 %1583 }
  0xdc   : > { %v6139_v12 = vpop.permute.xlu0 %2092  ;;  %2575 = vperm.xlu0 %5217, %v5870_v14  }
  0xdd   : > { %2623 = vperm.xlu1 %5180, %v6037_v57  }
  0xdf   : > { %v6143_v46 = vpop.permute.xlu1 %1861 }
  0xe0   : > { %8563 = vst [vmem:[#allocation17_spill] sm:$0xff] %v6143_v46  ;;  %v6145_v48 = vpop.permute.xlu0 %2101  ;;  %2581 = vperm.xlu0 %5217, %v5978_v47  }
  0xe1   : > { %8564 = vst [vmem:[#allocation18_spill] sm:$0xff] %v6145_v48  ;;  %2599 = vperm.xlu1 %5180, %v6005_v53  }
  0xe4   : > { %v6149_v52 = vpop.permute.xlu1 %2098  ;;  %2617 = vperm.xlu0 %5217, %v5992_v50   ;;  %v6153_v56 = vpop.permute.xlu0 %2104 }
  0xe5   : > { %8565 = vst [vmem:[#allocation19_spill] sm:$0xff] %v6149_v52  ;;  %5181 = vset.pattern.permute.xlu1 %v8460_v45  ;;  %8566 = vst [vmem:[#allocation20_spill] sm:$0xff] %v6153_v56  ;;  %v6180_v45 = vld [vmem:[%s5831_s20 + $0x60] sm:$0xff] }
  0xe6   : > { %1589 = vperm.xlu1 %5181, %v5978_v47  }
  0xe8   : > { %2620 = vperm.xlu0 %5217, %v5876_v15   ;;  %v6159_v57 = vpop.permute.xlu0 %2137 }
  0xe9   : > { %v6157_v14 = vpop.permute.xlu1 %1864  ;;  %8568 = vst [vmem:[#allocation22_spill] sm:$0xff] %v6159_v57 }
  0xea   : > { %8567 = vst [vmem:[#allocation21_spill] sm:$0xff] %v6157_v14  ;;  %1592 = vperm.xlu1 %5181, %v5986_v49   ;;  %v6202_v14 = vld [vmem:[%s5831_s20 + $0xc0] sm:$0xff] }
  0xec   : > { %2596 = vperm.xlu0 %5217, %v5895_v21   ;;  %v6165_v36 = vpop.permute.xlu0 %2113 }
  0xed   : > { %v6163_v7 = vpop.permute.xlu1 %1867  ;;  %8570 = vst [vmem:[#allocation24_spill] sm:$0xff] %v6165_v36 }
  0xee   : > { %8569 = vst [vmem:[#allocation23_spill] sm:$0xff] %v6163_v7  ;;  %5182 = vset.pattern.permute.xlu1 %v8462_v0  ;;  %v5237_v7 = vld [vmem:[%s5826_s7 + $0x50] sm:$0xff]  }
  0xef   : > { %1906 = vperm.xlu1 %5182, %v6043_v58  }
  0xf0   : > { %2626 = vperm.xlu0 %5217, %v6043_v58   ;;  %v6170_v47 = vpop.permute.xlu0 %2119 }
  0xf1   : > { %8571 = vst [vmem:[#allocation25_spill] sm:$0xff] %v6170_v47  ;;  %v6192_v47 = vld [vmem:[%s5831_s20 + $0x78] sm:$0xff] }
  0xf2   : > { %v6172_v26 = vpop.permute.xlu1 %2107 }
  0xf3   : > { %8572 = vst [vmem:[#allocation26_spill] sm:$0xff] %v6172_v26  ;;  %5183 = vset.pattern.permute.xlu1 %v8466_v6  ;;  %v855_v6 = vsel %vm680_vm0, %v5235_v43, 0  ;;  %v8580_v43 = vmov 2  }
  0xf4   : > { %2146 = vperm.xlu1 %5183, %v6043_v58   ;;  %2635 = vperm.xlu0 %5217, %v5921_v29   ;;  %v6177_v49 = vpop.permute.xlu0 %2128 }
  0xf5   : > { %8573 = vst [vmem:[#allocation27_spill] sm:$0xff] %v6177_v49  ;;  %4832 = vmatpush3.bf16.xpose.msra.mxu1 %v855_v6 }
  0xf7   : > { %v6182_v0 = vpop.permute.xlu1 %2341 }
  0xf8   : > { %8574 = vst [vmem:[#allocation28_spill] sm:$0xff] %v6182_v0  ;;  %2149 = vperm.xlu1 %5183, %v5903_v23   ;;  %2602 = vperm.xlu0 %5217, %v6180_v45   ;;  %v6187_v52 = vpop.permute.xlu0 %2173 }
  0xf9   : > { %8575 = vst [vmem:[#allocation29_spill] sm:$0xff] %v6187_v52  ;;  %v5236_v52 = vld [vmem:[%s5826_s7 + $0x48] sm:$0xff]  }
  0xfa   : > { %v858_v6 = vsel %vm680_vm0, %v5236_v52, 0  ;;  %5056 = vmatprep.subr.msk.bf16.mxu1 %vm680_vm0, %v5236_v52  ;;  %v861_v52 = vsel %vm680_vm0, %v5237_v7, 0 }
  0xfb   : > { %v6194_v49 = vpop.permute.xlu1 %2344 }
  0xfc   : > { %8576 = vst [vmem:[#allocation30_spill] sm:$0xff] %v6194_v49  ;;  %5184 = vset.pattern.permute.xlu1 %v8577_v40  ;;  %2611 = vperm.xlu0 %5217, %v6192_v47   ;;  %v6199_v0 = vpop.permute.xlu0 %2179 }
  0xfd   : > { %1625 = vperm.xlu1 %5184, %v5992_v50   ;;  %8578 = vst [vmem:[#allocation31_spill] sm:$0xff] %v6199_v0  ;;  %4834 = vmatpush3.bf16.xpose.msra.mxu1 %v858_v6  ;;  %v8582_v0 = vmov 3  }
  0xfe   : > { %5057 = vmatprep.subr.msk.bf16.mxu1 %vm680_vm0, %v5237_v7 }
 0x100   : > { %v6205_v36 = vpop.permute.xlu1 %2578  ;;  %2638 = vperm.xlu0 %5217, %v6202_v14  }
 0x101   : > { %8579 = vst [vmem:[#allocation32_spill] sm:$0xff] %v6205_v36  ;;  %5185 = vset.pattern.permute.xlu1 %v8580_v43  ;;  %v6211_v49 = vpop.permute.xlu0 %1577 }
 0x102   : > { %1912 = vperm.xlu1 %5185, %v6048_v59  }
 0x104   : > { %v6214_v50 = vpop.permute.xlu1 %2584  ;;  %2647 = vperm.xlu0 %5217, %v5948_v39   ;;  %v8473_v39 = vmov 0  }
 0x105   : > { %8581 = vst [vmem:[#allocation33_spill] sm:$0xff] %v6214_v50  ;;  %v6218_v36 = vpop.permute.xlu0 %1586  ;;  %4836 = vmatpush3.bf16.xpose.msra.mxu1 %v861_v52 }
 0x106   : > { %5186 = vset.pattern.permute.xlu1 %v8582_v0  ;;  %8583 = vst [vmem:[#allocation34_spill] sm:$0xff] %v6218_v36 }
 0x107   : > { %2152 = vperm.xlu1 %5186, %v6048_v59  }
 0x108   : > { %v6222_v57 = vpop.permute.xlu1 %2587  ;;  %2653 = vperm.xlu0 %5217, %v6012_v54  }
 0x109   : > { %8584 = vst [vmem:[#allocation35_spill] sm:$0xff] %v6222_v57  ;;  %v6227_v6 = vpop.permute.xlu0 %1595  ;;  %v5238_v57 = vld [vmem:[%s5826_s7 + $0x58] sm:$0xff]  }
 0x10a   : > { %8585 = vst [vmem:[#allocation36_spill] sm:$0xff] %v6227_v6  ;;  %5058 = vmatprep.subr.msk.bf16.mxu1 %vm680_vm0, %v5238_v57  ;;  %v864_v7 = vsel %vm680_vm0, %v5238_v57, 0  ;;  %v5239_v6 = vld [vmem:[%s5826_s7 + $0x60] sm:$0xff]  }
 0x10b   : > { %2155 = vperm.xlu1 %5186, %v5921_v29  }
 0x10c   : > { %5219 = vset.pattern.permute.xlu0 %v8473_v39 }
 0x10d   : > { %v6231_v36 = vpop.permute.xlu1 %1897  ;;  %1334 = vperm.xlu0 %5219, %v5839_v3   ;;  %v6234_v50 = vpop.permute.xlu0 %1622  ;;  %4838 = vmatpush3.bf16.xpose.msra.mxu1 %v864_v7 }
 0x10e   : > { %8586 = vst [vmem:[#allocation37_spill] sm:$0xff] %v6231_v36  ;;  %8587 = vst [vmem:[#allocation38_spill] sm:$0xff] %v6234_v50  ;;  %5059 = vmatprep.subr.msk.bf16.mxu1 %vm680_vm0, %v5239_v6 }
 0x10f   : > { %5187 = vset.pattern.permute.xlu1 %v8577_v40 }
 0x110   : > { %1601 = vperm.xlu1 %5187, %v6000_v51   ;;  %v8592_v51 = vmov 4  }
 0x111   : > { %1337 = vperm.xlu0 %5219, %v5836_v2   ;;  %v6244_v39 = vpop.permute.xlu0 %1598  ;;  %v867_v2 = vsel %vm680_vm0, %v5239_v6, 0 }
 0x112   : > { %v6242_v52 = vpop.permute.xlu1 %2134  ;;  %8589 = vst [vmem:[#allocation40_spill] sm:$0xff] %v6244_v39 }
 0x113   : > { %8588 = vst [vmem:[#allocation39_spill] sm:$0xff] %v6242_v52  ;;  %v5246_v52 = vld [vmem:[%s5826_s7 + $0x90] sm:$0xff]  }
 0x114   : > { %1628 = vperm.xlu1 %5187, %v5876_v15  }
 0x115   : > { %v6247_v3 = vpop.permute.xlu0 %1631  ;;  %4840 = vmatpush3.bf16.xpose.msra.mxu1 %v867_v2 }
 0x116   : > { %8590 = vst [vmem:[#allocation41_spill] sm:$0xff] %v6247_v3 }
 0x117   : > { %v6249_v50 = vpop.permute.xlu1 %1870 }
 0x118   : > { %8591 = vst [vmem:[#allocation42_spill] sm:$0xff] %v6249_v50  ;;  %5188 = vset.pattern.permute.xlu1 %v8592_v51 }
 0x119   : > { %2386 = vperm.xlu1 %5188, %v6043_v58   ;;  %v6256_v57 = vpop.permute.xlu0 %1634  ;;  %v5240_v58 = vld [vmem:[%s5826_s7 + $0x68] sm:$0xff]  }
 0x11a   : > { %8593 = vst [vmem:[#allocation43_spill] sm:$0xff] %v6256_v57  ;;  %5060 = vmatprep.subr.msk.bf16.mxu1 %vm680_vm0, %v5240_v58  ;;  %v870_v6 = vsel %vm680_vm0, %v5240_v58, 0 }
 0x11b   : > { %v6258_v39 = vpop.permute.xlu1 %1873 }
 0x11c   : > { %8594 = vst [vmem:[#allocation44_spill] sm:$0xff] %v6258_v39 }
 0x11d   : > { %5189 = vset.pattern.permute.xlu1 %v8577_v40  ;;  %v6262_v15 = vpop.permute.xlu0 %1640  ;;  %4842 = vmatpush3.bf16.xpose.msra.mxu1 %v870_v6 }
 0x11e   : > { %1604 = vperm.xlu1 %5189, %v5895_v21   ;;  %8595 = vst [vmem:[#allocation45_spill] sm:$0xff] %v6262_v15  ;;  %v5241_v21 = vld [vmem:[%s5826_s7 + $0x70] sm:$0xff]   ;;  %v5242_v15 = vld [vmem:[%s5826_s7 + $0x80] sm:$0xff]  }
 0x11f   : > { %v6264_v7 = vpop.permute.xlu1 %1903  ;;  %5061 = vmatprep.subr.msk.bf16.mxu1 %vm680_vm0, %v5241_v21  ;;  %5063 = vmatprep.subr.msk.bf16.mxu0 %vm680_vm0, %v5242_v15  ;;  %v1016_v58 = vsel %vm680_vm0, %v5242_v15, 0 }
 0x120   : > { %8596 = vst [vmem:[#allocation46_spill] sm:$0xff] %v6264_v7  ;;  %4856 = vmatpush3.bf16.xpose.msra.mxu0 %v1016_v58  ;;  %v5248_v7 = vld [vmem:[%s5913_s8 + $0x28] sm:$0xff]  }
 0x121   : > { %v6270_v57 = vpop.permute.xlu0 %1613 }
 0x122   : > { %1607 = vperm.xlu1 %5189, %v6005_v53   ;;  %8597 = vst [vmem:[#allocation47_spill] sm:$0xff] %v6270_v57  ;;  %v873_v53 = vsel %vm680_vm0, %v5241_v21, 0  ;;  %v5244_v57 = vld [vmem:[%s5826_s7 + $0x88] sm:$0xff]  }
 0x123   : > { %5064 = vmatprep.subr.msk.bf16.mxu0 %vm680_vm0, %v5244_v57  ;;  %v1019_v21 = vsel %vm680_vm0, %v5244_v57, 0  ;;  %v1022_v57 = vsel %vm680_vm0, %v5246_v52, 0 }
 0x124   : > { %v6272_v2 = vpop.permute.xlu1 %2110 }
 0x125   : > { %8598 = vst [vmem:[#allocation48_spill] sm:$0xff] %v6272_v2  ;;  %v6275_v50 = vpop.permute.xlu0 %1655  ;;  %4844 = vmatpush3.bf16.xpose.msra.mxu1 %v873_v53 }
 0x126   : > { %5190 = vset.pattern.permute.xlu1 %v8592_v51  ;;  %8599 = vst [vmem:[#allocation49_spill] sm:$0xff] %v6275_v50  ;;  %v8601_v50 = vmov 5  }
 0x127   : > { %2395 = vperm.xlu1 %5190, %v5921_v29  }
 0x128   : > { %v6280_v3 = vpop.permute.xlu1 %2140  ;;  %4858 = vmatpush3.bf16.xpose.msra.mxu0 %v1019_v21 }
 0x129   : > { %8600 = vst [vmem:[#allocation50_spill] sm:$0xff] %v6280_v3  ;;  %v5243_v3 = vld [vmem:[%s5826_s7 + $0x78] sm:$0xff]   ;;  %5065 = vmatprep.subr.msk.bf16.mxu0 %vm680_vm0, %v5246_v52 }
 0x12a   : > { %v6286_v6 = vpop.permute.xlu0 %2329  ;;  %5062 = vmatprep.subr.msk.bf16.mxu1 %vm680_vm0, %v5243_v3  ;;  %v5249_v52 = vld [vmem:[%s5826_s7 + $0x98] sm:$0xff]  }
 0x12b   : > { %5191 = vset.pattern.permute.xlu1 %v8601_v50 }
 0x12c   : > { %2629 = vperm.xlu1 %5191, %v5903_v23   ;;  %v6290_v29 = vpop.permute.xlu1 %2143  ;;  %v876_v23 = vsel %vm680_vm0, %v5243_v3, 0 }
 0x12d   : > { %8602 = vst [vmem:[#allocation51_spill] sm:$0xff] %v6290_v29  ;;  %4846 = vmatpush3.bf16.xpose.msra.mxu1 %v876_v23 }
 0x12e   : > { %v6292_v2 = vpop.permute.xlu0 %2338 }
 0x12f   : > { %8603 = vst [vmem:[#allocation52_spill] sm:$0xff] %v6292_v2  ;;  %v5245_v2 = vld [vmem:[%s5913_s8 + $0x20] sm:$0xff]  }
 0x130   : > { %2632 = vperm.xlu1 %5191, %v6048_v59   ;;  %4847 = vmatprep.mubr.msk.bf16.mxu1 %vm680_vm0, %v5245_v2 }
 0x131   : > { %v6297_v15 = vpop.permute.xlu1 %1879  ;;  %4860 = vmatpush3.bf16.xpose.msra.mxu0 %v1022_v57 }
 0x132   : > { %8604 = vst [vmem:[#allocation53_spill] sm:$0xff] %v6297_v15  ;;  %v6303_v53 = vpop.permute.xlu0 %2347  ;;  %v5247_v15 = vld [vmem:[%s5826_s7 + $0xc0] sm:$0xff]   ;;  %5066 = vmatprep.subr.msk.bf16.mxu0 %vm680_vm0, %v5249_v52 }
 0x133   : > { %8605 = vst [vmem:[#allocation54_spill] sm:$0xff] %v6303_v53  ;;  %v1177_v23 = vsel %vm680_vm0, %v5247_v15, 0  ;;  %5071 = vmatprep.subr.msk.bf16.mxu1 %vm680_vm0, %v5247_v15  ;;  %v5255_v53 = vld [vmem:[%s5826_s7 + $0xa8] sm:$0xff]  }
 0x134   : > { %5192 = vset.pattern.permute.xlu1 %v8580_v43  ;;  %4848 = vmatmul.mubr.msk.bf16.vlgmr.msra.gmra.mrb[0].mxu1 %vm680_vm0, %v5248_v7  ;;  %v1025_v7 = vsel %vm680_vm0, %v5249_v52, 0  ;;  %v5251_v52 = vld [vmem:[%s5826_s7 + $0xa0] sm:$0xff]  }
 0x135   : > { %1882 = vperm.xlu1 %5192, %v6180_v45   ;;  %4880 = vmatpush3.bf16.xpose.msra.mxu1 %v1177_v23 }
 0x136   : > { %v6307_v59 = vpop.permute.xlu1 %2116  ;;  %v6309_v58 = vpop.permute.xlu0 %2350 }
 0x137   : > { %8606 = vst [vmem:[#allocation55_spill] sm:$0xff] %v6307_v59  ;;  %8607 = vst [vmem:[#allocation56_spill] sm:$0xff] %v6309_v58  ;;  %v6316_v3 = vpop.f32.mrb[0].mxu0 }
 0x138   : > { %v6322_v21 = vpop.f32.mrb[1].mxu0 }
 0x139   : > { %5193 = vset.pattern.permute.xlu1 %v8582_v0  ;;  %v6331_v2 = vpop.f32.mrb[2].mxu0  ;;  %4862 = vmatpush3.bf16.xpose.msra.mxu0 %v1025_v7  ;;  %v1028_v7 = vsel %vm680_vm0, %v5251_v52, 0 }
 0x13a   : > { %2122 = vperm.xlu1 %5193, %v6180_v45   ;;  %v6325_v58 = vpop.permute.xlu0 %2383  ;;  %v6333_v36 = vpop.f32.mrb[3].mxu0  ;;  %5067 = vmatprep.subr.msk.bf16.mxu0 %vm680_vm0, %v5251_v52  ;;  %v5256_v52 = vld [vmem:[%s5826_s7 + $0xd8] sm:$0xff]  }
 0x13b   : > { %8608 = vst [vmem:[#allocation57_spill] sm:$0xff] %v6325_v58  ;;  %v6327_v59 = vpop.permute.xlu1 %2374 }
 0x13c   : > { %8609 = vst [vmem:[#allocation58_spill] sm:$0xff] %v6327_v59  ;;  %v5250_v59 = vld [vmem:[%s5826_s7 + $0xc8] sm:$0xff]  }
 0x13d   : > { %5072 = vmatprep.subr.msk.bf16.mxu1 %vm680_vm0, %v5250_v59  ;;  %v1180_v15 = vsel %vm680_vm0, %v5250_v59, 0  ;;  %v5252_v59 = vld [vmem:[%s5826_s7 + $0xd0] sm:$0xff]  }
 0x13e   : > { %2125 = vperm.xlu1 %5193, %v5926_v31   ;;  %v6336_v29 = vpop.permute.xlu0 %2359  ;;  %4882 = vmatpush3.bf16.xpose.msra.mxu1 %v1180_v15  ;;  %v1183_v15 = vsel %vm680_vm0, %v5252_v59, 0 }
 0x13f   : > { %8610 = vst [vmem:[#allocation59_spill] sm:$0xff] %v6336_v29  ;;  %v6338_v39 = vpop.permute.xlu1 %2377  ;;  %5073 = vmatprep.subr.msk.bf16.mxu1 %vm680_vm0, %v5252_v59  ;;  %v1031_v59 = vsel %vm680_vm0, %v5255_v53, 0 }
 0x140   : > { %8611 = vst [vmem:[#allocation60_spill] sm:$0xff] %v6338_v39 }
 0x141   : > { %4864 = vmatpush3.bf16.xpose.msra.mxu0 %v1028_v7  ;;  %v1186_v7 = vsel %vm680_vm0, %v5256_v52, 0 }
 0x142   : > { %5194 = vset.pattern.permute.xlu1 %v8580_v43  ;;  %v6350_v23 = vpop.permute.xlu0 %2389  ;;  %5068 = vmatprep.subr.msk.bf16.mxu0 %vm680_vm0, %v5255_v53 }
 0x143   : > { %1891 = vperm.xlu1 %5194, %v6192_v47   ;;  %v6348_v57 = vpop.permute.xlu1 %2353  ;;  %8613 = vst [vmem:[#allocation62_spill] sm:$0xff] %v6350_v23 }
 0x144   : > { %8612 = vst [vmem:[#allocation61_spill] sm:$0xff] %v6348_v57  ;;  %v5254_v57 = vld [vmem:[%s5913_s8 + $0x18] sm:$0xff]  }
 0x146   : > { %v6355_v39 = vpop.permute.xlu0 %2392  ;;  %4884 = vmatpush3.bf16.xpose.msra.mxu1 %v1183_v15 }
 0x147   : > { %5195 = vset.pattern.permute.xlu1 %v8582_v0  ;;  %v6353_v29 = vpop.permute.xlu1 %2380  ;;  %8615 = vst [vmem:[#allocation64_spill] sm:$0xff] %v6355_v39  ;;  %v5253_v39 = vld [vmem:[%s5913_s8 + $0x10] sm:$0xff]   ;;  %5074 = vmatprep.subr.msk.bf16.mxu1 %vm680_vm0, %v5256_v52 }
 0x148   : > { %8614 = vst [vmem:[#allocation63_spill] sm:$0xff] %v6353_v29  ;;  %2131 = vperm.xlu1 %5195, %v6192_v47   ;;  %4827 = vmatprep.mubr.msk.bf16.mxu0 %vm680_vm0, %v5253_v39  ;;  %v5257_v39 = vld [vmem:[%s5826_s7 + $0xb0] sm:$0xff]  }
 0x149   : > { %4828 = vmatmul.mubr.msk.bf16.gmra.mrb[4].mxu0 %vm680_vm0, %v5254_v57  ;;  %v5258_v57 = vld [vmem:[%s5826_s7 + $0xe0] sm:$0xff]   ;;  %v1034_v52 = vsel %vm680_vm0, %v5257_v39, 0 }
 0x14a   : > { %v6366_v29 = vpop.permute.xlu0 %2365  ;;  %4866 = vmatpush3.bf16.xpose.msra.mxu0 %v1031_v59  ;;  %v1189_v59 = vsel %vm680_vm0, %v5258_v57, 0 }
 0x14b   : > { %v6364_v23 = vpop.permute.xlu1 %2356  ;;  %8617 = vst [vmem:[#allocation66_spill] sm:$0xff] %v6366_v29  ;;  %5069 = vmatprep.subr.msk.bf16.mxu0 %vm680_vm0, %v5257_v39  ;;  %v5261_v29 = vld [vmem:[%s5826_s7 + $0xb8] sm:$0xff]  }
 0x14c   : > { %8616 = vst [vmem:[#allocation65_spill] sm:$0xff] %v6364_v23  ;;  %5196 = vset.pattern.permute.xlu1 %v8592_v51 }
 0x14d   : > { %2362 = vperm.xlu1 %5196, %v6180_v45  }
 0x14e   : > { %v6371_v58 = vpop.permute.xlu0 %2401  ;;  %4886 = vmatpush3.bf16.xpose.msra.mxu1 %v1186_v7 }
 0x14f   : > { %8618 = vst [vmem:[#allocation67_spill] sm:$0xff] %v6371_v58  ;;  %5075 = vmatprep.subr.msk.bf16.mxu1 %vm680_vm0, %v5258_v57  ;;  %v5260_v58 = vld [vmem:[%s5913_s8 + $0x38] sm:$0xff]  }
 0x150   : > { %v6376_v56 = vpop.permute.xlu1 %2614 }
 0x151   : > { %8619 = vst [vmem:[#allocation68_spill] sm:$0xff] %v6376_v56  ;;  %2368 = vperm.xlu1 %5196, %v5935_v33  }
 0x152   : > { %v6385_v15 = vpop.permute.xlu0 %2416  ;;  %4868 = vmatpush3.bf16.xpose.msra.mxu0 %v1034_v52 }
 0x153   : > { %8620 = vst [vmem:[#allocation69_spill] sm:$0xff] %v6385_v15  ;;  %5070 = vmatprep.subr.msk.bf16.mxu0 %vm680_vm0, %v5261_v29 }
 0x154   : > { %v6387_v23 = vpop.permute.xlu1 %2590 }
 0x155   : > { %8621 = vst [vmem:[#allocation70_spill] sm:$0xff] %v6387_v23  ;;  %2371 = vperm.xlu1 %5196, %v6192_v47   ;;  %v5259_v23 = vld [vmem:[%s5913_s8 + $0x30] sm:$0xff]  }
 0x156   : > { %4888 = vmatpush3.bf16.xpose.msra.mxu1 %v1189_v59  ;;  %4851 = vmatprep.mubr.msk.bf16.mxu1 %vm680_vm0, %v5259_v23  ;;  %v5263_v23 = vld [vmem:[%s5913_s8 + $0x40] sm:$0xff]  }
 0x157   : > { %v6392_v56 = vpop.permute.xlu0 %2566  ;;  %4852 = vmatmul.mubr.msk.bf16.gmra.mrb[4].mxu1 %vm680_vm0, %v5260_v58  ;;  %v5264_v58 = vld [vmem:[%s5913_s8 + $0x48] sm:$0xff]   ;;  %4871 = vmatprep.mubr.msk.bf16.mxu0 %vm680_vm0, %v5263_v23  ;;  %v6450_v23 = vld [vmem:[%s5881_s29] sm:$0x3f] }
 0x158   : > { %v6394_v53 = vpop.permute.xlu1 %2593 }
 0x159   : > { %8622 = vst [vmem:[#allocation71_spill] sm:$0xff] %v6394_v53  ;;  %5197 = vset.pattern.permute.xlu1 %v8601_v50  ;;  %v5262_v53 = vld [vmem:[%s5826_s7 + $0xe8] sm:$0xff]  }
 0x15a   : > { %2605 = vperm.xlu1 %5197, %v5926_v31   ;;  %5076 = vmatprep.subr.msk.bf16.mxu1 %vm680_vm0, %v5262_v53  ;;  %v1192_v57 = vsel %vm680_vm0, %v5262_v53, 0 }
 0x15b   : > { %v6402_v7 = vpop.permute.xlu0 %2575 }
 0x15c   : > { %v6404_v15 = vpop.permute.xlu1 %2623 }
 0x15d   : > { %8623 = vst [vmem:[#allocation72_spill] sm:$0xff] %v6404_v15  ;;  %v6477_v15 = vld [vmem:[%s5831_s20 + $0xa8] sm:$0xff] }
 0x15e   : > { %2608 = vperm.xlu1 %5197, %v5935_v33   ;;  %v1037_v33 = vsel %vm680_vm0, %v5261_v29, 0  ;;  %4890 = vmatpush3.bf16.xpose.msra.mxu1 %v1192_v57 }
 0x15f   : > { %v6411_v39 = vpop.permute.xlu0 %2581  ;;  %4870 = vmatpush3.bf16.xpose.msra.mxu0 %v1037_v33  ;;  %v6440_v33 = vsub.s32 3, %v5860_v11 }
 0x160   : > { %8624 = vst [vmem:[#allocation73_spill] sm:$0xff] %v6411_v39  ;;  %v6413_v31 = vpop.permute.xlu1 %2599 }
 0x161   : > { %8625 = vst [vmem:[#allocation74_spill] sm:$0xff] %v6413_v31  ;;  %v5265_v31 = vld [vmem:[%s5826_s7 + $0xf0] sm:$0xff]  }
 0x162   : > { %5198 = vset.pattern.permute.xlu1 %v8580_v43  ;;  %5077 = vmatprep.subr.msk.bf16.mxu1 %vm680_vm0, %v5265_v31  ;;  %v1195_v53 = vsel %vm680_vm0, %v5265_v31, 0  ;;  %v6457_v31 = vrot.slane %v6450_v23, %v6440_v33 }
 0x163   : > { %1918 = vperm.xlu1 %5198, %v6202_v14   ;;  %v6423_v52 = vpop.permute.xlu0 %2617 }
 0x164   : > { %8626 = vst [vmem:[#allocation75_spill] sm:$0xff] %v6423_v52  ;;  %v5268_v52 = vld [vmem:[%s5826_s7 + $0xf8] sm:$0xff]   ;;  %vm2197_vm1 = vcmp.eq.s32.totalorder %v6063_v63, %v6457_v31  ;;  %v8491_v63 = vmov 0.0   ;;  %vm2198_vm8 = vcmp.eq.s32.totalorder %v6070_v4, %v6457_v31  ;;  %v8663_v4 = vmov 0   ;;  %s453_s7 = scalar_select %p452_p0, %s5670_s24, 1 }
 0x165   : > { %v6425_v59 = vpop.permute.xlu1 %1589  ;;  %vm2199_vm14 = vcmp.eq.s32.totalorder %v6139_v12, %v6457_v31 }
 0x166   : > { %8627 = vst [vmem:[#allocation76_spill] sm:$0xff] %v6425_v59  ;;  %4872 = vmatmul.mubr.msk.bf16.vlgmr.msra.gmra.mrb[8].mxu0 %vm680_vm0, %v5264_v58  ;;  %4892 = vmatpush3.bf16.xpose.msra.mxu1 %v1195_v53  ;;  %v5266_v59 = vld [vmem:[%s5913_s8 + $0x50] sm:$0xff]   ;;  %v5267_v58 = vld [vmem:[%s5913_s8 + $0x58] sm:$0xff]   ;;  %s4334_s9 = sshll.u32 %s453_s7, 5 }
 0x167   : > { %5199 = vset.pattern.permute.xlu1 %v8582_v0  ;;  %v6431_v39 = vpop.permute.xlu0 %2620  ;;  %4875 = vmatprep.mubr.msk.bf16.mxu0 %vm680_vm0, %v5266_v59  ;;  %v1198_v59 = vsel %vm680_vm0, %v5268_v52, 0  ;;  %s456_s12 = sadd.s32 %s4334_s9, %s4317_s18 }
 0x168   : > { %8628 = vst [vmem:[#allocation77_spill] sm:$0xff] %v6431_v39  ;;  %2158 = vperm.xlu1 %5199, %v6202_v14   ;;  %v6447_v39 = vsub.s32 4, %v5860_v11  ;;  %5078 = vmatprep.subr.msk.bf16.mxu1 %vm680_vm0, %v5268_v52 }
 0x169   : > { %v6435_v29 = vpop.permute.xlu1 %1592 }
 0x16a   : > { %8629 = vst [vmem:[#allocation78_spill] sm:$0xff] %v6435_v29  ;;  %8631 = vst [vmem:[#allocation80_spill] sm:$0xff] %v6447_v39  ;;  %v6471_v53 = vrot.slane %v6450_v23, %v6447_v39 }
 0x16b   : > { %v6443_v57 = vpop.permute.xlu0 %2596 }
 0x16c   : > { %8630 = vst [vmem:[#allocation79_spill] sm:$0xff] %v6443_v57  ;;  %2161 = vperm.xlu1 %5199, %v5939_v35   ;;  %v6467_v35 = vrot.slane %v6450_v23, %v5884_v16  ;;  %vm2437_vm3 = vcmp.eq.s32.totalorder %v6091_v17, %v6471_v53  ;;  %vm2438_vm9 = vcmp.eq.s32.totalorder %v6286_v6, %v6471_v53 }
 0x16d   : > { %vm2439_vm15 = vcmp.eq.s32.totalorder %v6097_v19, %v6471_v53 }
 0x16e   : > { %v6452_v29 = vpop.permute.xlu1 %1906  ;;  %4876 = vmatmul.mubr.msk.bf16.gmra.mrb[12].mxu0 %vm680_vm0, %v5267_v58  ;;  %vm1957_vm2 = vcmp.eq.s32.totalorder %v6054_v60, %v6467_v35  ;;  %4894 = vmatpush3.bf16.xpose.msra.mxu1 %v1198_v59  ;;  %v5269_v58 = vld [vmem:[%s5913_s8 + $0x60] sm:$0xff]   ;;  %v5270_v59 = vld [vmem:[%s5913_s8 + $0x68] sm:$0xff]   ;;  %vm1958_vm7 = vcmp.eq.s32.totalorder %v6056_v61, %v6467_v35  ;;  %vm1959_vm13 = vcmp.eq.s32.totalorder %v6060_v62, %v6467_v35 }
 0x16f   : > { %8632 = vst [vmem:[#allocation81_spill] sm:$0xff] %v6452_v29  ;;  %v6462_v57 = vpop.permute.xlu0 %2626  ;;  %v6474_v29 = vsub.s32 5, %v5860_v11  ;;  %v4465_v17 = vsel %vm1957_vm2, 1.0, %v8491_v63  ;;  %4895 = vmatprep.mubr.msk.bf16.mxu1 %vm680_vm0, %v5269_v58  ;;  %v6523_v58 = vld [vmem:[%s5831_s20 + $0xd8] sm:$0xff]  ;;  %vm1960_vm2 = vcmp.eq.s32.totalorder %v6077_v9, %v6467_v35 }
 0x170   : > { %5200 = vset.pattern.permute.xlu1 %v8577_v40  ;;  %8633 = vst [vmem:[#allocation82_spill] sm:$0xff] %v6462_v57  ;;  %v6487_v57 = vld [vmem:[%s5831_s20 + $0xd0] sm:$0xff] }
 0x171   : > { %8634 = vst [vmem:[#allocation83_spill] sm:$0xff] %v6474_v29  ;;  %1637 = vperm.xlu1 %5200, %v6477_v15   ;;  %v6498_v52 = vrot.slane %v6450_v23, %v6474_v29 }
 0x173   : > { %v6484_v16 = vpop.permute.xlu1 %2146  ;;  %v6490_v26 = vpop.permute.xlu0 %2635  ;;  %vm2677_vm4 = vcmp.eq.s32.totalorder %v6392_v56, %v6498_v52  ;;  %vm2678_vm10 = vcmp.eq.s32.totalorder %v6111_v30, %v6498_v52 }
 0x174   : > { %8635 = vst [vmem:[#allocation84_spill] sm:$0xff] %v6484_v16  ;;  %8636 = vst [vmem:[#allocation85_spill] sm:$0xff] %v6490_v26  ;;  %v4497_v16 = vsel %vm2197_vm1, 1.0, %v8491_v63  ;;  %v4529_v26 = vsel %vm2437_vm3, 1.0, %v8491_v63  ;;  %v4561_v39 = vsel %vm2677_vm4, 1.0, %v8491_v63  ;;  %vm2200_vm1 = vcmp.eq.s32.totalorder %v6083_v13, %v6457_v31 }
 0x175   : > { %5201 = vset.pattern.permute.xlu1 %v8580_v43  ;;  %v2293_v46 = vadd.f32 %v4497_v16, %v4465_v17  ;;  %4896 = vmatmul.mubr.msk.bf16.vlgmr.msra.gmra.mrb[8].mxu1 %vm680_vm0, %v5270_v59  ;;  %vm2440_vm3 = vcmp.eq.s32.totalorder %v6103_v24, %v6471_v53  ;;  %vm2679_vm4 = vcmp.eq.s32.totalorder %v6117_v34, %v6498_v52 }
 0x176   : > { %1924 = vperm.xlu1 %5201, %v6487_v57  }
 0x177   : > { %v6506_v60 = vpop.permute.xlu1 %2149  ;;  %v6510_v29 = vpop.permute.xlu0 %2602  ;;  %v2533_v37 = vadd.f32 %v4529_v26, %v2293_v46  ;;  %v6531_v26 = vsub.s32 1, %v5860_v11  ;;  %v6535_v46 = vld [vmem:[%s5831_s20 + $0xb8] sm:$0xff] }
 0x178   : > { %8637 = vst [vmem:[#allocation86_spill] sm:$0xff] %v6506_v60  ;;  %8638 = vst [vmem:[#allocation87_spill] sm:$0xff] %v6510_v29 }
 0x179   : > { %v2773_v29 = vadd.f32 %v4561_v39, %v2533_v37  ;;  %v5271_v37 = vld [vmem:[%s5913_s8 + $0x70] sm:$0xff]   ;;  %v5272_v39 = vld [vmem:[%s5913_s8 + $0x78] sm:$0xff]   ;;  %s4667_s8 = sshll.u32 %s5674_s25, 4 }
 0x17a   : > { %5202 = vset.pattern.permute.xlu1 %v8582_v0  ;;  %4899 = vmatprep.mubr.msk.bf16.mxu1 %vm680_vm0, %v5271_v37  ;;  %s4096_s30 = sadd.s32 %s4667_s8, %s4666_s19 }
 0x17b   : > { %2164 = vperm.xlu1 %5202, %v6487_v57   ;;  %v6519_v60 = vpop.permute.xlu0 %2611  ;;  %v2805_v17 = vadd.f32 1e-09, %v2773_v29 }
 0x17c   : > { %v6517_v56 = vpop.permute.xlu1 %1625  ;;  %8640 = vst [vmem:[#allocation89_spill] sm:$0xff] %v6519_v60 }
 0x17d   : > { %8639 = vst [vmem:[#allocation88_spill] sm:$0xff] %v6517_v56  ;;  %5305 = vlog2.f32 %v2805_v17  ;;  %4900 = vmatmul.mubr.msk.bf16.gmra.mrb[12].mxu1 %vm680_vm0, %v5272_v39 }
 0x17f   : > { %2167 = vperm.xlu1 %5202, %v6523_v58   ;;  %v6526_v16 = vpop.permute.xlu0 %2638 }
 0x180   : > { %8641 = vst [vmem:[#allocation90_spill] sm:$0xff] %v6526_v16  ;;  %v6544_v16 = vrot.slane %v6450_v23, %v6531_v26 }
 0x181   : > { %v6528_v63 = vpop.permute.xlu1 %1912 }
 0x182   : > { %8642 = vst [vmem:[#allocation91_spill] sm:$0xff] %v6528_v63  ;;  %v6549_v63 = vsub.s32 0, %v5860_v11  ;;  %vm1685_vm5 = vcmp.ne.s32.totalorder %v6124_v38, %v6544_v16  ;;  %v8649_v11 = vmov 0.0   ;;  %vm1686_vm12 = vcmp.ne.s32.totalorder %v6211_v49, %v6544_v16 }
 0x183   : > { %5203 = vset.pattern.permute.xlu1 %v8577_v40  ;;  %v6538_v59 = vpop.permute.xlu0 %2647  ;;  %v4562_v6 = vsel %vm2678_vm10, 1.0, %v8649_v11  ;;  %v4500_v19 = vsel %vm2200_vm1, 1.0, %v8649_v11  ;;  %v4468_v13 = vsel %vm1960_vm2, 1.0, %v8649_v11  ;;  %v4563_v9 = vsel %vm2679_vm4, 1.0, %v8649_v11 }
 0x184   : > { %1643 = vperm.xlu1 %5203, %v6535_v46   ;;  %8643 = vst [vmem:[#allocation92_spill] sm:$0xff] %v6538_v59  ;;  %8645 = vst [vmem:[#allocation94_spill] sm:$0xff] %v6549_v63  ;;  %v4433_v59 = vsel %vm1685_vm5, 1.0, %v8649_v11  ;;  %vm2680_vm5 = vcmp.eq.s32.totalorder %v6402_v7, %v6498_v52  ;;  %vm1961_vm10 = vcmp.eq.s32.totalorder %v6067_v1, %v6467_v35 }
 0x185   : > { %v1781_v38 = vmul.f32 10000000.0, %v4433_v59  ;;  %v4564_v24 = vsel %vm2680_vm5, 1.0, %v8649_v11  ;;  %vm1970_vm1 = vcmp.eq.s32.totalorder %v6105_v27, %v5908_v25  ;;  %v8731_v27 = vld [vmem:[#allocation14_spill] sm:$0xff] }
 0x186   : > { %v6546_v29 = vpop.permute.xlu1 %2152 }
 0x187   : > { %8644 = vst [vmem:[#allocation93_spill] sm:$0xff] %v6546_v29  ;;  %v6554_v60 = vpop.permute.xlu0 %2653  ;;  %v6563_v29 = vrot.slane %v6450_v23, %v6549_v63  ;;  %v5306_v39 = vpop.eup %5305  ;;  %v1265_v23 = vmul.f32 0.17677669, %v6322_v21 }
 0x188   : > { %5204 = vset.pattern.permute.xlu1 %v8592_v51  ;;  %8646 = vst [vmem:[#allocation95_spill] sm:$0xff] %v6554_v60  ;;  %v2838_v63 = vmul.f32 0.6931472, %v5306_v39 }
 0x189   : > { %2398 = vperm.xlu1 %5204, %v6202_v14   ;;  %8648 = vst [vmem:[#allocation97_spill] sm:$0xff] %v6563_v29 }
 0x18a   : > { %v6559_v17 = vpop.permute.xlu1 %2155 }
 0x18b   : > { %8647 = vst [vmem:[#allocation96_spill] sm:$0xff] %v6559_v17 }
 0x18c   : > { %v1335_v37 = vpop.permute.xlu0 %1334 }
 0x18d   : > { %2404 = vperm.xlu1 %5204, %v6487_v57   ;;  %vm1445_vm6 = vcmp.eq.s32.totalorder %v1335_v37, %v6563_v29 }
 0x18e   : > { %v4401_v60 = vsel %vm1445_vm6, 1.0, %v8649_v11  ;;  %vm1687_vm6 = vcmp.ne.s32.totalorder %v6130_v42, %v6544_v16 }
 0x18f   : > { %v6569_v56 = vpop.permute.xlu1 %1601  ;;  %v1541_v48 = vmul.f32 100000.0, %v4401_v60 }
 0x191   : > { %2407 = vperm.xlu1 %5204, %v6523_v58   ;;  %v1813_v17 = vadd.f32 %v1781_v38, %v1541_v48 }
 0x193   : > { %v6573_v32 = vpop.permute.xlu1 %1628  ;;  %v2901_v41 = vadd.f32 %v2838_v63, %v1813_v17 }
 0x194   : > { %8650 = vst [vmem:[#allocation98_spill] sm:$0xff] %v6573_v32 }
 0x195   : > { %5205 = vset.pattern.permute.xlu1 %v8601_v50  ;;  %v6576_v37 = vsub.f32 %v1265_v23, %v2901_v41  ;;  %v6593_v41 = vld [vmem:[%s5831_s20 + $0x70] sm:$0xff] }
 0x196   : > { %2641 = vperm.xlu1 %5205, %v6579_v28  }
 0x197   : > { %8651 = vst [vmem:[#allocation99_spill] sm:$0xff] %v6576_v37  ;;  %2965 = vmax.xlane.f32.xlu0 %v6576_v37 }
 0x198   : > { %v6582_v59 = vpop.permute.xlu1 %2386 }
 0x199   : > { %8652 = vst [vmem:[#allocation100_spill] sm:$0xff] %v6582_v59 }
 0x19a   : > { %2644 = vperm.xlu1 %5205, %v6487_v57  }
 0x19d   : > { %v6586_v48 = vpop.permute.xlu1 %1604 }
 0x19e   : > { %8653 = vst [vmem:[#allocation101_spill] sm:$0xff] %v6586_v48  ;;  %5206 = vset.pattern.permute.xlu1 %v8577_v40  ;;  %v6625_v48 = vld [vmem:[%s5831_s20 + $0xf0] sm:$0xff] }
 0x19f   : > { %1610 = vperm.xlu1 %5206, %v6180_v45   ;;  %v6607_v45 = vld [vmem:[%s5831_s20 + $0xe0] sm:$0xff] }
 0x1a1   : > { %v6590_v21 = vpop.permute.xlu1 %1607 }
 0x1a2   : > { %8654 = vst [vmem:[#allocation102_spill] sm:$0xff] %v6590_v21 }
 0x1a3   : > { %1616 = vperm.xlu1 %5206, %v6593_v41  }
 0x1a6   : > { %v6596_v63 = vpop.permute.xlu1 %2395 }
 0x1a7   : > { %1619 = vperm.xlu1 %5206, %v6192_v47  }
 0x1ab   : > { %5207 = vset.pattern.permute.xlu1 %v8580_v43  ;;  %v6600_v60 = vpop.permute.xlu1 %2629 }
 0x1ac   : > { %1933 = vperm.xlu1 %5207, %v6012_v54  }
 0x1af   : > { %v6603_v17 = vpop.permute.xlu1 %2632 }
 0x1b0   : > { %8655 = vst [vmem:[#allocation103_spill] sm:$0xff] %v6603_v17  ;;  %5208 = vset.pattern.permute.xlu1 %v8582_v0 }
 0x1b1   : > { %2170 = vperm.xlu1 %5208, %v6607_v45  }
 0x1b4   : > { %v6610_v39 = vpop.permute.xlu1 %1882 }
 0x1b5   : > { %8656 = vst [vmem:[#allocation104_spill] sm:$0xff] %v6610_v39  ;;  %5209 = vset.pattern.permute.xlu1 %v8577_v40 }
 0x1b6   : > { %1646 = vperm.xlu1 %5209, %v6202_v14  }
 0x1b9   : > { %v6614_v38 = vpop.permute.xlu1 %2122 }
 0x1ba   : > { %8657 = vst [vmem:[#allocation105_spill] sm:$0xff] %v6614_v38  ;;  %1649 = vperm.xlu1 %5209, %v6579_v28  }
 0x1bd   : > { %v6617_v23 = vpop.permute.xlu1 %2125 }
 0x1be   : > { %5211 = vset.pattern.permute.xlu1 %v8580_v43 }
 0x1bf   : > { %1939 = vperm.xlu1 %5211, %v6017_v55  }
 0x1c2   : > { %v6621_v37 = vpop.permute.xlu1 %1891 }
 0x1c3   : > { %5212 = vset.pattern.permute.xlu1 %v8582_v0 }
 0x1c4   : > { %2176 = vperm.xlu1 %5212, %v6625_v48  }
 0x1c7   : > { %v6628_v32 = vpop.permute.xlu1 %2131 }
 0x1c8   : > { %5214 = vset.pattern.permute.xlu1 %v8577_v40 }
 0x1c9   : > { %1652 = vperm.xlu1 %5214, %v6487_v57  }
 0x1cc   : > { %v6632_v14 = vpop.permute.xlu1 %2362 }
 0x1cd   : > { %8658 = vst [vmem:[#allocation106_spill] sm:$0xff] %v6632_v14  ;;  %5216 = vset.pattern.permute.xlu1 %v8592_v51  ;;  %v4498_v51 = vsel %vm2198_vm8, 1.0, %v8649_v11  ;;  %v4530_v14 = vsel %vm2438_vm9, 1.0, %v8649_v11 }
 0x1ce   : > { %2410 = vperm.xlu1 %5216, %v6607_v45  }
 0x1d0   : > { %v6636_v43 = vpop.permute.xlu1 %2368 }
 0x1d1   : > { %8659 = vst [vmem:[#allocation107_spill] sm:$0xff] %v6636_v43 }
 0x1d2   : > { %2413 = vperm.xlu1 %5216, %v6012_v54   ;;  %v4466_v54 = vsel %vm1958_vm7, 1.0, %v8649_v11  ;;  %vm1688_vm7 = vcmp.ne.s32.totalorder %v6137_v44, %v6544_v16 }
 0x1d3   : > { %v2294_v39 = vadd.f32 %v4498_v51, %v4466_v54 }
 0x1d4   : > { %v6639_v0 = vpop.permute.xlu1 %2371 }
 0x1d5   : > { %8660 = vst [vmem:[#allocation108_spill] sm:$0xff] %v6639_v0  ;;  %v2534_v61 = vadd.f32 %v4530_v14, %v2294_v39  ;;  %v4434_v39 = vsel %vm1686_vm12, 1.0, %v8649_v11  ;;  %vm1975_vm12 = vcmp.eq.s32.totalorder %v6079_v10, %v5891_v20 }
 0x1d6   : > { %2419 = vperm.xlu1 %5216, %v6017_v55  }
 0x1d7   : > { %v2774_v59 = vadd.f32 %v4562_v6, %v2534_v61  ;;  %v1266_v6 = vmul.f32 0.17677669, %v6333_v36 }
 0x1d9   : > { %v6644_v17 = vpop.permute.xlu1 %2605 }
 0x1da   : > { %5218 = vset.pattern.permute.xlu1 %v8601_v50  ;;  %8661 = vst [vmem:[#allocation109_spill] sm:$0xff] %v6644_v17  ;;  %v2806_v17 = vadd.f32 1e-09, %v2774_v59  ;;  %v1782_v59 = vmul.f32 10000000.0, %v4434_v39 }
 0x1db   : > { %2650 = vperm.xlu1 %5218, %v6607_v45  }
 0x1dc   : > { %5307 = vlog2.f32 %v2806_v17 }
 0x1dd   : > { %v6655_v43 = vpop.permute.xlu1 %2608 }
 0x1de   : > { %8662 = vst [vmem:[#allocation110_spill] sm:$0xff] %v6655_v43  ;;  %v1338_v43 = vpop.permute.xlu0 %1337 }
 0x1df   : > { %2656 = vperm.xlu1 %5218, %v6625_v48   ;;  %vm1446_vm11 = vcmp.eq.s32.totalorder %v1338_v43, %v6563_v29 }
 0x1e0   : > { %v4402_v30 = vsel %vm1446_vm11, 1.0, %v8649_v11  ;;  %vm1973_vm11 = vcmp.eq.s32.totalorder %v6073_v5, %v5891_v20 }
 0x1e1   : > { %v1542_v14 = vmul.f32 100000.0, %v4402_v30 }
 0x1e2   : > { %v6662_v38 = vpop.permute.xlu1 %1918 }
 0x1e3   : > { %2659 = vperm.xlu1 %5218, %v6017_v55   ;;  %8664 = vst [vmem:[#allocation111_spill] sm:$0xff] %v6662_v38  ;;  %v1814_v61 = vadd.f32 %v1782_v59, %v1542_v14  ;;  %v5568_v14 = vld [vmem:[%s5831_s20 + $0x10] sm:$0xff]  ;;  %v5569_v59 = vld [vmem:[%s5831_s20 + $0x18] sm:$0xff] }
 0x1e6   : > { %v5308_v51 = vpop.eup %5307 }
 0x1e7   : > { %5220 = vset.pattern.permute.xlu1 %v8663_v4  ;;  %v6665_v21 = vpop.permute.xlu1 %2158  ;;  %v2840_v17 = vmul.f32 0.6931472, %v5308_v51  ;;  %v5570_v51 = vld [vmem:[%s5831_s20 + $0x28] sm:$0xff] }
 0x1e8   : > { %8665 = vst [vmem:[#allocation112_spill] sm:$0xff] %v6665_v21 }
 0x1e9   : > { %v2902_v49 = vadd.f32 %v2840_v17, %v1814_v61  ;;  %v5571_v17 = vld [vmem:[%s5831_s20 + $0x38] sm:$0xff] }
 0x1eb   : > { %v6668_v55 = vpop.permute.xlu1 %2161  ;;  %v6679_v38 = vsub.f32 %v1266_v6, %v2902_v49 }
 0x1ec   : > { %8666 = vst [vmem:[#allocation113_spill] sm:$0xff] %v6668_v55 }
 0x1ed   : > { %8669 = vst [vmem:[#allocation116_spill] sm:$0xff] %v6679_v38 }
 0x1f0   : > { %v6674_v54 = vpop.permute.xlu1 %1637 }
 0x1f1   : > { %8667 = vst [vmem:[#allocation114_spill] sm:$0xff] %v6674_v54 }
 0x1f5   : > { %v6676_v43 = vpop.permute.xlu1 %1924 }
 0x1f6   : > { %8668 = vst [vmem:[#allocation115_spill] sm:$0xff] %v6676_v43 }
 0x1fa   : > { %v6681_v21 = vpop.permute.xlu1 %2164 }
 0x1fb   : > { %8670 = vst [vmem:[#allocation117_spill] sm:$0xff] %v6681_v21 }
 0x1fe   : > { %v6684_v30 = vpop.permute.xlu1 %2167 }
 0x1ff   : > { %8671 = vst [vmem:[#allocation118_spill] sm:$0xff] %v6684_v30  ;;  %v8755_v30 = vld [vmem:[#allocation60_spill] sm:$0xff] }
 0x203   : > { %v6686_v54 = vpop.permute.xlu1 %1643 }
 0x204   : > { %8672 = vst [vmem:[#allocation119_spill] sm:$0xff] %v6686_v54 }
 0x207   : > { %2967 = vmax.xlane.f32.xlu1 %v6679_v38 }
 0x208   : > { %v6688_v39 = vpop.permute.xlu1 %2398 }
 0x209   : > { %8673 = vst [vmem:[#allocation120_spill] sm:$0xff] %v6688_v39 }
 0x20c   : > { %v6692_v36 = vpop.permute.xlu1 %2404 }
 0x20d   : > { %8674 = vst [vmem:[#allocation121_spill] sm:$0xff] %v6692_v36  ;;  %v5573_v36 = vld [vmem:[%s5831_s20 + $0x58] sm:$0xff] }
 0x210   : > { %v6695_v61 = vpop.permute.xlu1 %2407 }
 0x211   : > { %8675 = vst [vmem:[#allocation122_spill] sm:$0xff] %v6695_v61  ;;  %v8752_v61 = vld [vmem:[#allocation57_spill] sm:$0xff] }
 0x218   : > { %1340 = vperm.xlu1 %5220, %v5568_v14   ;;  %v5572_v14 = vld [vmem:[%s5831_s20 + $0x48] sm:$0xff] }
 0x21c   : > { %1343 = vperm.xlu1 %5220, %v5569_v59   ;;  %v6698_v6 = vpop.f32.mrb[4].mxu0  ;;  %v6707_v59 = vpop.permute.xlu1 %2641 }
 0x21d   : > { %8676 = vst [vmem:[#allocation123_spill] sm:$0xff] %v6698_v6  ;;  %v6700_v49 = vpop.f32.mrb[5].mxu0  ;;  %8680 = vst [vmem:[#allocation127_spill] sm:$0xff] %v6707_v59 }
 0x21e   : > { %8677 = vst [vmem:[#allocation124_spill] sm:$0xff] %v6700_v49  ;;  %v6702_v38 = vpop.f32.mrb[6].mxu0  ;;  %v5574_v49 = vld [vmem:[%s5831_s20 + $0x68] sm:$0xff] }
 0x21f   : > { %8678 = vst [vmem:[#allocation125_spill] sm:$0xff] %v6702_v38  ;;  %v6704_v43 = vpop.f32.mrb[7].mxu0 }
 0x220   : > { %1349 = vperm.xlu1 %5220, %v5570_v51   ;;  %8679 = vst [vmem:[#allocation126_spill] sm:$0xff] %v6704_v43  ;;  %v6710_v51 = vpop.f32.mrb[0].mxu1  ;;  %v6718_v39 = vpop.permute.xlu1 %2644  ;;  %v5591_v43 = vld [vmem:[%s5831_s20 + $0xc0] sm:$0xff] }
 0x221   : > { %8681 = vst [vmem:[#allocation128_spill] sm:$0xff] %v6710_v51  ;;  %v6712_v21 = vpop.f32.mrb[1].mxu1  ;;  %8685 = vst [vmem:[#allocation132_spill] sm:$0xff] %v6718_v39 }
 0x222   : > { %8682 = vst [vmem:[#allocation129_spill] sm:$0xff] %v6712_v21  ;;  %v5575_v21 = vld [vmem:[%s5831_s20 + $0x88] sm:$0xff] }
 0x224   : > { %1355 = vperm.xlu1 %5220, %v5571_v17   ;;  %v6714_v17 = vpop.f32.mrb[2].mxu1 }
 0x225   : > { %8683 = vst [vmem:[#allocation130_spill] sm:$0xff] %v6714_v17  ;;  %v6716_v6 = vpop.f32.mrb[3].mxu1 }
 0x226   : > { %8684 = vst [vmem:[#allocation131_spill] sm:$0xff] %v6716_v6  ;;  %v5576_v6 = vld [vmem:[%s5831_s20 + $0x98] sm:$0xff] }
 0x228   : > { %1361 = vperm.xlu1 %5220, %v5572_v14  }
 0x22a   : > { %v6722_v14 = vpop.f32.mrb[4].mxu1 }
 0x22b   : > { %8686 = vst [vmem:[#allocation133_spill] sm:$0xff] %v6722_v14  ;;  %v6724_v54 = vpop.f32.mrb[5].mxu1 }
 0x22c   : > { %1367 = vperm.xlu1 %5220, %v5573_v36   ;;  %8687 = vst [vmem:[#allocation134_spill] sm:$0xff] %v6724_v54  ;;  %v6726_v36 = vpop.permute.xlu1 %1610  ;;  %v6728_v51 = vpop.f32.mrb[6].mxu1 }
 0x22d   : > { %8688 = vst [vmem:[#allocation135_spill] sm:$0xff] %v6726_v36  ;;  %8689 = vst [vmem:[#allocation136_spill] sm:$0xff] %v6728_v51  ;;  %v6730_v59 = vpop.f32.mrb[7].mxu1 }
 0x22e   : > { %8690 = vst [vmem:[#allocation137_spill] sm:$0xff] %v6730_v59 }
 0x230   : > { %1373 = vperm.xlu1 %5220, %v5574_v49   ;;  %v6733_v17 = vpop.permute.xlu1 %1616 }
 0x231   : > { %8691 = vst [vmem:[#allocation138_spill] sm:$0xff] %v6733_v17 }
 0x234   : > { %1379 = vperm.xlu1 %5220, %v6192_v47   ;;  %v6745_v14 = vpop.permute.xlu1 %1619 }
 0x235   : > { %8696 = vst [vmem:[#allocation143_spill] sm:$0xff] %v6745_v14 }
 0x238   : > { %1385 = vperm.xlu1 %5220, %v5575_v21  }
 0x239   : > { %v6736_v39 = vpop.f32.mrb[8].mxu0 }
 0x23a   : > { %8692 = vst [vmem:[#allocation139_spill] sm:$0xff] %v6736_v39  ;;  %v6738_v49 = vpop.f32.mrb[9].mxu0 }
 0x23b   : > { %8693 = vst [vmem:[#allocation140_spill] sm:$0xff] %v6738_v49  ;;  %v6741_v47 = vpop.f32.mrb[10].mxu0 }
 0x23c   : > { %1391 = vperm.xlu1 %5220, %v5576_v6   ;;  %8694 = vst [vmem:[#allocation141_spill] sm:$0xff] %v6741_v47  ;;  %v6743_v54 = vpop.f32.mrb[11].mxu0  ;;  %v6752_v6 = vpop.permute.xlu1 %1933 }
 0x23d   : > { %8695 = vst [vmem:[#allocation142_spill] sm:$0xff] %v6743_v54  ;;  %8699 = vst [vmem:[#allocation146_spill] sm:$0xff] %v6752_v6 }
 0x240   : > { %1397 = vperm.xlu1 %5220, %v6477_v15   ;;  %v6760_v49 = vpop.permute.xlu1 %2170 }
 0x241   : > { %v6748_v36 = vpop.f32.mrb[12].mxu0  ;;  %8702 = vst [vmem:[#allocation149_spill] sm:$0xff] %v6760_v49 }
 0x242   : > { %8697 = vst [vmem:[#allocation144_spill] sm:$0xff] %v6748_v36  ;;  %v6750_v21 = vpop.f32.mrb[13].mxu0 }
 0x243   : > { %8698 = vst [vmem:[#allocation145_spill] sm:$0xff] %v6750_v21  ;;  %v6755_v39 = vpop.f32.mrb[14].mxu0 }
 0x244   : > { %1403 = vperm.xlu1 %5220, %v6535_v46   ;;  %8700 = vst [vmem:[#allocation147_spill] sm:$0xff] %v6755_v39  ;;  %v6757_v15 = vpop.f32.mrb[15].mxu0  ;;  %v8747_v39 = vld [vmem:[#allocation51_spill] sm:$0xff] }
 0x245   : > { %8701 = vst [vmem:[#allocation148_spill] sm:$0xff] %v6757_v15  ;;  %v8748_v15 = vld [vmem:[#allocation15_spill] sm:$0xff] }
 0x248   : > { %1409 = vperm.xlu1 %5220, %v6579_v28   ;;  %v6762_v17 = vpop.f32.mrb[8].mxu1  ;;  %v6771_v28 = vpop.permute.xlu1 %1646 }
 0x249   : > { %8703 = vst [vmem:[#allocation150_spill] sm:$0xff] %v6762_v17  ;;  %v6765_v46 = vpop.f32.mrb[9].mxu1  ;;  %8707 = vst [vmem:[#allocation154_spill] sm:$0xff] %v6771_v28  ;;  %v5578_v28 = vld [vmem:[%s5831_s20 + $0xf8] sm:$0xff] }
 0x24a   : > { %8704 = vst [vmem:[#allocation151_spill] sm:$0xff] %v6765_v46  ;;  %v6767_v36 = vpop.f32.mrb[10].mxu1 }
 0x24b   : > { %8705 = vst [vmem:[#allocation152_spill] sm:$0xff] %v6767_v36  ;;  %v6769_v21 = vpop.f32.mrb[11].mxu1 }
 0x24c   : > { %1415 = vperm.xlu1 %5220, %v6523_v58   ;;  %8706 = vst [vmem:[#allocation153_spill] sm:$0xff] %v6769_v21  ;;  %v6776_v58 = vld [vmem:[%s5831_s20 + $0xe8] sm:$0xff]  ;;  %v6779_v17 = vpop.permute.xlu1 %1649 }
 0x24d   : > { %8708 = vst [vmem:[#allocation155_spill] sm:$0xff] %v6779_v17  ;;  %v8740_v21 = vld [vmem:[#allocation22_spill] sm:$0xff] }
 0x250   : > { %1418 = vperm.xlu1 %5220, %v6607_v45   ;;  %v6781_v49 = vpop.f32.mrb[12].mxu1  ;;  %v6787_v46 = vpop.permute.xlu1 %1939 }
 0x251   : > { %8709 = vst [vmem:[#allocation156_spill] sm:$0xff] %v6781_v49  ;;  %v6783_v6 = vpop.f32.mrb[13].mxu1  ;;  %8711 = vst [vmem:[#allocation158_spill] sm:$0xff] %v6787_v46  ;;  %v8739_v46 = vld [vmem:[#allocation83_spill] sm:$0xff] }
 0x252   : > { %8710 = vst [vmem:[#allocation157_spill] sm:$0xff] %v6783_v6  ;;  %v6796_v49 = vpop.f32.mrb[14].mxu1 }
 0x253   : > { %8714 = vst [vmem:[#allocation161_spill] sm:$0xff] %v6796_v49  ;;  %v4531_v49 = vsel %vm2439_vm15, 1.0, %v8649_v11  ;;  %vm1980_vm15 = vcmp.eq.s32.totalorder %v6099_v22, %v5891_v20 }
 0x254   : > { %5221 = vset.pattern.permute.xlu1 %v8577_v40  ;;  %v6790_v36 = vpop.permute.xlu1 %2176 }
 0x255   : > { %1658 = vperm.xlu1 %5221, %v6607_v45   ;;  %8712 = vst [vmem:[#allocation159_spill] sm:$0xff] %v6790_v36  ;;  %v4467_v36 = vsel %vm1959_vm13, 1.0, %v8649_v11  ;;  %vm1967_vm13 = vcmp.eq.s32.totalorder %v6086_v8, %v5908_v25  ;;  %v5587_v8 = vld [vmem:[%s5831_s20 + $0x80] sm:$0xff] }
 0x256   : > { %v6927_v22 = vsel %vm1967_vm13, 1.0, %v8649_v11 }
 0x258   : > { %v6794_v45 = vpop.permute.xlu1 %1652 }
 0x259   : > { %1661 = vperm.xlu1 %5221, %v6776_v58   ;;  %8713 = vst [vmem:[#allocation160_spill] sm:$0xff] %v6794_v45 }
 0x25c   : > { %v6798_v6 = vpop.permute.xlu1 %2410 }
 0x25d   : > { %5222 = vset.pattern.permute.xlu1 %v8663_v4  ;;  %8715 = vst [vmem:[#allocation162_spill] sm:$0xff] %v6798_v6 }
 0x25e   : > { %1424 = vperm.xlu1 %5222, %v6625_v48  }
 0x260   : > { %v6800_v4 = vpop.permute.xlu1 %2413 }
 0x261   : > { %8716 = vst [vmem:[#allocation163_spill] sm:$0xff] %v6800_v4 }
 0x262   : > { %1427 = vperm.xlu1 %5222, %v5578_v28  }
 0x266   : > { %5223 = vset.pattern.permute.xlu1 %v8577_v40  ;;  %v4499_v40 = vsel %vm2199_vm14, 1.0, %v8649_v11  ;;  %vm1978_vm14 = vcmp.eq.s32.totalorder %v6093_v18, %v5891_v20  ;;  %v8729_v18 = vld [vmem:[#allocation18_spill] sm:$0xff] }
 0x267   : > { %1664 = vperm.xlu1 %5223, %v6625_v48   ;;  %v6808_v48 = vpop.permute.xlu1 %2419  ;;  %vm2202_vm4 = vcmp.eq.s32.totalorder %v8729_v18, %v6457_v31  ;;  %v8736_v18 = vld [vmem:[#allocation26_spill] sm:$0xff] }
 0x268   : > { %8717 = vst [vmem:[#allocation164_spill] sm:$0xff] %v6808_v48 }
 0x26b   : > { %1667 = vperm.xlu1 %5223, %v5578_v28   ;;  %v2295_v28 = vadd.f32 %v4499_v40, %v4467_v36  ;;  %v6821_v12 = vpop.permute.xlu1 %2650  ;;  %v4532_v36 = vsel %vm2440_vm3, 1.0, %v8649_v11  ;;  %v2296_v40 = vadd.f32 %v4500_v19, %v4468_v13  ;;  %v4435_v19 = vsel %vm1687_vm6, 1.0, %v8649_v11 }
 0x26c   : > { %8718 = vst [vmem:[#allocation165_spill] sm:$0xff] %v6821_v12  ;;  %v1783_v13 = vmul.f32 10000000.0, %v4435_v19 }
 0x26d   : > { %v2535_v62 = vadd.f32 %v4531_v49, %v2295_v28  ;;  %v2536_v6 = vadd.f32 %v4532_v36, %v2296_v40 }
 0x26f   : > { %v2775_v45 = vadd.f32 %v4563_v9, %v2535_v62  ;;  %v6830_v34 = vpop.permute.xlu1 %2656  ;;  %v2776_v28 = vadd.f32 %v4564_v24, %v2536_v6 }
 0x270   : > { %8719 = vst [vmem:[#allocation166_spill] sm:$0xff] %v6830_v34 }
 0x271   : > { %v2807_v49 = vadd.f32 1e-09, %v2775_v45  ;;  %v2808_v12 = vadd.f32 1e-09, %v2776_v28  ;;  %v1267_v28 = vmul.f32 0.17677669, %v6316_v3 }
 0x272   : > { %v5580_v3 = vld [vmem:[%s5831_s20 + $0x30] sm:$0xff] }
 0x273   : > { %5309 = vlog2.f32 %v2807_v49  ;;  %v6832_v48 = vpop.permute.xlu1 %2659 }
 0x274   : > { %8720 = vst [vmem:[#allocation167_spill] sm:$0xff] %v6832_v48  ;;  %5311 = vlog2.f32 %v2808_v12  ;;  %v4436_v12 = vsel %vm1688_vm7, 1.0, %v8649_v11  ;;  %vm2204_vm7 = vcmp.eq.s32.totalorder %v8736_v18, %v6457_v31 }
 0x275   : > { %v1784_v44 = vmul.f32 10000000.0, %v4436_v12  ;;  %v5579_v12 = vld [vmem:[%s5831_s20 + $0x20] sm:$0xff] }
 0x27d   : > { %v5310_v45 = vpop.eup %5309 }
 0x27e   : > { %v2842_v42 = vmul.f32 0.6931472, %v5310_v45  ;;  %v5312_v24 = vpop.eup %5311 }
 0x294   : > { %v6834_v7 = vpop.xlane.xlu1 %2967 }
 0x295   : > { %8721 = vst [vmem:[#allocation168_spill] sm:$0xff] %v6834_v7 }
 0x298   : > { %v1341_v62 = vpop.permute.xlu1 %1340 }
 0x299   : > { %vm1447_vm8 = vcmp.eq.s32.totalorder %v1341_v62, %v6563_v29 }
 0x29a   : > { %v4403_v6 = vsel %vm1447_vm8, 1.0, %v8649_v11 }
 0x29b   : > { %v1543_v36 = vmul.f32 100000.0, %v4403_v6  ;;  %v2844_v6 = vmul.f32 0.6931472, %v5312_v24  ;;  %v6874_v24 = vld [vmem:[%s5881_s29 + $0x8] sm:$0x3f] }
 0x29c   : > { %v1344_v9 = vpop.permute.xlu1 %1343  ;;  %v6878_v1 = vrot.slane %v6874_v24, %v6440_v33  ;;  %v6987_v51 = vrot.slane %v6874_v24, %v8739_v46 }
 0x29d   : > { %v1815_v40 = vadd.f32 %v1783_v13, %v1543_v36  ;;  %vm1448_vm9 = vcmp.eq.s32.totalorder %v1344_v9, %v6563_v29  ;;  %v1268_v13 = vmul.f32 0.17677669, %v6331_v2  ;;  %v5581_v9 = vld [vmem:[%s5831_s20 + $0x40] sm:$0xff]  ;;  %v6865_v2 = vld [vmem:[%s5881_s29 + $0x10] sm:$0x3f] }
 0x29e   : > { %v4404_v49 = vsel %vm1448_vm9, 1.0, %v8649_v11  ;;  %v6973_v4 = vrot.slane %v6865_v2, %v8739_v46 }
 0x29f   : > { %v1544_v62 = vmul.f32 100000.0, %v4404_v49  ;;  %v2903_v19 = vadd.f32 %v2842_v42, %v1815_v40  ;;  %v5582_v40 = vld [vmem:[%s5831_s20 + $0x50] sm:$0xff]  ;;  %v5583_v42 = vld [vmem:[%s5831_s20 + $0x60] sm:$0xff]  ;;  %v6889_v49 = vrot.slane %v6865_v2, %v6531_v26 }
 0x2a1   : > { %v1816_v7 = vadd.f32 %v1784_v44, %v1544_v62  ;;  %v6847_v34 = vsub.f32 %v1267_v28, %v2903_v19  ;;  %v6892_v44 = vsel %vm1961_vm10, 1.0, %v8649_v11  ;;  %v6898_v28 = vrot.slane %v6874_v24, %v6531_v26  ;;  %v8726_v19 = vld [vmem:[#allocation12_spill] sm:$0xff] }
 0x2a2   : > { %vm1971_vm2 = vcmp.eq.s32.totalorder %v8726_v19, %v5908_v25  ;;  %8730 = vst [vmem:[#allocation12_spill] sm:$0xff] %v6927_v22  ;;  %v8742_v22 = vld [vmem:[#allocation54_spill] sm:$0xff] }
 0x2a3   : > { %8722 = vst [vmem:[#allocation169_spill] sm:$0xff] %v6847_v34  ;;  %2969 = vmax.xlane.f32.xlu0 %v6847_v34  ;;  %v2904_v45 = vadd.f32 %v2844_v6, %v1816_v7  ;;  %v6869_v7 = vrot.slane %v6865_v2, %v6440_v33  ;;  %v8727_v6 = vld [vmem:[#allocation11_spill] sm:$0xff] }
 0x2a4   : > { %vm1984_vm5 = vcmp.eq.s32.totalorder %v8731_v27, %v8727_v6  ;;  %v6959_v27 = vpop.permute.xlu1 %1349  ;;  %v5588_v34 = vld [vmem:[%s5831_s20 + $0x90] sm:$0xff] }
 0x2a5   : > { %v6851_v36 = vsub.f32 %v1268_v13, %v2904_v45  ;;  %v8728_v13 = vld [vmem:[#allocation13_spill] sm:$0xff]  ;;  %v8732_v45 = vld [vmem:[#allocation80_spill] sm:$0xff]  ;;  %vm2214_vm9 = vcmp.eq.s32.totalorder %v8740_v21, %v6869_v7 }
 0x2a6   : > { %vm1982_vm3 = vcmp.eq.s32.totalorder %v8728_v13, %v8727_v6  ;;  %v6933_v10 = vrot.slane %v6874_v24, %v8732_v45  ;;  %v4502_v13 = vsel %vm2202_vm4, 1.0, %v8649_v11  ;;  %v8744_v21 = vld [vmem:[#allocation21_spill] sm:$0xff] }
 0x2a7   : > { %8723 = vst [vmem:[#allocation170_spill] sm:$0xff] %v6851_v36  ;;  %2971 = vmax.xlane.f32.xlu0 %v6851_v36  ;;  %v6954_v19 = vsel %vm1982_vm3, 1.0, %v8649_v11  ;;  %v6963_v36 = vsel %vm1984_vm5, 1.0, %v8649_v11  ;;  %vm1963_vm13 = vcmp.eq.s32.totalorder %v8744_v21, %v6467_v35 }
 0x2a8   : > { %8735 = vst [vmem:[#allocation18_spill] sm:$0xff] %v6954_v19  ;;  %8737 = vst [vmem:[#allocation14_spill] sm:$0xff] %v6963_v36  ;;  %v8751_v36 = vld [vmem:[#allocation46_spill] sm:$0xff]  ;;  %v5590_v19 = vld [vmem:[%s5831_s20 + $0xb0] sm:$0xff] }
 0x2a9   : > { %vm1976_vm5 = vcmp.eq.s32.totalorder %v8751_v36, %v5891_v20 }
 0x2bd   : > { %1346 = vperm.xlu0 %5219, %v5579_v12   ;;  %v6937_v12 = vrot.slane %v6865_v2, %v8732_v45 }
 0x2c1   : > { %1352 = vperm.xlu0 %5219, %v5580_v3   ;;  %v6940_v3 = vsel %vm1978_vm14, 1.0, %v8649_v11 }
 0x2c5   : > { %1358 = vperm.xlu0 %5219, %v5581_v9   ;;  %v6943_v9 = vsel %vm1980_vm15, 1.0, %v8649_v11 }
 0x2c9   : > { %1364 = vperm.xlu0 %5219, %v5582_v40   ;;  %v6946_v40 = vsel %vm1970_vm1, 1.0, %v8649_v11  ;;  %vm2216_vm1 = vcmp.eq.s32.totalorder %v8747_v39, %v6869_v7 }
 0x2ca   : > { %8733 = vst [vmem:[#allocation13_spill] sm:$0xff] %v6946_v40 }
 0x2cd   : > { %1370 = vperm.xlu0 %5219, %v5583_v42   ;;  %v8734_v42 = vld [vmem:[#allocation17_spill] sm:$0xff] }
 0x2ce   : > { %vm1962_vm6 = vcmp.eq.s32.totalorder %v8734_v42, %v6467_v35  ;;  %v8738_v42 = vld [vmem:[#allocation20_spill] sm:$0xff] }
 0x2cf   : > { %vm2203_vm8 = vcmp.eq.s32.totalorder %v8738_v42, %v6457_v31  ;;  %v4470_v18 = vsel %vm1962_vm6, 1.0, %v8649_v11  ;;  %vm2456_vm6 = vcmp.eq.s32.totalorder %v8752_v61, %v6937_v12  ;;  %v8756_v61 = vld [vmem:[#allocation72_spill] sm:$0xff] }
 0x2d0   : > { %v2298_v42 = vadd.f32 %v4502_v13, %v4470_v18  ;;  %v6990_v59 = vsel %vm2203_vm8, 1.0, %v8649_v11  ;;  %v5589_v13 = vld [vmem:[%s5831_s20 + $0xa0] sm:$0xff]  ;;  %s4336_s20 = sshll.u32 %s456_s12, 3 }
 0x2d1   : > { %1376 = vperm.xlu0 %5219, %v6593_v41   ;;  %v6881_v41 = vld [vmem:[%s5881_s29 + $0x18] sm:$0x3f]  ;;  %s8100_s16 = scalar_lea.vmem %s8450_s6, %s4336_s20  ;;  %s382_s29 = sand.u32 1, %s5662_s22  }
 0x2d2   : > { %v6885_v5 = vrot.slane %v6881_v41, %v6440_v33  ;;  %v6902_v62 = vrot.slane %v6881_v41, %v6531_v26  ;;  %v6905_v33 = vsel %vm1973_vm11, 1.0, %v8649_v11  ;;  %v6918_v26 = vsel %vm1975_vm12, 1.0, %v8649_v11  ;;  %s4314_s13 = sshll.u32 %s382_s29, 6  ;;  %s8392_s9 = scalar_lea.sflag [#allocation3], %s382_s29 }
 0x2d3   : > { %8725 = vst [vmem:[#allocation172_spill] sm:$0xff] %v6918_v26  ;;  %v6969_v48 = vrot.slane %v6881_v41, %v8732_v45  ;;  %vm2444_vm11 = vcmp.eq.s32.totalorder %v8742_v22, %v6471_v53  ;;  %v8743_v26 = vld [vmem:[#allocation24_spill] sm:$0xff]  ;;  %v4504_v45 = vsel %vm2204_vm7, 1.0, %v8649_v11  ;;  %s384_s14 = scalar_lea.vmem [#allocation2], %s4314_s13  ;;  %s5695_s20 = smov [#allocation2]  }
 0x2d4   : > { %8724 = vst [vmem:[#allocation171_spill] sm:$0xff] %v6902_v62  ;;  %vm2206_vm12 = vcmp.eq.s32.totalorder %v8743_v26, %v6878_v1  ;;  %v8746_v22 = vld [vmem:[#allocation44_spill] sm:$0xff]  ;;  %v4514_v26 = vsel %vm2214_vm9, 1.0, %v8649_v11  ;;  %v4536_v17 = vsel %vm2444_vm11, 1.0, %v8649_v11  ;;  %v7011_v62 = vpop.permute.xlu1 %1355  ;;  %vm2454_vm9 = vcmp.eq.s32.totalorder %v8755_v30, %v6937_v12  ;;  %v8758_v30 = vld [vmem:[#allocation75_spill] sm:$0xff]  ;;  %s4099_s26 = sshll.u32 %s384_s14, 4  ;;  %s8385_s26 = int_to_ptr.vmem [resolvable:$true] %s4099_s26 }
 0x2d5   : > { %1382 = vperm.xlu0 %5219, %v5587_v8   ;;  %v6951_v8 = vsel %vm1971_vm2, 1.0, %v8649_v11  ;;  %vm1966_vm15 = vcmp.eq.s32.totalorder %v8746_v22, %v5908_v25  ;;  %vm1985_vm2 = vcmp.eq.s32.totalorder %v8748_v15, %v8727_v6  ;;  %v8749_v22 = vld [vmem:[#allocation37_spill] sm:$0xff]  ;;  %v4546_v40 = vsel %vm2454_vm9, 1.0, %v8649_v11  ;;  %v8766_v15 = vld [vmem:[#allocation27_spill] sm:$0xff]  ;;  %s5592_s12 = scalar_lea.vmem %s8385_s26, 1024  ;;  %s5596_s17 = sshll.u32 %s5695_s20, 4  ;;  %s5597_s17 = int_to_ptr.vmem [resolvable:$false] %s5596_s17 }
 0x2d6   : > { %vm1974_vm3 = vcmp.eq.s32.totalorder %v8749_v22, %v5891_v20  ;;  %v4474_v39 = vsel %vm1966_vm15, 1.0, %v8649_v11  ;;  %v4484_v20 = vsel %vm1976_vm5, 1.0, %v8649_v11  ;;  %p5593_p1 = scmp.ne.s32.totalorder %s8385_s26, %s5592_s12  ;;  %s5598_s18 = scalar_lea.vmem %s5597_s17, 2048 }
 0x2d7   : > { %v4482_v54 = vsel %vm1974_vm3, 1.0, %v8649_v11  ;;  %p5599_p5 = scmp.lt.s32.totalorder %s8385_s26, %s5597_s17  ;;  %p5600_p6 = scmp.lt.s32.totalorder %s5598_s18, %s5592_s12 }
 0x2d8   : > { %v2310_v0 = vadd.f32 %v4514_v26, %v4482_v54  ;;  %p5594_p2 = pnand %p5593_p1, %p5784_p3 }
 0x2d9   : > { %1388 = vperm.xlu0 %5219, %v5588_v34   ;;  %v8741_v34 = vld [vmem:[#allocation23_spill] sm:$0xff]  ;;  %p5601_p7 = por %p5600_p6, %p5599_p5 }
 0x2da   : > { %vm1964_vm10 = vcmp.eq.s32.totalorder %v8741_v34, %v6467_v35  ;;  %v8745_v34 = vld [vmem:[#allocation28_spill] sm:$0xff]  ;;  %p5595_p4 = pneg %p5594_p2 }
 0x2db   : > { %vm2442_vm14 = vcmp.eq.s32.totalorder %v8745_v34, %v6471_v53  ;;  %v4472_v18 = vsel %vm1964_vm10, 1.0, %v8649_v11  ;;  %v4506_v34 = vsel %vm2206_vm12, 1.0, %v8649_v11  ;;  %vm2696_vm10 = vcmp.eq.s32.totalorder %v8756_v61, %v6973_v4 }
 0x2dc   : > { %v2300_v14 = vadd.f32 %v4504_v45, %v4472_v18  ;;  %v4534_v47 = vsel %vm2442_vm14, 1.0, %v8649_v11  ;;  %v8753_v45 = vld [vmem:[#allocation35_spill] sm:$0xff]  ;;  %v4516_v18 = vsel %vm2216_vm1, 1.0, %v8649_v11  ;;  %vm2694_vm12 = vcmp.eq.s32.totalorder %v8758_v30, %v6973_v4  ;;  %v8760_v30 = vld [vmem:[#allocation25_spill] sm:$0xff]  ;;  %p5602_p9 = pnand %p5601_p7, %p5595_p4 }
 0x2dd   : > { %1394 = vperm.xlu0 %5219, %v5589_v13   ;;  %v8750_v13 = vld [vmem:[#allocation61_spill] sm:$0xff]  ;;  %vm2684_vm7 = vcmp.eq.s32.totalorder %v8753_v45, %v6498_v52  ;;  %v2302_v45 = vadd.f32 %v4506_v34, %v4474_v39  ;;  %v4580_v34 = vsel %vm2696_vm10, 1.0, %v8649_v11  ;;  %v7041_v39 = vpop.permute.xlu1 %1361  ;;  %vm2208_vm15 = vcmp.eq.s32.totalorder %v8760_v30, %v6878_v1 }
 0x2de   : > { %vm2446_vm4 = vcmp.eq.s32.totalorder %v8750_v13, %v6933_v10  ;;  %v2540_v22 = vadd.f32 %v4536_v17, %v2300_v14  ;;  %v8754_v13 = vld [vmem:[#allocation71_spill] sm:$0xff]  ;;  %v4548_v17 = vsel %vm2456_vm6, 1.0, %v8649_v11  ;;  %v8757_v14 = vld [vmem:[#allocation73_spill] sm:$0xff] }
 0x2df   : > { %vm2686_vm8 = vcmp.eq.s32.totalorder %v8754_v13, %v6987_v51  ;;  %v4538_v36 = vsel %vm2446_vm4, 1.0, %v8649_v11  ;;  %vm2682_vm11 = vcmp.eq.s32.totalorder %v8757_v14, %v6498_v52  ;;  %v2312_v13 = vadd.f32 %v4516_v18, %v4484_v20  ;;  %v8759_v14 = vld [vmem:[#allocation30_spill] sm:$0xff] }
 0x2e0   : > { %v4570_v38 = vsel %vm2686_vm8, 1.0, %v8649_v11  ;;  %v2542_v61 = vadd.f32 %v4538_v36, %v2302_v45  ;;  %vm2443_vm14 = vcmp.eq.s32.totalorder %v8759_v14, %v6471_v53  ;;  %v4566_v18 = vsel %vm2682_vm11, 1.0, %v8649_v11 }
 0x2e1   : > { %1400 = vperm.xlu0 %5219, %v5590_v19   ;;  %v4568_v19 = vsel %vm2684_vm7, 1.0, %v8649_v11  ;;  %v2552_v20 = vadd.f32 %v4548_v17, %v2312_v13  ;;  %v4578_v45 = vsel %vm2694_vm12, 1.0, %v8649_v11  ;;  %v2550_v14 = vadd.f32 %v4546_v40, %v2310_v0  ;;  %v8762_v17 = vld [vmem:[#allocation53_spill] sm:$0xff] }
 0x2e2   : > { %v2780_v55 = vadd.f32 %v4568_v19, %v2540_v22  ;;  %v4471_v22 = vsel %vm1963_vm13, 1.0, %v8649_v11  ;;  %v2538_v19 = vadd.f32 %v4534_v47, %v2298_v42  ;;  %v2782_v36 = vadd.f32 %v4570_v38, %v2542_v61  ;;  %v8764_v47 = vld [vmem:[#allocation19_spill] sm:$0xff]  ;;  %v7073_v61 = vpop.permute.xlu1 %1367 }
 0x2e3   : > { %v2792_v54 = vadd.f32 %v4580_v34, %v2552_v20  ;;  %v4535_v26 = vsel %vm2443_vm14, 1.0, %v8649_v11  ;;  %vm1968_vm3 = vcmp.eq.s32.totalorder %v8762_v17, %v5908_v25  ;;  %v7064_v38 = vsel %vm1985_vm2, 1.0, %v8649_v11  ;;  %v8770_v17 = vld [vmem:[#allocation29_spill] sm:$0xff] }
 0x2e4   : > { %v2812_v13 = vadd.f32 1e-09, %v2780_v55  ;;  %v2778_v35 = vadd.f32 %v4566_v18, %v2538_v19  ;;  %8763 = vst [vmem:[#allocation80_spill] sm:$0xff] %v7064_v38  ;;  %vm2201_vm13 = vcmp.eq.s32.totalorder %v8764_v47, %v6457_v31  ;;  %v2299_v0 = vadd.f32 %v6990_v59, %v4471_v22  ;;  %v8765_v55 = vld [vmem:[#allocation59_spill] sm:$0xff]  ;;  %v8767_v59 = vld [vmem:[#allocation16_spill] sm:$0xff]  ;;  %v8768_v19 = vld [vmem:[#allocation74_spill] sm:$0xff] }
 0x2e5   : > { %1406 = vperm.xlu0 %5219, %v5591_v43   ;;  %v8761_v43 = vld [vmem:[#allocation33_spill] sm:$0xff]  ;;  %v2790_v40 = vadd.f32 %v4578_v45, %v2550_v14  ;;  %v4508_v42 = vsel %vm2208_vm15, 1.0, %v8649_v11  ;;  %vm2448_vm4 = vcmp.eq.s32.totalorder %v8765_v55, %v6933_v10  ;;  %vm2211_vm2 = vcmp.eq.s32.totalorder %v8766_v15, %v6878_v1  ;;  %v8769_v45 = vld [vmem:[#allocation34_spill] sm:$0xff]  ;;  %v8775_v55 = vld [vmem:[#allocation39_spill] sm:$0xff] }
 0x2e6   : > { %vm2683_vm1 = vcmp.eq.s32.totalorder %v8761_v43, %v6498_v52  ;;  %v2539_v34 = vadd.f32 %v4535_v26, %v2299_v0  ;;  %v4476_v20 = vsel %vm1968_vm3, 1.0, %v8649_v11  ;;  %v2824_v18 = vadd.f32 1e-09, %v2792_v54  ;;  %v7099_v47 = vpop.permute.xlu1 %1373 }
 0x2e7   : > { %v4567_v21 = vsel %vm2683_vm1, 1.0, %v8649_v11  ;;  %vm1987_vm5 = vcmp.eq.s32.totalorder %v8767_v59, %v8727_v6  ;;  %5313 = vlog2.f32 %v2812_v13  ;;  %v2810_v22 = vadd.f32 1e-09, %v2778_v35  ;;  %v8772_v35 = vld [vmem:[#allocation32_spill] sm:$0xff] }
 0x2e8   : > { %vm2688_vm6 = vcmp.eq.s32.totalorder %v8768_v19, %v6987_v51  ;;  %vm1689_vm7 = vcmp.ne.s32.totalorder %v8769_v45, %v6544_v16  ;;  %v4540_v30 = vsel %vm2448_vm4, 1.0, %v8649_v11  ;;  %v2822_v43 = vadd.f32 1e-09, %v2790_v40  ;;  %v7101_v40 = vpop.f32.mrb[15].mxu1 }
 0x2e9   : > { %1412 = vperm.xlu0 %5219, %v6487_v57   ;;  %v2814_v57 = vadd.f32 1e-09, %v2782_v36  ;;  %v2779_v36 = vadd.f32 %v4567_v21, %v2539_v34  ;;  %v4501_v14 = vsel %vm2201_vm13, 1.0, %v8649_v11  ;;  %v4511_v54 = vsel %vm2211_vm2, 1.0, %v8649_v11  ;;  %8773 = vst [vmem:[#allocation17_spill] sm:$0xff] %v7101_v40  ;;  %v8774_v21 = vld [vmem:[#allocation36_spill] sm:$0xff] }
 0x2ea   : > { %v2304_v26 = vadd.f32 %v4508_v42, %v4476_v20  ;;  %vm2226_vm8 = vcmp.eq.s32.totalorder %v8770_v17, %v6885_v5  ;;  %v4572_v13 = vsel %vm2688_vm6, 1.0, %v8649_v11  ;;  %vm2681_vm10 = vcmp.eq.s32.totalorder %v8772_v35, %v6498_v52  ;;  %v8777_v34 = vld [vmem:[#allocation41_spill] sm:$0xff]  ;;  %v8783_v52 = vld [vmem:[#allocation62_spill] sm:$0xff]  ;;  %v7159_v17 = vpop.permute.xlu1 %1379  ;;  %v8786_v35 = vld [vmem:[#allocation67_spill] sm:$0xff] }
 0x2eb   : > { %5315 = vlog2.f32 %v2814_v57  ;;  %v4437_v0 = vsel %vm1689_vm7, 1.0, %v8649_v11  ;;  %v2811_v42 = vadd.f32 1e-09, %v2779_v36  ;;  %vm1692_vm11 = vcmp.ne.s32.totalorder %v8774_v21, %v6544_v16 }
 0x2ec   : > { %5317 = vlog2.f32 %v2824_v18  ;;  %v2544_v31 = vadd.f32 %v4540_v30, %v2304_v26  ;;  %vm2213_vm12 = vcmp.eq.s32.totalorder %v8775_v55, %v6869_v7  ;;  %v7112_v57 = vsel %vm1987_vm5, 1.0, %v8649_v11  ;;  %v8781_v30 = vld [vmem:[#allocation42_spill] sm:$0xff]  ;;  %v8785_v26 = vld [vmem:[#allocation76_spill] sm:$0xff] }
 0x2ed   : > { %1421 = vperm.xlu0 %5219, %v6776_v58   ;;  %v8771_v58 = vld [vmem:[#allocation31_spill] sm:$0xff]  ;;  %5319 = vlog2.f32 %v2810_v22  ;;  %8776 = vst [vmem:[#allocation26_spill] sm:$0xff] %v7112_v57  ;;  %v7115_v15 = vadd.f32 %v4501_v14, %v6892_v44  ;;  %vm1704_vm14 = vcmp.ne.s32.totalorder %v8777_v34, %v6889_v49  ;;  %v7120_v20 = vadd.f32 %v4511_v54, %v6951_v8  ;;  %v8784_v14 = vld [vmem:[#allocation66_spill] sm:$0xff] }
 0x2ee   : > { %vm2228_vm9 = vcmp.eq.s32.totalorder %v8771_v58, %v6885_v5  ;;  %5321 = vlog2.f32 %v2822_v43  ;;  %v7126_v18 = vsel %vm2226_vm8, 1.0, %v8649_v11  ;;  %v7136_v44 = vrot.slane %v6881_v41, %v8739_v46  ;;  %v8782_v46 = vld [vmem:[#allocation47_spill] sm:$0xff]  ;;  %v8787_v55 = vld [vmem:[#allocation86_spill] sm:$0xff] }
 0x2ef   : > { %8778 = vst [vmem:[#allocation20_spill] sm:$0xff] %v7126_v18  ;;  %v7132_v59 = vsel %vm2228_vm9, 1.0, %v8649_v11  ;;  %v7142_v8 = vsel %vm2681_vm10, 1.0, %v8649_v11  ;;  %v7144_v22 = vmul.f32 10000000.0, %v4437_v0  ;;  %v4440_v19 = vsel %vm1692_vm11, 1.0, %v8649_v11 }
 0x2f0   : > { %8779 = vst [vmem:[#allocation83_spill] sm:$0xff] %v7132_v59  ;;  %v4513_v36 = vsel %vm2213_vm12, 1.0, %v8649_v11  ;;  %5323 = vlog2.f32 %v2811_v42  ;;  %v4452_v45 = vsel %vm1704_vm14, 1.0, %v8649_v11  ;;  %vm1965_vm15 = vcmp.eq.s32.totalorder %v8781_v30, %v5908_v25  ;;  %v8788_v30 = vld [vmem:[#allocation96_spill] sm:$0xff] }
 0x2f1   : > { %5224 = vset.pattern.permute.xlu0 %v8601_v50  ;;  %v2784_v50 = vadd.f32 %v4572_v13, %v2544_v31  ;;  %8780 = vst [vmem:[#allocation22_spill] sm:$0xff] %v7144_v22  ;;  %vm1698_vm1 = vcmp.ne.s32.totalorder %v8782_v46, %v6898_v28  ;;  %v5314_v43 = vpop.eup %5313  ;;  %vm2458_vm3 = vcmp.eq.s32.totalorder %v8783_v52, %v6937_v12  ;;  %v7161_v58 = vmul.f32 10000000.0, %v4440_v19 }
 0x2f2   : > { %vm2450_vm13 = vcmp.eq.s32.totalorder %v8784_v14, %v6933_v10  ;;  %vm1690_vm4 = vcmp.ne.s32.totalorder %v8785_v26, %v6544_v16  ;;  %v7164_v13 = vadd.f32 %v4513_v36, %v6905_v33  ;;  %vm2462_vm2 = vcmp.eq.s32.totalorder %v8786_v35, %v6969_v48  ;;  %v8789_v14 = vld [vmem:[#allocation85_spill] sm:$0xff] }
 0x2f3   : > { %v2816_v54 = vadd.f32 1e-09, %v2784_v50  ;;  %vm1450_vm5 = vcmp.eq.s32.totalorder %v6959_v27, %v6563_v29  ;;  %v7170_v31 = vmul.f32 10000000.0, %v4452_v45  ;;  %v7173_v42 = vsel %vm1965_vm15, 1.0, %v8649_v11 }
 0x2f4   : > { %v7176_v21 = vsel %vm1698_vm1, 1.0, %v8649_v11  ;;  %vm2218_vm6 = vcmp.eq.s32.totalorder %v8787_v55, %v6869_v7  ;;  %v4550_v34 = vsel %vm2458_vm3, 1.0, %v8649_v11  ;;  %v7182_v50 = vsel %vm2450_vm13, 1.0, %v8649_v11 }
 0x2f5   : > { %v5316_v0 = vpop.eup %5315  ;;  %v4438_v27 = vsel %vm1690_vm4, 1.0, %v8649_v11  ;;  %v7185_v19 = vmul.f32 0.6931472, %v5314_v43  ;;  %v7188_v45 = vsel %vm2462_vm2, 1.0, %v8649_v11  ;;  %5325 = vlog2.f32 %v2816_v54  ;;  %v8790_v43 = vld [vmem:[#allocation94_spill] sm:$0xff] }
 0x2f6   : > { %v5318_v33 = vpop.eup %5317  ;;  %vm2220_vm7 = vcmp.eq.s32.totalorder %v8788_v30, %v6869_v7  ;;  %v4406_v46 = vsel %vm1450_vm5, 1.0, %v8649_v11  ;;  %vm2700_vm8 = vcmp.eq.s32.totalorder %v8789_v14, %v6973_v4  ;;  %v4518_v26 = vsel %vm2218_vm6, 1.0, %v8649_v11  ;;  %v1386_v30 = vpop.permute.xlu1 %1385  ;;  %v8791_v14 = vld [vmem:[#allocation88_spill] sm:$0xff] }
 0x2f7   : > { %v5320_v36 = vpop.eup %5319  ;;  %vm1452_vm9 = vcmp.eq.s32.totalorder %v7011_v62, %v6563_v29  ;;  %v7200_v35 = vrot.slane %v6865_v2, %v8790_v43  ;;  %v1786_v55 = vmul.f32 10000000.0, %v4438_v27  ;;  %vm2460_vm10 = vcmp.eq.s32.totalorder %v6596_v63, %v6937_v12 }
 0x2f8   : > { %v5322_v52 = vpop.eup %5321  ;;  %v7204_v54 = vmul.f32 0.6931472, %v5316_v0  ;;  %v7206_v40 = vmul.f32 0.6931472, %v5318_v33  ;;  %vm1702_vm11 = vcmp.ne.s32.totalorder %v8791_v14, %v6889_v49  ;;  %v4520_v57 = vsel %vm2220_vm7, 1.0, %v8649_v11  ;;  %v8793_v0 = vld [vmem:[#allocation89_spill] sm:$0xff] }
 0x2f9   : > { %v1546_v38 = vmul.f32 100000.0, %v4406_v46  ;;  %v2848_v62 = vmul.f32 0.6931472, %v5320_v36  ;;  %v4584_v59 = vsel %vm2700_vm8, 1.0, %v8649_v11  ;;  %v2314_v2 = vadd.f32 %v4518_v26, %v6940_v3 }
 0x2fa   : > { %v4408_v27 = vsel %vm1452_vm9, 1.0, %v8649_v11  ;;  %v7214_v18 = vmul.f32 0.6931472, %v5322_v52  ;;  %v7216_v63 = vpop.eup %5323  ;;  %vm2692_vm12 = vcmp.eq.s32.totalorder %v8793_v0, %v6987_v51  ;;  %v4552_v33 = vsel %vm2460_vm10, 1.0, %v8649_v11 }
 0x2fb   : > { %8792 = vst [vmem:[#allocation23_spill] sm:$0xff] %v7216_v63  ;;  %v7223_v14 = vrot.slane %v6874_v24, %v8790_v43  ;;  %vm1462_vm14 = vcmp.eq.s32.totalorder %v1386_v30, %v7200_v35  ;;  %v4450_v36 = vsel %vm1702_vm11, 1.0, %v8649_v11  ;;  %v2316_v3 = vadd.f32 %v4520_v57, %v6943_v9 }
 0x2fc   : > { %vm1694_vm15 = vcmp.ne.s32.totalorder %v6569_v56, %v6898_v28  ;;  %vm2698_vm1 = vcmp.eq.s32.totalorder %v6600_v60, %v6973_v4  ;;  %vm2210_vm3 = vcmp.eq.s32.totalorder %v6617_v23, %v6878_v1  ;;  %vm2212_vm13 = vcmp.eq.s32.totalorder %v6628_v32, %v6878_v1 }
 0x2fd   : > { %v1818_v24 = vadd.f32 %v1786_v55, %v1546_v38  ;;  %v1548_v46 = vmul.f32 100000.0, %v4408_v27  ;;  %v4576_v52 = vsel %vm2692_vm12, 1.0, %v8649_v11  ;;  %v2556_v26 = vadd.f32 %v4552_v33, %v2316_v3  ;;  %v8794_v38 = vld [vmem:[#allocation108_spill] sm:$0xff] }
 0x2fe   : > { %v2554_v30 = vadd.f32 %v4550_v34, %v2314_v2  ;;  %v4418_v9 = vsel %vm1462_vm14, 1.0, %v8649_v11  ;;  %v1798_v57 = vmul.f32 10000000.0, %v4450_v36  ;;  %v4442_v56 = vsel %vm1694_vm15, 1.0, %v8649_v11  ;;  %v1392_v34 = vpop.permute.xlu1 %1391  ;;  %v8795_v2 = vld [vmem:[#allocation126_spill] sm:$0xff] }
 0x2ff   : > { %v4582_v0 = vsel %vm2698_vm1, 1.0, %v8649_v11  ;;  %vm1454_vm4 = vcmp.eq.s32.totalorder %v7041_v39, %v7223_v14  ;;  %v7242_v60 = vpop.eup %5325  ;;  %v4510_v32 = vsel %vm2210_vm3, 1.0, %v8649_v11  ;;  %vm1972_vm2 = vcmp.eq.s32.totalorder %v6621_v37, %v5908_v25  ;;  %v8796_v39 = vld [vmem:[#allocation102_spill] sm:$0xff]  ;;  %v8797_v37 = vld [vmem:[#allocation13_spill] sm:$0xff] }
 0x300   : > { %v4512_v23 = vsel %vm2212_vm13, 1.0, %v8649_v11  ;;  %vm2452_vm5 = vcmp.eq.s32.totalorder %v8794_v38, %v6933_v10  ;;  %v1820_v55 = vadd.f32 %v7161_v58, %v1548_v46  ;;  %v1270_v27 = vmul.f32 0.17677669, %v8795_v2  ;;  %v8798_v46 = vld [vmem:[#allocation109_spill] sm:$0xff] }
 0x301   : > { %v2906_v33 = vadd.f32 %v2848_v62, %v1818_v24  ;;  %v1558_v36 = vmul.f32 100000.0, %v4418_v9  ;;  %vm1696_vm6 = vcmp.ne.s32.totalorder %v8796_v39, %v6898_v28  ;;  %v2796_v3 = vadd.f32 %v4584_v59, %v2556_v26  ;;  %v8799_v62 = vld [vmem:[#allocation113_spill] sm:$0xff] }
 0x302   : > { %v2794_v6 = vadd.f32 %v4582_v0, %v2554_v30  ;;  %v4410_v63 = vsel %vm1454_vm4, 1.0, %v8649_v11  ;;  %v2306_v22 = vadd.f32 %v4510_v32, %v8797_v37  ;;  %v4480_v29 = vsel %vm1972_vm2, 1.0, %v8649_v11  ;;  %v8800_v24 = vld [vmem:[#allocation125_spill] sm:$0xff] }
 0x303   : > { %v4544_v38 = vsel %vm2452_vm5, 1.0, %v8649_v11  ;;  %vm1464_vm7 = vcmp.eq.s32.totalorder %v1392_v34, %v7200_v35  ;;  %v2308_v58 = vadd.f32 %v4512_v23, %v4480_v29  ;;  %vm2690_vm8 = vcmp.eq.s32.totalorder %v8798_v46, %v6987_v51  ;;  %v1398_v29 = vpop.permute.xlu1 %1397 }
 0x304   : > { %vm2222_vm9 = vcmp.eq.s32.totalorder %v8799_v62, %v6885_v5  ;;  %v1272_v59 = vmul.f32 0.17677669, %v8800_v24  ;;  %v2908_v26 = vadd.f32 %v7185_v19, %v1820_v55  ;;  %v7265_v30 = vsub.f32 %v1270_v27, %v2906_v33  ;;  %v8803_v55 = vld [vmem:[#allocation52_spill] sm:$0xff] }
 0x305   : > { %v1550_v9 = vmul.f32 100000.0, %v4410_v63  ;;  %v1830_v0 = vadd.f32 %v1798_v57, %v1558_v36  ;;  %v1790_v32 = vmul.f32 10000000.0, %v4442_v56  ;;  %v2826_v2 = vadd.f32 1e-09, %v2794_v6  ;;  %v8801_v63 = vld [vmem:[#allocation118_spill] sm:$0xff] }
 0x306   : > { %v2548_v37 = vadd.f32 %v4544_v38, %v2308_v58  ;;  %v4420_v34 = vsel %vm1464_vm7, 1.0, %v8649_v11  ;;  %v4444_v23 = vsel %vm1696_vm6, 1.0, %v8649_v11  ;;  %v2828_v46 = vadd.f32 1e-09, %v2796_v3  ;;  %v8802_v57 = vld [vmem:[#allocation142_spill] sm:$0xff]  ;;  %v8804_v27 = vld [vmem:[#allocation92_spill] sm:$0xff] }
 0x307   : > { %v4574_v24 = vsel %vm2690_vm8, 1.0, %v8649_v11  ;;  %vm1456_vm10 = vcmp.eq.s32.totalorder %v7073_v61, %v7223_v14  ;;  %v2546_v19 = vadd.f32 %v7182_v50, %v2306_v22  ;;  %v4522_v6 = vsel %vm2222_vm9, 1.0, %v8649_v11  ;;  %v8805_v58 = vld [vmem:[#allocation18_spill] sm:$0xff] }
 0x308   : > { %vm2224_vm11 = vcmp.eq.s32.totalorder %v8801_v63, %v6885_v5  ;;  %v1282_v56 = vmul.f32 0.17677669, %v8802_v57  ;;  %vm2441_vm12 = vcmp.eq.s32.totalorder %v8803_v55, %v6471_v53  ;;  %vm2704_vm14 = vcmp.eq.s32.totalorder %v8804_v27, %v7136_v44  ;;  %v8806_v57 = vld [vmem:[#allocation114_spill] sm:$0xff] }
 0x309   : > { %v7288_v61 = vsub.f32 %v1272_v59, %v2908_v26  ;;  %v1822_v33 = vadd.f32 %v1790_v32, %v1550_v9  ;;  %v1560_v22 = vmul.f32 100000.0, %v4420_v34  ;;  %v2918_v50 = vadd.f32 %v7214_v18, %v1830_v0  ;;  %v8808_v59 = vld [vmem:[#allocation127_spill] sm:$0xff]  ;;  %v1404_v0 = vpop.permute.xlu1 %1403 }
 0x30a   : > { %5327 = vlog2.f32 %v2826_v2  ;;  %v2788_v36 = vadd.f32 %v4576_v52, %v2548_v37  ;;  %v2786_v39 = vadd.f32 %v4574_v24, %v2546_v19  ;;  %v4412_v3 = vsel %vm1456_vm10, 1.0, %v8649_v11  ;;  %v8807_v52 = vld [vmem:[#allocation122_spill] sm:$0xff]  ;;  %v8809_v26 = vld [vmem:[#allocation131_spill] sm:$0xff] }
 0x30b   : > { %v1792_v38 = vmul.f32 10000000.0, %v4444_v23  ;;  %v2318_v62 = vadd.f32 %v4522_v6, %v8805_v58  ;;  %vm1706_vm15 = vcmp.ne.s32.totalorder %v8806_v57, %v6889_v49  ;;  %vm1466_vm1 = vcmp.eq.s32.totalorder %v1398_v29, %v7200_v35  ;;  %v8813_v57 = vld [vmem:[#allocation48_spill] sm:$0xff] }
 0x30c   : > { %2975 = vmax.xlane.f32.xlu0 %v7265_v30  ;;  %v4524_v18 = vsel %vm2224_vm11, 1.0, %v8649_v11  ;;  %vm2464_vm3 = vcmp.eq.s32.totalorder %v8807_v52, %v6969_v48  ;;  %vm2702_vm13 = vcmp.eq.s32.totalorder %v8808_v59, %v7136_v44  ;;  %v1274_v9 = vmul.f32 0.17677669, %v8809_v26  ;;  %v8814_v26 = vld [vmem:[#allocation130_spill] sm:$0xff] }
 0x30d   : > { %v1552_v32 = vmul.f32 100000.0, %v4412_v3  ;;  %v2910_v2 = vadd.f32 %v7204_v54, %v1822_v33  ;;  %v1832_v37 = vadd.f32 %v7170_v31, %v1560_v22  ;;  %v7308_v34 = vsub.f32 %v1282_v56, %v2918_v50  ;;  %v8810_v54 = vld [vmem:[#allocation14_spill] sm:$0xff]  ;;  %v8811_v56 = vld [vmem:[#allocation119_spill] sm:$0xff]  ;;  %v8812_v33 = vld [vmem:[#allocation141_spill] sm:$0xff] }
 0x30e   : > { %5329 = vlog2.f32 %v2828_v46  ;;  %v2820_v29 = vadd.f32 1e-09, %v2788_v36  ;;  %v2818_v23 = vadd.f32 1e-09, %v2786_v39  ;;  %v4422_v24 = vsel %vm1466_vm1, 1.0, %v8649_v11 }
 0x30f   : > { %v4556_v19 = vsel %vm2464_vm3, 1.0, %v8649_v11  ;;  %v2558_v6 = vadd.f32 %v7188_v45, %v2318_v62  ;;  %v4586_v63 = vsel %vm2702_vm13, 1.0, %v8649_v11  ;;  %vm1468_vm4 = vcmp.eq.s32.totalorder %v1404_v0, %v7200_v35 }
 0x310   : > { %2979 = vmax.xlane.f32.xlu0 %v7288_v61  ;;  %v4454_v31 = vsel %vm1706_vm15, 1.0, %v8649_v11  ;;  %v2320_v46 = vadd.f32 %v4524_v18, %v8810_v54  ;;  %vm1708_vm2 = vcmp.ne.s32.totalorder %v8811_v56, %v6889_v49  ;;  %v1284_v22 = vmul.f32 0.17677669, %v8812_v33  ;;  %v8817_v54 = vld [vmem:[#allocation143_spill] sm:$0xff] }
 0x311   : > { %v1824_v50 = vadd.f32 %v1792_v38, %v1552_v32  ;;  %v7324_v45 = vsub.f32 %v1274_v9, %v2910_v2  ;;  %v2920_v36 = vadd.f32 %v7206_v40, %v1832_v37  ;;  %v1562_v39 = vmul.f32 100000.0, %v4422_v24 }
 0x312   : > { %5331 = vlog2.f32 %v2818_v23  ;;  %v2560_v3 = vadd.f32 %v4556_v19, %v2320_v46  ;;  %v2798_v58 = vadd.f32 %v4586_v63, %v2558_v6  ;;  %v4424_v62 = vsel %vm1468_vm4, 1.0, %v8649_v11  ;;  %v1410_v23 = vpop.permute.xlu1 %1409  ;;  %v8815_v63 = vld [vmem:[#allocation171_spill] sm:$0xff]  ;;  %v8818_v46 = vld [vmem:[#allocation148_spill] sm:$0xff] }
 0x313   : > { %vm2205_vm5 = vcmp.eq.s32.totalorder %v8813_v57, %v6878_v1  ;;  %v1802_v18 = vmul.f32 10000000.0, %v4454_v31  ;;  %v2860_v52 = vmul.f32 0.6931472, %v7242_v60  ;;  %vm1458_vm6 = vcmp.eq.s32.totalorder %v7099_v47, %v7223_v14  ;;  %v8816_v31 = vld [vmem:[#allocation49_spill] sm:$0xff] }
 0x314   : > { %2999 = vmax.xlane.f32.xlu0 %v7308_v34  ;;  %v5328_v38 = vpop.eup %5327  ;;  %v4533_v40 = vsel %vm2441_vm12, 1.0, %v8649_v11  ;;  %v4588_v59 = vsel %vm2704_vm14, 1.0, %v8649_v11  ;;  %v4456_v60 = vsel %vm1708_vm2, 1.0, %v8649_v11  ;;  %v1276_v47 = vmul.f32 0.17677669, %v8814_v26  ;;  %v8821_v26 = vld [vmem:[#allocation50_spill] sm:$0xff] }
 0x315   : > { %v2912_v9 = vadd.f32 %v2860_v52, %v1824_v50  ;;  %v7347_v0 = vsub.f32 %v1284_v22, %v2920_v36  ;;  %v1834_v32 = vadd.f32 %v1802_v18, %v1562_v39  ;;  %v1564_v2 = vmul.f32 100000.0, %v4424_v62 }
 0x316   : > { %5333 = vlog2.f32 %v2820_v29  ;;  %v2800_v53 = vadd.f32 %v4588_v59, %v2560_v3  ;;  %v2830_v55 = vadd.f32 1e-09, %v2798_v58  ;;  %v4414_v37 = vsel %vm1458_vm6, 1.0, %v8649_v11  ;;  %v1416_v52 = vpop.permute.xlu1 %1415 }
 0x317   : > { %v1804_v27 = vmul.f32 10000000.0, %v4456_v60  ;;  %vm1460_vm7 = vcmp.eq.s32.totalorder %v7159_v17, %v7223_v14  ;;  %v2880_v24 = vmul.f32 0.6931472, %v5328_v38  ;;  %v7354_v19 = vrot.slane %v6881_v41, %v8790_v43 }
 0x318   : > { %2983 = vmax.xlane.f32.xlu0 %v7324_v45  ;;  %v5330_v6 = vpop.eup %5329  ;;  %v4505_v29 = vsel %vm2205_vm5, 1.0, %v8649_v11  ;;  %vm1712_vm8 = vcmp.ne.s32.totalorder %v8816_v31, %v8815_v63  ;;  %vm1700_vm9 = vcmp.ne.s32.totalorder %v8817_v54, %v6898_v28  ;;  %v1286_v56 = vmul.f32 0.17677669, %v8818_v46 }
 0x319   : > { %v7366_v33 = vsub.f32 %v1276_v47, %v2912_v9  ;;  %v1554_v41 = vmul.f32 100000.0, %v4414_v37  ;;  %v1836_v43 = vadd.f32 %v1804_v27, %v1564_v2  ;;  %v2922_v22 = vadd.f32 %v2880_v24, %v1834_v32  ;;  %v8822_v32 = vld [vmem:[#allocation55_spill] sm:$0xff]  ;;  %v8823_v37 = vld [vmem:[#allocation56_spill] sm:$0xff]  ;;  %v8825_v27 = vld [vmem:[#allocation137_spill] sm:$0xff] }
 0x31a   : > { %v2537_v50 = vadd.f32 %v4533_v40, %v7115_v15  ;;  %v2832_v36 = vadd.f32 1e-09, %v2800_v53  ;;  %5335 = vlog2.f32 %v2830_v55  ;;  %v4416_v39 = vsel %vm1460_vm7, 1.0, %v8649_v11 }
 0x31b   : > { %v1794_v3 = vmul.f32 10000000.0, %v7176_v21  ;;  %v2301_v58 = vadd.f32 %v4505_v29, %v7173_v42  ;;  %v2884_v62 = vmul.f32 0.6931472, %v5330_v6  ;;  %vm1470_vm10 = vcmp.eq.s32.totalorder %v1410_v23, %v7354_v19  ;;  %v8819_v21 = vld [vmem:[#allocation155_spill] sm:$0xff]  ;;  %v8824_v23 = vld [vmem:[#allocation58_spill] sm:$0xff] }
 0x31c   : > { %3003 = vmax.xlane.f32.xlu0 %v7347_v0  ;;  %v5332_v57 = vpop.eup %5331  ;;  %v4460_v15 = vsel %vm1712_vm8, 1.0, %v8649_v11  ;;  %v4448_v17 = vsel %vm1700_vm9, 1.0, %v8649_v11  ;;  %vm1710_vm11 = vcmp.ne.s32.totalorder %v8819_v21, %v8815_v63  ;;  %v8820_v42 = vld [vmem:[#allocation147_spill] sm:$0xff]  ;;  %v1556_v40 = vmul.f32 100000.0, %v4416_v39  ;;  %v8829_v21 = vld [vmem:[#allocation136_spill] sm:$0xff] }
 0x31d   : > { %v1288_v18 = vmul.f32 0.17677669, %v8820_v42  ;;  %v1826_v38 = vadd.f32 %v1794_v3, %v1554_v41  ;;  %v2924_v59 = vadd.f32 %v2884_v62, %v1836_v43  ;;  %v7388_v60 = vsub.f32 %v1286_v56, %v2922_v22  ;;  %v8826_v62 = vld [vmem:[#allocation63_spill] sm:$0xff] }
 0x31e   : > { %vm2215_vm12 = vcmp.eq.s32.totalorder %v8821_v26, %v6869_v7  ;;  %v2777_v47 = vadd.f32 %v7142_v8, %v2537_v50  ;;  %5337 = vlog2.f32 %v2832_v36  ;;  %v4426_v9 = vsel %vm1470_vm10, 1.0, %v8649_v11  ;;  %v8831_v26 = vld [vmem:[#allocation172_spill] sm:$0xff] }
 0x31f   : > { %vm2207_vm14 = vcmp.eq.s32.totalorder %v8822_v32, %v6878_v1  ;;  %v1796_v2 = vmul.f32 10000000.0, %v4448_v17  ;;  %v2864_v53 = vmul.f32 0.6931472, %v5332_v57  ;;  %vm1472_vm15 = vcmp.eq.s32.totalorder %v1416_v52, %v7354_v19  ;;  %v8827_v57 = vld [vmem:[#allocation65_spill] sm:$0xff]  ;;  %v8828_v17 = vld [vmem:[#allocation68_spill] sm:$0xff] }
 0x320   : > { %2987 = vmax.xlane.f32.xlu0 %v7366_v33  ;;  %v5334_v55 = vpop.eup %5333  ;;  %vm2445_vm1 = vcmp.eq.s32.totalorder %v8823_v37, %v6933_v10  ;;  %vm2453_vm3 = vcmp.eq.s32.totalorder %v8824_v23, %v6937_v12  ;;  %v4458_v8 = vsel %vm1710_vm11, 1.0, %v8649_v11  ;;  %v1278_v24 = vmul.f32 0.17677669, %v8825_v27  ;;  %v8833_v23 = vld [vmem:[#allocation12_spill] sm:$0xff] }
 0x321   : > { %v1828_v6 = vadd.f32 %v1796_v2, %v1556_v40  ;;  %v2914_v29 = vadd.f32 %v2864_v53, %v1826_v38  ;;  %v7407_v31 = vsub.f32 %v1288_v18, %v2924_v59  ;;  %v1566_v54 = vmul.f32 100000.0, %v4426_v9  ;;  %v8832_v9 = vld [vmem:[#allocation64_spill] sm:$0xff] }
 0x322   : > { %v4515_v46 = vsel %vm2215_vm12, 1.0, %v8649_v11  ;;  %v2809_v56 = vadd.f32 1e-09, %v2777_v47  ;;  %v4507_v41 = vsel %vm2207_vm14, 1.0, %v8649_v11  ;;  %v4428_v43 = vsel %vm1472_vm15, 1.0, %v8649_v11 }
 0x323   : > { %v4537_v22 = vsel %vm2445_vm1, 1.0, %v8649_v11  ;;  %v4545_v50 = vsel %vm2453_vm3, 1.0, %v8649_v11  ;;  %v1806_v36 = vmul.f32 10000000.0, %v4458_v8  ;;  %v2868_v39 = vmul.f32 0.6931472, %v5334_v55 }
 0x324   : > { %3007 = vmax.xlane.f32.xlu0 %v7388_v60  ;;  %v5336_v3 = vpop.eup %5335  ;;  %vm2455_vm13 = vcmp.eq.s32.totalorder %v8826_v62, %v6937_v12  ;;  %vm2447_vm4 = vcmp.eq.s32.totalorder %v8827_v57, %v6933_v10  ;;  %vm2693_vm2 = vcmp.eq.s32.totalorder %v8828_v17, %v6973_v4  ;;  %v1280_v42 = vmul.f32 0.17677669, %v8829_v21  ;;  %v8841_v62 = vld [vmem:[#allocation93_spill] sm:$0xff]  ;;  %v8842_v17 = vld [vmem:[#allocation10_spill] sm:$0xff] }
 0x325   : > { %v2916_v18 = vadd.f32 %v2868_v39, %v1828_v6  ;;  %v7428_v52 = vsub.f32 %v1278_v24, %v2914_v29  ;;  %v1838_v38 = vadd.f32 %v1806_v36, %v1566_v54  ;;  %v1568_v40 = vmul.f32 100000.0, %v4428_v43  ;;  %v8834_v24 = vld [vmem:[#allocation84_spill] sm:$0xff]  ;;  %v7441_v6 = vpop.xlane.xlu0 %2965  ;;  %v8839_v39 = vld [vmem:[#allocation70_spill] sm:$0xff]  ;;  %v8843_v21 = vld [vmem:[#allocation81_spill] sm:$0xff] }
 0x326   : > { %v1808_v59 = vmul.f32 10000000.0, %v4460_v15  ;;  %v2311_v47 = vadd.f32 %v4515_v46, %v8831_v26  ;;  %5339 = vlog2.f32 %v2809_v56  ;;  %vm2459_vm5 = vcmp.eq.s32.totalorder %v8832_v9, %v6937_v12  ;;  %v8836_v46 = vld [vmem:[#allocation153_spill] sm:$0xff] }
 0x327   : > { %8830 = vst [vmem:[#allocation54_spill] sm:$0xff] %v7428_v52  ;;  %v4547_v32 = vsel %vm2455_vm13, 1.0, %v8649_v11  ;;  %v4539_v2 = vsel %vm2447_vm4, 1.0, %v8649_v11  ;;  %v4577_v53 = vsel %vm2693_vm2, 1.0, %v8649_v11  ;;  %v2888_v55 = vmul.f32 0.6931472, %v5336_v3 }
 0x328   : > { %3011 = vmax.xlane.f32.xlu0 %v7407_v31  ;;  %v5338_v37 = vpop.eup %5337  ;;  %v2303_v8 = vadd.f32 %v4507_v41, %v8833_v23  ;;  %v2541_v27 = vadd.f32 %v4537_v22, %v2301_v58  ;;  %v2549_v15 = vadd.f32 %v4545_v50, %v7164_v13  ;;  %vm2217_vm6 = vcmp.eq.s32.totalorder %v8834_v24, %v6869_v7  ;;  %v8837_v13 = vld [vmem:[#allocation38_spill] sm:$0xff]  ;;  %v8838_v50 = vld [vmem:[#allocation40_spill] sm:$0xff]  ;;  %v8840_v3 = vld [vmem:[#allocation77_spill] sm:$0xff] }
 0x329   : > { %v7443_v29 = vsub.f32 %v1280_v42, %v2916_v18  ;;  %v1840_v54 = vadd.f32 %v1808_v59, %v1568_v40  ;;  %v1290_v56 = vmul.f32 0.17677669, %v8836_v46  ;;  %v2926_v43 = vadd.f32 %v2888_v55, %v1838_v38  ;;  %v8844_v18 = vld [vmem:[#allocation91_spill] sm:$0xff]  ;;  %v8845_v38 = vld [vmem:[#allocation100_spill] sm:$0xff]  ;;  %v8846_v40 = vld [vmem:[#allocation105_spill] sm:$0xff] }
 0x32a   : > { %v2551_v36 = vadd.f32 %v4547_v32, %v2311_v47  ;;  %v4551_v41 = vsel %vm2459_vm5, 1.0, %v8649_v11  ;;  %v2543_v58 = vadd.f32 %v4539_v2, %v2303_v8  ;;  %v2789_v22 = vadd.f32 %v4577_v53, %v2549_v15  ;;  %v8847_v59 = vld [vmem:[#allocation152_spill] sm:$0xff]  ;;  %v8849_v53 = vld [vmem:[#allocation79_spill] sm:$0xff]  ;;  %v8851_v8 = vld [vmem:[#allocation106_spill] sm:$0xff] }
 0x32b   : > { %8835 = vst [vmem:[#allocation24_spill] sm:$0xff] %v7443_v29  ;;  %vm1701_vm7 = vcmp.ne.s32.totalorder %v8837_v13, %v6889_v49  ;;  %vm1693_vm8 = vcmp.ne.s32.totalorder %v8838_v50, %v6898_v28  ;;  %vm2685_vm9 = vcmp.eq.s32.totalorder %v8839_v39, %v6987_v51  ;;  %vm2695_vm10 = vcmp.eq.s32.totalorder %v8840_v3, %v6973_v4  ;;  %v8850_v23 = vld [vmem:[#allocation104_spill] sm:$0xff]  ;;  %v8852_v24 = vld [vmem:[#allocation82_spill] sm:$0xff]  ;;  %v8853_v39 = vld [vmem:[#allocation103_spill] sm:$0xff] }
 0x32c   : > { %2991 = vmax.xlane.f32.xlu0 %v7428_v52  ;;  %vm2219_vm11 = vcmp.eq.s32.totalorder %v8841_v62, %v6869_v7  ;;  %v2892_v57 = vmul.f32 0.6931472, %v5338_v37  ;;  %vm1977_vm12 = vcmp.eq.s32.totalorder %v8843_v21, %v8842_v17  ;;  %v4517_v42 = vsel %vm2217_vm6, 1.0, %v8649_v11 }
 0x32d   : > { %vm1979_vm14 = vcmp.eq.s32.totalorder %v8844_v18, %v8842_v17  ;;  %vm2457_vm15 = vcmp.eq.s32.totalorder %v8845_v38, %v6937_v12  ;;  %vm2209_vm1 = vcmp.eq.s32.totalorder %v8846_v40, %v6878_v1  ;;  %v1292_v26 = vmul.f32 0.17677669, %v8847_v59  ;;  %v8855_v17 = vld [vmem:[#allocation107_spill] sm:$0xff]  ;;  %v8856_v1 = vld [vmem:[#allocation78_spill] sm:$0xff] }
 0x32e   : > { %v2928_v47 = vadd.f32 %v2892_v57, %v1840_v54  ;;  %v7474_v9 = vsub.f32 %v1290_v56, %v2926_v43  ;;  %v4569_v2 = vsel %vm2685_vm9, 1.0, %v8649_v11  ;;  %v4579_v7 = vsel %vm2695_vm10, 1.0, %v8649_v11 }
 0x32f   : > { %vm2687_vm3 = vcmp.eq.s32.totalorder %v8849_v53, %v6987_v51  ;;  %v4519_v55 = vsel %vm2219_vm11, 1.0, %v8649_v11  ;;  %v4485_v12 = vsel %vm1977_vm12, 1.0, %v8649_v11  ;;  %v4549_v37 = vsel %vm2457_vm15, 1.0, %v8649_v11 }
 0x330   : > { %2995 = vmax.xlane.f32.xlu0 %v7443_v29  ;;  %8848 = vst [vmem:[#allocation21_spill] sm:$0xff] %v7474_v9  ;;  %v7476_v32 = vpop.xlane.xlu0 %2969  ;;  %vm1969_vm13 = vcmp.eq.s32.totalorder %v8850_v23, %v5908_v25  ;;  %vm2449_vm4 = vcmp.eq.s32.totalorder %v8851_v8, %v6933_v10  ;;  %v5340_v15 = vpop.eup %5339  ;;  %vm2697_vm2 = vcmp.eq.s32.totalorder %v8852_v24, %v6973_v4  ;;  %v4487_v46 = vsel %vm1979_vm14, 1.0, %v8649_v11 }
 0x331   : > { %v2313_v54 = vadd.f32 %v4517_v42, %v4485_v12  ;;  %v4509_v25 = vsel %vm2209_vm1, 1.0, %v8649_v11  ;;  %v4571_v56 = vsel %vm2687_vm3, 1.0, %v8649_v11  ;;  %v2315_v43 = vadd.f32 %v4519_v55, %v4487_v46 }
 0x332   : > { %vm2699_vm5 = vcmp.eq.s32.totalorder %v8853_v39, %v6973_v4  ;;  %v7503_v3 = vsub.f32 %v1292_v26, %v2928_v47  ;;  %v4477_v57 = vsel %vm1969_vm13, 1.0, %v8649_v11  ;;  %v4541_v21 = vsel %vm2449_vm4, 1.0, %v8649_v11  ;;  %v8857_v47 = vld [vmem:[#allocation110_spill] sm:$0xff] }
 0x333   : > { %v2553_v62 = vadd.f32 %v4549_v37, %v2313_v54  ;;  %vm2451_vm6 = vcmp.eq.s32.totalorder %v8855_v17, %v6933_v10  ;;  %v2781_v42 = vadd.f32 %v4569_v2, %v2541_v27  ;;  %vm1691_vm9 = vcmp.ne.s32.totalorder %v8856_v1, %v6544_v16  ;;  %v8858_v10 = vld [vmem:[#allocation87_spill] sm:$0xff]  ;;  %v8859_v54 = vld [vmem:[#allocation97_spill] sm:$0xff]  ;;  %v8862_v1 = vld [vmem:[#allocation22_spill] sm:$0xff] }
 0x334   : > { %3015 = vmax.xlane.f32.xlu0 %v7474_v9  ;;  %8854 = vst [vmem:[#allocation28_spill] sm:$0xff] %v7503_v3  ;;  %v4581_v18 = vsel %vm2697_vm2, 1.0, %v8649_v11  ;;  %v2305_v38 = vadd.f32 %v4509_v25, %v4477_v57  ;;  %v7512_v40 = vpop.xlane.xlu0 %2971  ;;  %v2791_v4 = vadd.f32 %v4579_v7, %v2551_v36  ;;  %v2783_v59 = vadd.f32 %v4571_v56, %v2543_v58 }
 0x335   : > { %v4583_v26 = vsel %vm2699_vm5, 1.0, %v8649_v11  ;;  %vm2691_vm10 = vcmp.eq.s32.totalorder %v8857_v47, %v6987_v51  ;;  %vm2689_vm11 = vcmp.eq.s32.totalorder %v8858_v10, %v6987_v51  ;;  %v2555_v27 = vadd.f32 %v4551_v41, %v2315_v43  ;;  %v8864_v10 = vld [vmem:[#allocation23_spill] sm:$0xff] }
 0x336   : > { %v2545_v2 = vadd.f32 %v4541_v21, %v2305_v38  ;;  %v4543_v53 = vsel %vm2451_vm6, 1.0, %v8649_v11  ;;  %v4449_v55 = vsel %vm1701_vm7, 1.0, %v8649_v11  ;;  %v4441_v36 = vsel %vm1693_vm8, 1.0, %v8649_v11 }
 0x337   : > { %v2821_v58 = vadd.f32 1e-09, %v2789_v22  ;;  %v2793_v7 = vadd.f32 %v4581_v18, %v2553_v62  ;;  %v2813_v12 = vadd.f32 1e-09, %v2781_v42  ;;  %v4439_v51 = vsel %vm1691_vm9, 1.0, %v8649_v11  ;;  %v8860_v22 = vld [vmem:[#allocation43_spill] sm:$0xff]  ;;  %v7541_v42 = vpop.permute.xlu1 %1418 }
 0x338   : > { %3019 = vmax.xlane.f32.xlu0 %v7503_v3  ;;  %v2795_v41 = vadd.f32 %v4583_v26, %v2555_v27  ;;  %v4575_v37 = vsel %vm2691_vm10, 1.0, %v8649_v11  ;;  %v2823_v8 = vadd.f32 1e-09, %v2791_v4  ;;  %v4573_v13 = vsel %vm2689_vm11, 1.0, %v8649_v11  ;;  %v8863_v4 = vld [vmem:[#allocation112_spill] sm:$0xff] }
 0x339   : > { %v2547_v24 = vadd.f32 %v4543_v53, %v7120_v20  ;;  %vm1705_vm8 = vcmp.ne.s32.totalorder %v8860_v22, %v6889_v49  ;;  %v2815_v50 = vadd.f32 1e-09, %v2783_v59  ;;  %v2785_v46 = vadd.f32 %v4573_v13, %v2545_v2  ;;  %v8861_v20 = vld [vmem:[#allocation124_spill] sm:$0xff]  ;;  %v8865_v2 = vld [vmem:[#allocation11_spill] sm:$0xff]  ;;  %v8870_v13 = vld [vmem:[#allocation45_spill] sm:$0xff] }
 0x33a   : > { %5341 = vlog2.f32 %v2821_v58  ;;  %v2825_v16 = vadd.f32 1e-09, %v2793_v7  ;;  %v1787_v39 = vmul.f32 10000000.0, %v4439_v51  ;;  %v2827_v62 = vadd.f32 1e-09, %v2795_v41 }
 0x33b   : > { %v2787_v56 = vadd.f32 %v4575_v37, %v2547_v24  ;;  %5343 = vlog2.f32 %v2813_v12  ;;  %v2846_v57 = vmul.f32 0.6931472, %v5340_v15  ;;  %v1269_v17 = vmul.f32 0.17677669, %v8861_v20  ;;  %v8866_v53 = vld [vmem:[#allocation111_spill] sm:$0xff]  ;;  %v8867_v58 = vld [vmem:[#allocation120_spill] sm:$0xff] }
 0x33c   : > { %v1347_v23 = vpop.permute.xlu0 %1346  ;;  %5345 = vlog2.f32 %v2823_v8  ;;  %v2817_v38 = vadd.f32 1e-09, %v2785_v46  ;;  %vm2221_vm14 = vcmp.eq.s32.totalorder %v8863_v4, %v6885_v5  ;;  %v2850_v27 = vmul.f32 0.6931472, %v8864_v10  ;;  %v8868_v51 = vld [vmem:[#allocation123_spill] sm:$0xff]  ;;  %v8871_v24 = vld [vmem:[#allocation117_spill] sm:$0xff]  ;;  %v7569_v46 = vpop.permute.xlu1 %1658 }
 0x33d   : > { %vm1449_vm7 = vcmp.eq.s32.totalorder %v1347_v23, %v8859_v54  ;;  %5347 = vlog2.f32 %v2815_v50  ;;  %v2819_v26 = vadd.f32 1e-09, %v2787_v56  ;;  %vm1981_vm15 = vcmp.eq.s32.totalorder %v8866_v53, %v8865_v2  ;;  %v8872_v56 = vld [vmem:[#allocation115_spill] sm:$0xff]  ;;  %v8876_v4 = vld [vmem:[#allocation132_spill] sm:$0xff] }
 0x33e   : > { %v4405_v25 = vsel %vm1449_vm7, 1.0, %v8649_v11  ;;  %5349 = vlog2.f32 %v2825_v16  ;;  %vm2461_vm1 = vcmp.eq.s32.totalorder %v8867_v58, %v6969_v48  ;;  %v4521_v12 = vsel %vm2221_vm14, 1.0, %v8649_v11  ;;  %v8879_v58 = vld [vmem:[#allocation69_spill] sm:$0xff] }
 0x33f   : > { %v1545_v43 = vmul.f32 100000.0, %v4405_v25  ;;  %5351 = vlog2.f32 %v2827_v62  ;;  %v1271_v41 = vmul.f32 0.17677669, %v8868_v51  ;;  %v4453_v8 = vsel %vm1705_vm8, 1.0, %v8649_v11 }
 0x340   : > { %v1353_v21 = vpop.permute.xlu0 %1352  ;;  %vm1707_vm3 = vcmp.ne.s32.totalorder %v8870_v13, %v6889_v49  ;;  %5353 = vlog2.f32 %v2817_v38  ;;  %vm2223_vm13 = vcmp.eq.s32.totalorder %v8871_v24, %v6885_v5  ;;  %v4553_v50 = vsel %vm2461_vm1, 1.0, %v8649_v11  ;;  %v7601_v10 = vpop.permute.xlu1 %1661  ;;  %v8881_v13 = vld [vmem:[#allocation95_spill] sm:$0xff] }
 0x341   : > { %v1817_v18 = vadd.f32 %v8862_v1, %v1545_v43  ;;  %vm1451_vm12 = vcmp.eq.s32.totalorder %v1353_v21, %v8859_v54  ;;  %5355 = vlog2.f32 %v2819_v26  ;;  %v4489_v54 = vsel %vm1981_vm15, 1.0, %v8649_v11  ;;  %v8873_v43 = vld [vmem:[#allocation121_spill] sm:$0xff] }
 0x342   : > { %v4407_v59 = vsel %vm1451_vm12, 1.0, %v8649_v11  ;;  %v7572_v16 = vmul.f32 10000000.0, %v4449_v55  ;;  %v2317_v22 = vadd.f32 %v4521_v12, %v4489_v54  ;;  %vm1983_vm4 = vcmp.eq.s32.totalorder %v8872_v56, %v8865_v2  ;;  %v8880_v12 = vld [vmem:[#allocation101_spill] sm:$0xff]  ;;  %v8882_v54 = vld [vmem:[#allocation163_spill] sm:$0xff] }
 0x343   : > { %v2905_v15 = vadd.f32 %v2846_v57, %v1817_v18  ;;  %v1547_v47 = vmul.f32 100000.0, %v4407_v59  ;;  %vm2463_vm2 = vcmp.eq.s32.totalorder %v8873_v43, %v6969_v48  ;;  %v7580_v57 = vmul.f32 10000000.0, %v4441_v36  ;;  %v8875_v18 = vld [vmem:[#allocation90_spill] sm:$0xff] }
 0x344   : > { %v7553_v7 = vpop.permute.xlu0 %1358  ;;  %v5342_v62 = vpop.eup %5341  ;;  %v4455_v21 = vsel %vm1707_vm3, 1.0, %v8649_v11  ;;  %v4523_v55 = vsel %vm2223_vm13, 1.0, %v8649_v11  ;;  %v7589_v1 = vmul.f32 10000000.0, %v4453_v8  ;;  %vm2701_vm5 = vcmp.eq.s32.totalorder %v8875_v18, %v7136_v44  ;;  %v8877_v59 = vld [vmem:[#allocation98_spill] sm:$0xff] }
 0x345   : > { %v1819_v37 = vadd.f32 %v1787_v39, %v1547_v47  ;;  %v7557_v23 = vsub.f32 %v1269_v17, %v2905_v15  ;;  %v5344_v17 = vpop.eup %5343  ;;  %v2557_v38 = vadd.f32 %v4553_v50, %v2317_v22  ;;  %vm2703_vm6 = vcmp.eq.s32.totalorder %v8876_v4, %v7136_v44  ;;  %v8878_v47 = vld [vmem:[#allocation146_spill] sm:$0xff] }
 0x346   : > { %v5346_v36 = vpop.eup %5345  ;;  %vm1703_vm9 = vcmp.ne.s32.totalorder %v8877_v59, %v6889_v49  ;;  %v4491_v26 = vsel %vm1983_vm4, 1.0, %v8649_v11  ;;  %v4555_v15 = vsel %vm2463_vm2, 1.0, %v8649_v11  ;;  %vm1986_vm10 = vcmp.eq.s32.totalorder %v8878_v47, %v8865_v2 }
 0x347   : > { %8869 = vst [vmem:[#allocation44_spill] sm:$0xff] %v7557_v23  ;;  %v2907_v25 = vadd.f32 %v2850_v27, %v1819_v37  ;;  %2973 = vmax.xlane.f32.xlu1 %v7557_v23  ;;  %v5348_v27 = vpop.eup %5347  ;;  %v7604_v53 = vmul.f32 10000000.0, %v4455_v21  ;;  %vm2467_vm11 = vcmp.eq.s32.totalorder %v8879_v58, %v6969_v48  ;;  %vm1695_vm7 = vcmp.ne.s32.totalorder %v8880_v12, %v6898_v28 }
 0x348   : > { %v7578_v39 = vpop.permute.xlu0 %1364  ;;  %v2319_v51 = vadd.f32 %v4523_v55, %v4491_v26  ;;  %v5350_v37 = vpop.eup %5349  ;;  %v4585_v8 = vsel %vm2701_vm5, 1.0, %v8649_v11  ;;  %vm2706_vm8 = vcmp.eq.s32.totalorder %v8881_v13, %v7136_v44  ;;  %v4587_v24 = vsel %vm2703_vm6, 1.0, %v8649_v11 }
 0x349   : > { %v7587_v20 = vsub.f32 %v1271_v41, %v2907_v25  ;;  %vm2466_vm12 = vcmp.eq.s32.totalorder %v8882_v54, %v6969_v48  ;;  %v5352_v50 = vpop.eup %5351  ;;  %v4451_v25 = vsel %vm1703_vm9, 1.0, %v8649_v11  ;;  %v2797_v22 = vadd.f32 %v4585_v8, %v2557_v38  ;;  %v7650_v54 = vpop.permute.xlu1 %1424 }
 0x34a   : > { %v2559_v56 = vadd.f32 %v4555_v15, %v2319_v51  ;;  %v4494_v43 = vsel %vm1986_vm10, 1.0, %v8649_v11  ;;  %v2870_v21 = vmul.f32 0.6931472, %v5342_v62  ;;  %v7633_v55 = vsel %vm2467_vm11, 1.0, %v8649_v11  ;;  %v5354_v4 = vpop.eup %5353  ;;  %v8883_v51 = vld [vmem:[#allocation20_spill] sm:$0xff] }
 0x34b   : > { %8874 = vst [vmem:[#allocation51_spill] sm:$0xff] %v7587_v20  ;;  %2977 = vmax.xlane.f32.xlu1 %v7587_v20  ;;  %v4443_v18 = vsel %vm1695_vm7, 1.0, %v8649_v11  ;;  %vm1453_vm14 = vcmp.eq.s32.totalorder %v7553_v7, %v7223_v14  ;;  %v2854_v26 = vmul.f32 0.6931472, %v5344_v17  ;;  %v7638_v49 = vmul.f32 0.6931472, %v5346_v36  ;;  %v5356_v47 = vpop.eup %5355 }
 0x34c   : > { %v7610_v41 = vpop.permute.xlu0 %1370  ;;  %v2799_v38 = vadd.f32 %v4587_v24, %v2559_v56  ;;  %v4558_v59 = vsel %vm2466_vm12, 1.0, %v8649_v11  ;;  %v7643_v58 = vmul.f32 0.6931472, %v5348_v27  ;;  %v4590_v62 = vsel %vm2706_vm8, 1.0, %v8649_v11  ;;  %v8884_v24 = vld [vmem:[#allocation158_spill] sm:$0xff] }
 0x34d   : > { %v1799_v12 = vmul.f32 10000000.0, %v4451_v25  ;;  %v2322_v8 = vadd.f32 %v8883_v51, %v4494_v43  ;;  %v7652_v17 = vmul.f32 10000000.0, %v4443_v18  ;;  %v2829_v36 = vadd.f32 1e-09, %v2797_v22 }
 0x34e   : > { %vm1988_vm15 = vcmp.eq.s32.totalorder %v8884_v24, %v8865_v2  ;;  %v4409_v27 = vsel %vm1453_vm14, 1.0, %v8649_v11  ;;  %v7660_v56 = vmul.f32 0.6931472, %v5352_v50  ;;  %v7662_v20 = vmul.f32 0.6931472, %v5354_v4  ;;  %v8885_v22 = vld [vmem:[#allocation135_spill] sm:$0xff]  ;;  %v7684_v24 = vpop.permute.xlu1 %1427 }
 0x34f   : > { %v2562_v13 = vadd.f32 %v4558_v59, %v2322_v8  ;;  %v7664_v25 = vmul.f32 0.6931472, %v5350_v37  ;;  %v7666_v43 = vmul.f32 0.6931472, %v5356_v47  ;;  %v2831_v18 = vadd.f32 1e-09, %v2799_v38 }
 0x350   : > { %v7641_v15 = vpop.permute.xlu0 %1376  ;;  %vm1697_vm1 = vcmp.ne.s32.totalorder %v8885_v22, %v6898_v28  ;;  %v8886_v2 = vld [vmem:[#allocation164_spill] sm:$0xff]  ;;  %v4496_v7 = vsel %vm1988_vm15, 1.0, %v8649_v11  ;;  %v8887_v50 = vld [vmem:[#allocation167_spill] sm:$0xff]  ;;  %v1549_v59 = vmul.f32 100000.0, %v4409_v27  ;;  %5357 = vlog2.f32 %v2829_v36  ;;  %v8888_v37 = vld [vmem:[#allocation138_spill] sm:$0xff] }
 0x351   : > { %vm2468_vm3 = vcmp.eq.s32.totalorder %v8886_v2, %v6969_v48  ;;  %vm2708_vm13 = vcmp.eq.s32.totalorder %v8887_v50, %v7136_v44  ;;  %vm1699_vm2 = vcmp.ne.s32.totalorder %v8888_v37, %v6898_v28  ;;  %vm1455_vm5 = vcmp.eq.s32.totalorder %v7578_v39, %v7223_v14  ;;  %v8889_v38 = vld [vmem:[#allocation149_spill] sm:$0xff]  ;;  %v8890_v2 = vld [vmem:[#allocation83_spill] sm:$0xff] }
 0x352   : > { %vm2225_vm6 = vcmp.eq.s32.totalorder %v8889_v38, %v6885_v5  ;;  %v2802_v47 = vadd.f32 %v4590_v62, %v2562_v13  ;;  %v4560_v8 = vsel %vm2468_vm3, 1.0, %v8649_v11  ;;  %5359 = vlog2.f32 %v2831_v18  ;;  %v7707_v28 = vpop.permute.xlu1 %1664 }
 0x353   : > { %v4445_v36 = vsel %vm1697_vm1, 1.0, %v8649_v11  ;;  %v4592_v39 = vsel %vm2708_vm13, 1.0, %v8649_v11  ;;  %v1821_v23 = vadd.f32 %v7580_v57, %v1549_v59  ;;  %v4411_v62 = vsel %vm1455_vm5, 1.0, %v8649_v11 }
 0x354   : > { %v1383_v51 = vpop.permute.xlu0 %1382  ;;  %v4447_v18 = vsel %vm1699_vm2, 1.0, %v8649_v11  ;;  %v4525_v22 = vsel %vm2225_vm6, 1.0, %v8649_v11  ;;  %v2834_v38 = vadd.f32 1e-09, %v2802_v47  ;;  %v7703_v9 = vmul.f32 10000000.0, %v4445_v36 }
 0x355   : > { %vm1461_vm4 = vcmp.eq.s32.totalorder %v1383_v51, %v7200_v35  ;;  %v2324_v51 = vadd.f32 %v8890_v2, %v4496_v7  ;;  %v8891_v2 = vld [vmem:[#allocation140_spill] sm:$0xff]  ;;  %v2909_v37 = vadd.f32 %v2854_v26, %v1821_v23  ;;  %v7712_v47 = vmul.f32 10000000.0, %v4447_v18  ;;  %v8894_v36 = vld [vmem:[#allocation129_spill] sm:$0xff] }
 0x356   : > { %v4417_v4 = vsel %vm1461_vm4, 1.0, %v8649_v11  ;;  %v1281_v3 = vmul.f32 0.17677669, %v8891_v2  ;;  %5361 = vlog2.f32 %v2834_v38  ;;  %vm1457_vm14 = vcmp.eq.s32.totalorder %v7610_v41, %v7223_v14  ;;  %v8903_v41 = vld [vmem:[#allocation160_spill] sm:$0xff] }
 0x357   : > { %v1557_v27 = vmul.f32 100000.0, %v4417_v4  ;;  %v2564_v4 = vadd.f32 %v4560_v8, %v2324_v51  ;;  %vm1714_vm1 = vcmp.ne.s32.totalorder %v7601_v10, %v8815_v63  ;;  %vm1476_vm3 = vcmp.eq.s32.totalorder %v7684_v24, %v7354_v19 }
 0x358   : > { %v1389_v50 = vpop.permute.xlu0 %1388  ;;  %vm1711_vm4 = vcmp.ne.s32.totalorder %v8903_v41, %v8815_v63  ;;  %vm1459_vm2 = vcmp.eq.s32.totalorder %v7641_v15, %v7223_v14 }
 0x359   : > { %v1829_v13 = vadd.f32 %v7572_v16, %v1557_v27  ;;  %vm1463_vm9 = vcmp.eq.s32.totalorder %v1389_v50, %v7200_v35  ;;  %v8892_v16 = vld [vmem:[#allocation162_spill] sm:$0xff]  ;;  %v2804_v27 = vadd.f32 %v4592_v39, %v2564_v4  ;;  %v1551_v50 = vmul.f32 100000.0, %v4411_v62  ;;  %v8896_v39 = vld [vmem:[#allocation159_spill] sm:$0xff] }
 0x35a   : > { %v4419_v7 = vsel %vm1463_vm9, 1.0, %v8649_v11  ;;  %vm2465_vm10 = vcmp.eq.s32.totalorder %v8892_v16, %v6969_v48  ;;  %v8895_v48 = vld [vmem:[#allocation154_spill] sm:$0xff]  ;;  %vm2227_vm8 = vcmp.eq.s32.totalorder %v8896_v39, %v6885_v5  ;;  %v4413_v5 = vsel %vm1457_vm14, 1.0, %v8649_v11 }
 0x35b   : > { %v2917_v57 = vadd.f32 %v2870_v21, %v1829_v13  ;;  %v1559_v59 = vmul.f32 100000.0, %v4419_v7  ;;  %v8893_v21 = vld [vmem:[#allocation80_spill] sm:$0xff]  ;;  %v1273_v13 = vmul.f32 0.17677669, %v8894_v36  ;;  %vm1709_vm7 = vcmp.ne.s32.totalorder %v8895_v48, %v8815_v63 }
 0x35c   : > { %v1395_v29 = vpop.permute.xlu0 %1394  ;;  %v2321_v51 = vadd.f32 %v4525_v22, %v8893_v21  ;;  %v4557_v23 = vsel %vm2465_vm10, 1.0, %v8649_v11  ;;  %v2836_v26 = vadd.f32 1e-09, %v2804_v27  ;;  %v4457_v2 = vsel %vm1709_vm7, 1.0, %v8649_v11  ;;  %v1668_v21 = vpop.permute.xlu1 %1667 }
 0x35d   : > { %v1831_v52 = vadd.f32 %v1799_v12, %v1559_v59  ;;  %vm1465_vm11 = vcmp.eq.s32.totalorder %v1395_v29, %v7200_v35  ;;  %v7710_v8 = vsub.f32 %v1281_v3, %v2917_v57  ;;  %v7723_v29 = vpop.eup %5357  ;;  %v8897_v3 = vld [vmem:[#allocation165_spill] sm:$0xff]  ;;  %v1823_v12 = vadd.f32 %v7652_v17, %v1551_v50  ;;  %v8898_v57 = vld [vmem:[#allocation128_spill] sm:$0xff]  ;;  %v8900_v50 = vld [vmem:[#allocation139_spill] sm:$0xff] }
 0x35e   : > { %v4421_v7 = vsel %vm1465_vm11, 1.0, %v8649_v11  ;;  %vm2705_vm12 = vcmp.eq.s32.totalorder %v8897_v3, %v7136_v44  ;;  %v7732_v4 = vsub.f32 %v1273_v13, %v2909_v37  ;;  %v7734_v38 = vpop.eup %5359  ;;  %v1275_v17 = vmul.f32 0.17677669, %v8898_v57  ;;  %v8899_v59 = vld [vmem:[#allocation133_spill] sm:$0xff] }
 0x35f   : > { %2997 = vmax.xlane.f32.xlu1 %v7710_v8  ;;  %v2919_v18 = vadd.f32 %v7638_v49, %v1831_v52  ;;  %v1561_v22 = vmul.f32 100000.0, %v4421_v7  ;;  %v7742_v16 = vmul.f32 0.17677669, %v8899_v59  ;;  %v2561_v52 = vadd.f32 %v4557_v23, %v2321_v51  ;;  %v8901_v23 = vld [vmem:[#allocation26_spill] sm:$0xff]  ;;  %v8904_v59 = vld [vmem:[#allocation145_spill] sm:$0xff] }
 0x360   : > { %v1401_v62 = vpop.permute.xlu0 %1400  ;;  %v4589_v49 = vsel %vm2705_vm12, 1.0, %v8649_v11  ;;  %v1283_v37 = vmul.f32 0.17677669, %v8900_v50  ;;  %5363 = vlog2.f32 %v2836_v26  ;;  %v2911_v36 = vadd.f32 %v7643_v58, %v1823_v12  ;;  %v8902_v26 = vld [vmem:[#allocation134_spill] sm:$0xff] }
 0x361   : > { %vm1467_vm15 = vcmp.eq.s32.totalorder %v1401_v62, %v7200_v35  ;;  %v4527_v35 = vsel %vm2227_vm8, 1.0, %v8649_v11  ;;  %v1833_v13 = vadd.f32 %v7589_v1, %v1561_v22  ;;  %v7767_v39 = vmul.f32 10000000.0, %v4457_v2  ;;  %v8905_v1 = vld [vmem:[#allocation166_spill] sm:$0xff] }
 0x362   : > { %v4423_v27 = vsel %vm1467_vm15, 1.0, %v8649_v11  ;;  %v7765_v48 = vsub.f32 %v1283_v37, %v2919_v18  ;;  %v2323_v3 = vadd.f32 %v4527_v35, %v8901_v23  ;;  %v7771_v62 = vmul.f32 0.17677669, %v8902_v26  ;;  %v8908_v23 = vld [vmem:[#allocation116_spill] sm:$0xff] }
 0x363   : > { %2981 = vmax.xlane.f32.xlu1 %v7732_v4  ;;  %v1563_v7 = vmul.f32 100000.0, %v4423_v27  ;;  %vm1716_vm13 = vcmp.ne.s32.totalorder %v1668_v21, %v8815_v63  ;;  %v2801_v57 = vadd.f32 %v4589_v49, %v2561_v52  ;;  %v1285_v58 = vmul.f32 0.17677669, %v8904_v59  ;;  %v5362_v27 = vpop.eup %5361  ;;  %v8906_v49 = vld [vmem:[#allocation144_spill] sm:$0xff] }
 0x364   : > { %v1407_v51 = vpop.permute.xlu0 %1406  ;;  %vm2707_vm5 = vcmp.eq.s32.totalorder %v8905_v1, %v7136_v44  ;;  %v4462_v12 = vsel %vm1714_vm1, 1.0, %v8649_v11  ;;  %v4432_v18 = vsel %vm1476_vm3, 1.0, %v8649_v11  ;;  %v1553_v22 = vmul.f32 100000.0, %v4413_v5  ;;  %v8907_v5 = vld [vmem:[#allocation168_spill] sm:$0xff]  ;;  %vm8329_vm1 = vmpackc.low %vm680_vm0, %vm680_vm0 }
 0x365   : > { %v4464_v14 = vsel %vm1716_vm13, 1.0, %v8649_v11  ;;  %v2921_v15 = vadd.f32 %v7664_v25, %v1833_v13  ;;  %v1835_v35 = vadd.f32 %v7604_v53, %v1563_v7  ;;  %v7793_v44 = vsub.f32 %v1275_v17, %v2911_v36 }
 0x366   : > { %v4459_v52 = vsel %vm1711_vm4, 1.0, %v8649_v11  ;;  %v2563_v10 = vadd.f32 %v7633_v55, %v2323_v3  ;;  %v1287_v50 = vmul.f32 0.17677669, %v8906_v49  ;;  %v4415_v24 = vsel %vm1459_vm2, 1.0, %v8649_v11 }
 0x367   : > { %3001 = vmax.xlane.f32.xlu1 %v7765_v48  ;;  %v2833_v37 = vadd.f32 1e-09, %v2801_v57  ;;  %v4591_v21 = vsel %vm2707_vm5, 1.0, %v8649_v11  ;;  %v3030_v26 = vsub.f32 %v8908_v23, %v8907_v5  ;;  %vm1469_vm6 = vcmp.eq.s32.totalorder %v1407_v51, %v7354_v19  ;;  %v8911_v23 = vld [vmem:[#allocation161_spill] sm:$0xff] }
 0x368   : > { %v1413_v2 = vpop.permute.xlu0 %1412  ;;  %v1810_v53 = vmul.f32 10000000.0, %v4462_v12  ;;  %v1572_v25 = vmul.f32 100000.0, %v4432_v18  ;;  %v1812_v17 = vmul.f32 10000000.0, %v4464_v14  ;;  %v1825_v36 = vadd.f32 %v7703_v9, %v1553_v22  ;;  %v8910_v14 = vld [vmem:[#allocation17_spill] sm:$0xff] }
 0x369   : > { %v1555_v13 = vmul.f32 100000.0, %v4415_v24  ;;  %v2923_v7 = vadd.f32 %v7660_v56, %v1835_v35  ;;  %v7807_v3 = vsub.f32 %v1285_v58, %v2921_v15  ;;  %v2803_v57 = vadd.f32 %v4591_v21, %v2563_v10  ;;  %v8909_v58 = vld [vmem:[#allocation170_spill] sm:$0xff] }
 0x36a   : > { %v5364_v41 = vpop.eup %5363  ;;  %v4425_v59 = vsel %vm1469_vm6, 1.0, %v8649_v11  ;;  %v2896_v1 = vmul.f32 0.6931472, %v5362_v27  ;;  %v3063_v12 = vmul.f32 1.442695, %v3030_v26  ;;  %vm1713_vm10 = vcmp.ne.s32.totalorder %v7569_v46, %v8815_v63  ;;  %v8912_v46 = vld [vmem:[#allocation151_spill] sm:$0xff] }
 0x36b   : > { %2985 = vmax.xlane.f32.xlu1 %v7793_v44  ;;  %vm1471_vm11 = vcmp.eq.s32.totalorder %v1413_v2, %v7354_v19  ;;  %v1844_v56 = vadd.f32 %v1812_v17, %v1572_v25  ;;  %v3032_v18 = vsub.f32 %v8909_v58, %v7512_v40  ;;  %v2913_v22 = vadd.f32 %v7662_v20, %v1825_v36 }
 0x36c   : > { %v1422_v55 = vpop.permute.xlu0 %1421  ;;  %v1294_v15 = vmul.f32 0.17677669, %v8910_v14  ;;  %v1827_v35 = vadd.f32 %v7712_v47, %v1555_v13  ;;  %v1565_v27 = vmul.f32 100000.0, %v4425_v59  ;;  %v7820_v49 = vsub.f32 %v1287_v50, %v2923_v7  ;;  %v8913_v59 = vld [vmem:[#allocation99_spill] sm:$0xff] }
 0x36d   : > { %vm1474_vm9 = vcmp.eq.s32.totalorder %v1422_v55, %v7354_v19  ;;  %5365 = vlog2.f32 %v2833_v37  ;;  %v2835_v24 = vadd.f32 1e-09, %v2803_v57  ;;  %v2900_v2 = vmul.f32 0.6931472, %v5364_v41 }
 0x36e   : > { %v4430_v51 = vsel %vm1474_vm9, 1.0, %v8649_v11  ;;  %v4427_v21 = vsel %vm1471_vm11, 1.0, %v8649_v11  ;;  %5367 = vpow2.f32 %v3063_v12  ;;  %vm1473_vm7 = vcmp.eq.s32.totalorder %v7541_v42, %v7354_v19 }
 0x36f   : > { %v1570_v9 = vmul.f32 100000.0, %v4430_v51  ;;  %3005 = vmax.xlane.f32.xlu1 %v7807_v3  ;;  %v1296_v26 = vmul.f32 0.17677669, %v8911_v23  ;;  %v4461_v47 = vsel %vm1713_vm10, 1.0, %v8649_v11  ;;  %v2932_v50 = vadd.f32 %v2900_v2, %v1844_v56 }
 0x370   : > { %v3067_v37 = vmul.f32 1.442695, %v3032_v18  ;;  %v2915_v25 = vadd.f32 %v7666_v43, %v1827_v35  ;;  %v1837_v17 = vadd.f32 %v7767_v39, %v1565_v27  ;;  %v1567_v42 = vmul.f32 100000.0, %v4427_v21  ;;  %v8915_v35 = vld [vmem:[#allocation169_spill] sm:$0xff] }
 0x371   : > { %v1842_v10 = vadd.f32 %v1810_v53, %v1570_v9  ;;  %v7832_v53 = vsub.f32 %v7771_v62, %v2913_v22  ;;  %5369 = vlog2.f32 %v2835_v24  ;;  %v2886_v55 = vmul.f32 0.6931472, %v7723_v29 }
 0x372   : > { %v1807_v13 = vmul.f32 10000000.0, %v4459_v52  ;;  %v4429_v7 = vsel %vm1473_vm7, 1.0, %v8649_v11  ;;  %vm1475_vm8 = vcmp.eq.s32.totalorder %v7650_v54, %v7354_v19  ;;  %vm1715_vm12 = vcmp.ne.s32.totalorder %v7707_v28, %v8815_v63 }
 0x373   : > { %v2930_v20 = vadd.f32 %v2896_v1, %v1842_v10  ;;  %3009 = vmax.xlane.f32.xlu1 %v7820_v49  ;;  %v1289_v43 = vmul.f32 0.17677669, %v8912_v46  ;;  %v1809_v39 = vmul.f32 10000000.0, %v4461_v47  ;;  %5371 = vpow2.f32 %v3067_v37  ;;  %v8914_v1 = vld [vmem:[#allocation150_spill] sm:$0xff]  ;;  %v8916_v10 = vld [vmem:[#allocation157_spill] sm:$0xff] }
 0x374   : > { %v7847_v62 = vsub.f32 %v1296_v26, %v2932_v50  ;;  %v2925_v29 = vadd.f32 %v2886_v55, %v1837_v17  ;;  %v1839_v52 = vadd.f32 %v1807_v13, %v1567_v42  ;;  %v7850_v41 = vsub.f32 %v7742_v16, %v2915_v25  ;;  %v8917_v50 = vld [vmem:[#allocation156_spill] sm:$0xff]  ;;  %v5273_v13 = vld [vmem:[%s5966_s27] sm:$0xff]   ;;  %v5274_v46 = vld [vmem:[%s5966_s27 + $0x8] sm:$0xff]  }
 0x375   : > { %v7836_v36 = vsub.f32 %v1294_v15, %v2930_v20  ;;  %v1569_v57 = vmul.f32 100000.0, %v4429_v7  ;;  %v4431_v19 = vsel %vm1475_vm8, 1.0, %v8649_v11  ;;  %v4463_v63 = vsel %vm1715_vm12, 1.0, %v8649_v11  ;;  %4903 = vmatprep.subr.bf16.mxu1 %v5273_v13 }
 0x376   : > { %v2890_v54 = vmul.f32 0.6931472, %v7734_v38  ;;  %v3029_v51 = vsub.f32 %v8913_v59, %v7441_v6  ;;  %v1291_v12 = vmul.f32 0.17677669, %v8914_v1  ;;  %v1571_v56 = vmul.f32 100000.0, %v4431_v19  ;;  %4904 = vmatpush3.bf16.msra.mxu1 %v5273_v13  ;;  %v5276_v19 = vld [vmem:[%s5966_s27 + $0x18] sm:$0xff]  }
 0x377   : > { %2989 = vmax.xlane.f32.xlu1 %v7832_v53  ;;  %3023 = vmax.xlane.f32.xlu0 %v7836_v36  ;;  %v5366_v28 = vpop.eup %5365  ;;  %v1841_v9 = vadd.f32 %v1809_v39, %v1569_v57  ;;  %v1811_v58 = vmul.f32 10000000.0, %v4463_v63  ;;  %v7862_v22 = vsub.f32 %v1289_v43, %v2925_v29  ;;  %v3031_v27 = vsub.f32 %v8915_v35, %v7476_v32  ;;  %v5275_v39 = vld [vmem:[%s5966_s27 + $0x10] sm:$0xff]   ;;  %v5277_v59 = vld [vmem:[%s5966_s27 + $0x20] sm:$0xff]  }
 0x378   : > { %v7860_v16 = vpop.eup %5367  ;;  %v2927_v18 = vadd.f32 %v2890_v54, %v1839_v52  ;;  %v2894_v14 = vmul.f32 0.6931472, %v5366_v28  ;;  %v3061_v15 = vmul.f32 1.442695, %v3029_v51  ;;  %v1293_v24 = vmul.f32 0.17677669, %v8916_v10  ;;  %4905 = vmatprep.subr.bf16.mxu1 %v5274_v46 }
 0x379   : > { %v1843_v21 = vadd.f32 %v1811_v58, %v1571_v56  ;;  %v3065_v47 = vmul.f32 1.442695, %v3031_v27  ;;  %v1295_v37 = vmul.f32 0.17677669, %v8917_v50  ;;  %vm4041_vm14 = vcmask 7168  }
 0x37a   : > { %v2929_v2 = vadd.f32 %v2894_v14, %v1841_v9  ;;  %v7869_v23 = vsub.f32 %v1291_v12, %v2927_v18  ;;  %5373 = vpow2.f32 %v3061_v15  ;;  %4906 = vmatpush3.bf16.msra.mxu1 %v5274_v46  ;;  %v5278_v12 = vld [vmem:[%s5966_s27 + $0x28] sm:$0xff]   ;;  %v5280_v15 = vld [vmem:[%s5966_s27 + $0x38] sm:$0xff]  }
 0x37b   : > { %2993 = vmax.xlane.f32.xlu1 %v7850_v41  ;;  %3027 = vmax.xlane.f32.xlu0 %v7847_v62  ;;  %v5370_v38 = vpop.eup %5369  ;;  %5375 = vpow2.f32 %v3065_v47 }
 0x37c   : > { %v2898_v20 = vmul.f32 0.6931472, %v5370_v38  ;;  %v7876_v25 = vsub.f32 %v1293_v24, %v2929_v2  ;;  %4907 = vmatprep.subr.bf16.mxu1 %v5275_v39 }
 0x37d   : > { %v7871_v26 = vpop.eup %5371 }
 0x37e   : > { %v2931_v17 = vadd.f32 %v2898_v20, %v1843_v21  ;;  %4908 = vmatpush3.bf16.msra.mxu1 %v5275_v39 }
 0x37f   : > { %3013 = vmax.xlane.f32.xlu1 %v7862_v22  ;;  %3127 = vadd.xlane.f32.xlu0 %v7860_v16 }
 0x380   : > { %v7879_v42 = vsub.f32 %v1295_v37, %v2931_v17  ;;  %4909 = vmatprep.subr.bf16.mxu1 %v5276_v19 }
 0x382   : > { %4910 = vmatpush3.bf16.msra.mxu1 %v5276_v19 }
 0x383   : > { %3017 = vmax.xlane.f32.xlu1 %v7869_v23  ;;  %3131 = vadd.xlane.f32.xlu0 %v7871_v26 }
 0x384   : > { %v7882_v55 = vpop.eup %5373  ;;  %4911 = vmatprep.subr.bf16.mxu1 %v5277_v59 }
 0x385   : > { %v7886_v7 = vpop.eup %5375 }
 0x386   : > { %4912 = vmatpush3.bf16.msra.mxu1 %v5277_v59 }
 0x387   : > { %3021 = vmax.xlane.f32.xlu1 %v7876_v25  ;;  %4913 = vmatprep.subr.bf16.mxu1 %v5278_v12 }
 0x38a   : > { %4914 = vmatpush3.bf16.msra.mxu1 %v5278_v12 }
 0x38b   : > { %3025 = vmax.xlane.f32.xlu1 %v7879_v42 }
 0x38f   : > { %3125 = vadd.xlane.f32.xlu1 %v7882_v55 }
 0x393   : > { %3129 = vadd.xlane.f32.xlu1 %v7886_v7 }
 0x399   : > { %v7890_v43 = vpop.xlane.xlu0 %2975 }
 0x39a   : > { %v3034_v29 = vsub.f32 %v7265_v30, %v7890_v43 }
 0x39c   : > { %v3071_v52 = vmul.f32 1.442695, %v3034_v29 }
 0x39d   : > { %v7895_v57 = vpop.xlane.xlu0 %2979 }
 0x39e   : > { %5377 = vpow2.f32 %v3071_v52  ;;  %v3036_v63 = vsub.f32 %v7288_v61, %v7895_v57 }
 0x3a0   : > { %v3075_v54 = vmul.f32 1.442695, %v3036_v63 }
 0x3a1   : > { %v7900_v28 = vpop.xlane.xlu0 %2999 }
 0x3a2   : > { %5379 = vpow2.f32 %v3075_v54  ;;  %v3046_v30 = vsub.f32 %v7308_v34, %v7900_v28  ;;  %v5279_v34 = vld [vmem:[%s5966_s27 + $0x30] sm:$0xff]   ;;  %v8920_v54 = vld [vmem:[#allocation21_spill] sm:$0xff] }
 0x3a3   : > { %4915 = vmatprep.subr.bf16.mxu1 %v5279_v34 }
 0x3a4   : > { %v3095_v51 = vmul.f32 1.442695, %v3046_v30  ;;  %4916 = vmatpush3.bf16.msra.mxu1 %v5279_v34 }
 0x3a5   : > { %v7905_v1 = vpop.xlane.xlu0 %2983  ;;  %4917 = vmatprep.subr.bf16.mxu1 %v5280_v15 }
 0x3a6   : > { %5381 = vpow2.f32 %v3095_v51  ;;  %v3038_v61 = vsub.f32 %v7324_v45, %v7905_v1 }
 0x3a8   : > { %v7910_v9 = vpop.eup %5377  ;;  %v3079_v56 = vmul.f32 1.442695, %v3038_v61  ;;  %4918 = vmatpush3.bf16.msra.mxu1 %v5280_v15  ;;  %v8921_v61 = vld [vmem:[#allocation28_spill] sm:$0xff] }
 0x3a9   : > { %v7912_v58 = vpop.xlane.xlu0 %3003  ;;  %3135 = vadd.xlane.f32.xlu0 %v7910_v9 }
 0x3aa   : > { %5383 = vpow2.f32 %v3079_v56  ;;  %v3048_v18 = vsub.f32 %v7347_v0, %v7912_v58 }
 0x3ac   : > { %v7918_v14 = vpop.eup %5379  ;;  %v3099_v38 = vmul.f32 1.442695, %v3048_v18 }
 0x3ad   : > { %v7920_v45 = vpop.xlane.xlu0 %2987  ;;  %3139 = vadd.xlane.f32.xlu0 %v7918_v14 }
 0x3ae   : > { %5385 = vpow2.f32 %v3099_v38  ;;  %v3040_v35 = vsub.f32 %v7366_v33, %v7920_v45 }
 0x3b0   : > { %v7926_v27 = vpop.eup %5381  ;;  %v3083_v10 = vmul.f32 1.442695, %v3040_v35 }
 0x3b1   : > { %3159 = vadd.xlane.f32.xlu0 %v7926_v27  ;;  %v7929_v0 = vpop.xlane.xlu0 %3007 }
 0x3b2   : > { %5387 = vpow2.f32 %v3083_v10  ;;  %v3050_v24 = vsub.f32 %v7388_v60, %v7929_v0  ;;  %v8918_v60 = vld [vmem:[#allocation54_spill] sm:$0xff] }
 0x3b4   : > { %v7933_v2 = vpop.eup %5383  ;;  %v3103_v21 = vmul.f32 1.442695, %v3050_v24  ;;  %v8925_v24 = vld [vmem:[#allocation44_spill] sm:$0xff] }
 0x3b5   : > { %3143 = vadd.xlane.f32.xlu0 %v7933_v2  ;;  %v7936_v20 = vpop.xlane.xlu0 %3011 }
 0x3b6   : > { %5389 = vpow2.f32 %v3103_v21  ;;  %v3052_v33 = vsub.f32 %v7407_v31, %v7936_v20  ;;  %v8919_v31 = vld [vmem:[#allocation24_spill] sm:$0xff] }
 0x3b8   : > { %v7940_v47 = vpop.eup %5385  ;;  %v3107_v50 = vmul.f32 1.442695, %v3052_v33 }
 0x3b9   : > { %3163 = vadd.xlane.f32.xlu0 %v7940_v47  ;;  %v7943_v37 = vpop.xlane.xlu0 %2991 }
 0x3ba   : > { %5391 = vpow2.f32 %v3107_v50  ;;  %v3042_v17 = vsub.f32 %v8918_v60, %v7943_v37  ;;  %v8926_v60 = vld [vmem:[#allocation51_spill] sm:$0xff] }
 0x3bc   : > { %v7947_v13 = vpop.eup %5387  ;;  %v3087_v46 = vmul.f32 1.442695, %v3042_v17 }
 0x3bd   : > { %3147 = vadd.xlane.f32.xlu0 %v7947_v13  ;;  %v7950_v39 = vpop.xlane.xlu0 %2995 }
 0x3be   : > { %5393 = vpow2.f32 %v3087_v46  ;;  %v3044_v29 = vsub.f32 %v8919_v31, %v7950_v39 }
 0x3c0   : > { %v7954_v52 = vpop.eup %5389  ;;  %v3091_v19 = vmul.f32 1.442695, %v3044_v29 }
 0x3c1   : > { %3167 = vadd.xlane.f32.xlu0 %v7954_v52  ;;  %v7957_v63 = vpop.xlane.xlu0 %3015 }
 0x3c2   : > { %5395 = vpow2.f32 %v3091_v19  ;;  %v3054_v59 = vsub.f32 %v8920_v54, %v7957_v63 }
 0x3c4   : > { %v7961_v30 = vpop.eup %5391  ;;  %v3111_v51 = vmul.f32 1.442695, %v3054_v59 }
 0x3c5   : > { %3171 = vadd.xlane.f32.xlu0 %v7961_v30  ;;  %v7964_v12 = vpop.xlane.xlu0 %3019 }
 0x3c6   : > { %5397 = vpow2.f32 %v3111_v51  ;;  %v3056_v56 = vsub.f32 %v8921_v61, %v7964_v12 }
 0x3c8   : > { %v7968_v34 = vpop.eup %5393  ;;  %v3115_v18 = vmul.f32 1.442695, %v3056_v56 }
 0x3c9   : > { %3151 = vadd.xlane.f32.xlu0 %v7968_v34 }
 0x3ca   : > { %5399 = vpow2.f32 %v3115_v18 }
 0x3cc   : > { %v7971_v38 = vpop.eup %5395 }
 0x3cd   : > { %8922 = vst [vmem:[#allocation15_spill] sm:$0xff] %v7971_v38  ;;  %3155 = vadd.xlane.f32.xlu0 %v7971_v38 }
 0x3d0   : > { %v7974_v15 = vpop.eup %5397 }
 0x3d1   : > { %8923 = vst [vmem:[#allocation37_spill] sm:$0xff] %v7974_v15  ;;  %3175 = vadd.xlane.f32.xlu0 %v7974_v15 }
 0x3d4   : > { %v7977_v35 = vpop.eup %5399  ;;  %v7979_v10 = vpop.xlane.xlu1 %2973 }
 0x3d5   : > { %8924 = vst [vmem:[#allocation61_spill] sm:$0xff] %v7977_v35  ;;  %v3033_v21 = vsub.f32 %v8925_v24, %v7979_v10  ;;  %3179 = vadd.xlane.f32.xlu0 %v7977_v35 }
 0x3d7   : > { %v3069_v33 = vmul.f32 1.442695, %v3033_v21 }
 0x3d8   : > { %v7984_v50 = vpop.xlane.xlu1 %2977 }
 0x3d9   : > { %5401 = vpow2.f32 %v3069_v33  ;;  %v3035_v17 = vsub.f32 %v8926_v60, %v7984_v50 }
 0x3db   : > { %v3073_v46 = vmul.f32 1.442695, %v3035_v17 }
 0x3dd   : > { %5403 = vpow2.f32 %v3073_v46 }
 0x3e3   : > { %v7988_v31 = vpop.eup %5401 }
 0x3e4   : > { %3133 = vadd.xlane.f32.xlu1 %v7988_v31 }
 0x3e7   : > { %v7991_v29 = vpop.eup %5403 }
 0x3e8   : > { %3137 = vadd.xlane.f32.xlu1 %v7991_v29 }
 0x3ec   : > { %v7994_v19 = vpop.xlane.xlu1 %2997 }
 0x3ed   : > { %v3045_v54 = vsub.f32 %v7710_v8, %v7994_v19 }
 0x3ef   : > { %v3093_v59 = vmul.f32 1.442695, %v3045_v54 }
 0x3f0   : > { %v7998_v51 = vpop.xlane.xlu1 %2981 }
 0x3f1   : > { %5405 = vpow2.f32 %v3093_v59  ;;  %v3037_v61 = vsub.f32 %v7732_v4, %v7998_v51 }
 0x3f3   : > { %v3077_v56 = vmul.f32 1.442695, %v3037_v61  ;;  %v5281_v61 = vld [vmem:[%s5966_s27 + $0x80] sm:$0xff]  }
 0x3f4   : > { %v8002_v18 = vpop.xlane.xlu1 %3001  ;;  %4951 = vmatprep.subr.bf16.mxu0 %v5281_v61 }
 0x3f5   : > { %5407 = vpow2.f32 %v3077_v56  ;;  %v3047_v24 = vsub.f32 %v7765_v48, %v8002_v18  ;;  %4952 = vmatpush3.bf16.msra.mxu0 %v5281_v61 }
 0x3f7   : > { %v3097_v21 = vmul.f32 1.442695, %v3047_v24 }
 0x3f8   : > { %v8006_v33 = vpop.xlane.xlu1 %2985 }
 0x3f9   : > { %5409 = vpow2.f32 %v3097_v21  ;;  %v3039_v8 = vsub.f32 %v7793_v44, %v8006_v33 }
 0x3fb   : > { %v8010_v60 = vpop.eup %5405  ;;  %v3081_v17 = vmul.f32 1.442695, %v3039_v8 }
 0x3fc   : > { %3157 = vadd.xlane.f32.xlu1 %v8010_v60  ;;  %v8013_v4 = vpop.xlane.xlu1 %3005 }
 0x3fd   : > { %5411 = vpow2.f32 %v3081_v17  ;;  %v3049_v46 = vsub.f32 %v7807_v3, %v8013_v4 }
 0x3ff   : > { %v8017_v48 = vpop.eup %5407  ;;  %v3101_v54 = vmul.f32 1.442695, %v3049_v46  ;;  %v5283_v46 = vld [vmem:[%s5966_s27 + $0x88] sm:$0xff]  }
 0x400   : > { %3141 = vadd.xlane.f32.xlu1 %v8017_v48  ;;  %v8020_v59 = vpop.xlane.xlu1 %3009  ;;  %4953 = vmatprep.subr.bf16.mxu0 %v5283_v46 }
 0x401   : > { %5413 = vpow2.f32 %v3101_v54  ;;  %v3051_v44 = vsub.f32 %v7820_v49, %v8020_v59  ;;  %v8037_v49 = vld [vmem:[%s5966_s27 + $0x40] sm:$0xff]   ;;  %v5285_v54 = vld [vmem:[%s5966_s27 + $0x90] sm:$0xff]   ;;  %4954 = vmatpush3.bf16.msra.mxu0 %v5283_v46 }
 0x402   : > { %4927 = vmatprep.subr.bf16.mxu1 %v8037_v49  ;;  %4955 = vmatprep.subr.bf16.mxu0 %v5285_v54 }
 0x403   : > { %v8025_v56 = vpop.eup %5409  ;;  %v3105_v24 = vmul.f32 1.442695, %v3051_v44 }
 0x404   : > { %3161 = vadd.xlane.f32.xlu1 %v8025_v56  ;;  %v8028_v3 = vpop.xlane.xlu1 %2989  ;;  %v8030_v21 = vpop.xlane.xlu0 %3023 }
 0x405   : > { %5415 = vpow2.f32 %v3105_v24  ;;  %v3041_v8 = vsub.f32 %v7832_v53, %v8028_v3  ;;  %v3058_v17 = vsub.f32 %v7836_v36, %v8030_v21  ;;  %4956 = vmatpush3.bf16.msra.mxu0 %v5285_v54 }
 0x407   : > { %v8041_v44 = vpop.eup %5411  ;;  %v3085_v11 = vmul.f32 1.442695, %v3041_v8  ;;  %v3119_v35 = vmul.f32 1.442695, %v3058_v17 }
 0x408   : > { %3145 = vadd.xlane.f32.xlu1 %v8041_v44  ;;  %v8045_v24 = vpop.xlane.xlu1 %2993  ;;  %v8047_v53 = vpop.xlane.xlu0 %3027 }
 0x409   : > { %8927 = vst [vmem:[#allocation46_spill] sm:$0xff] %v8045_v24  ;;  %8928 = vst [vmem:[#allocation57_spill] sm:$0xff] %v8047_v53  ;;  %5417 = vpow2.f32 %v3085_v11  ;;  %v3043_v36 = vsub.f32 %v7850_v41, %v8045_v24  ;;  %v3060_v61 = vsub.f32 %v7847_v62, %v8047_v53  ;;  %v5287_v62 = vld [vmem:[%s5966_s27 + $0x98] sm:$0xff]  }
 0x40a   : > { %5419 = vpow2.f32 %v3119_v35  ;;  %4957 = vmatprep.subr.bf16.mxu0 %v5287_v62 }
 0x40b   : > { %v8054_v8 = vpop.eup %5413  ;;  %v3089_v17 = vmul.f32 1.442695, %v3043_v36  ;;  %v3123_v15 = vmul.f32 1.442695, %v3060_v61  ;;  %4958 = vmatpush3.bf16.msra.mxu0 %v5287_v62  ;;  %v5291_v62 = vld [vmem:[%s5966_s27 + $0xa8] sm:$0xff]  }
 0x40c   : > { %3165 = vadd.xlane.f32.xlu1 %v8054_v8  ;;  %v8057_v38 = vpop.xlane.xlu1 %3013  ;;  %v3128_v11 = vpop.xlane.xlu0 %3127 }
 0x40d   : > { %8929 = vst [vmem:[#allocation35_spill] sm:$0xff] %v8057_v38  ;;  %5421 = vpow2.f32 %v3089_v17  ;;  %v3053_v41 = vsub.f32 %v7862_v22, %v8057_v38 }
 0x40e   : > { %5423 = vpow2.f32 %v3123_v15  ;;  %v5289_v15 = vld [vmem:[%s5966_s27 + $0xa0] sm:$0xff]  }
 0x40f   : > { %v8063_v35 = vpop.eup %5415  ;;  %v3109_v46 = vmul.f32 1.442695, %v3053_v41  ;;  %5425 = vlog2.f32 %v3128_v11  ;;  %4959 = vmatprep.subr.bf16.mxu0 %v5289_v15 }
 0x410   : > { %3169 = vadd.xlane.f32.xlu1 %v8063_v35  ;;  %v8066_v36 = vpop.xlane.xlu1 %3017  ;;  %v3132_v61 = vpop.xlane.xlu0 %3131  ;;  %4960 = vmatpush3.bf16.msra.mxu0 %v5289_v15 }
 0x411   : > { %8930 = vst [vmem:[#allocation71_spill] sm:$0xff] %v8066_v36  ;;  %5427 = vpow2.f32 %v3109_v46  ;;  %v3055_v22 = vsub.f32 %v7869_v23, %v8066_v36  ;;  %4961 = vmatprep.subr.bf16.mxu0 %v5291_v62 }
 0x412   : > { %5429 = vlog2.f32 %v3132_v61 }
 0x413   : > { %v8071_v54 = vpop.eup %5417  ;;  %v3113_v17 = vmul.f32 1.442695, %v3055_v22 }
 0x414   : > { %v8073_v41 = vpop.eup %5419  ;;  %3149 = vadd.xlane.f32.xlu1 %v8071_v54  ;;  %v8076_v38 = vpop.xlane.xlu1 %3021  ;;  %4962 = vmatpush3.bf16.msra.mxu0 %v5291_v62 }
 0x415   : > { %8931 = vst [vmem:[#allocation60_spill] sm:$0xff] %v8073_v41  ;;  %8932 = vst [vmem:[#allocation72_spill] sm:$0xff] %v8076_v38  ;;  %5431 = vpow2.f32 %v3113_v17  ;;  %v3057_v23 = vsub.f32 %v7876_v25, %v8076_v38  ;;  %3183 = vadd.xlane.f32.xlu0 %v8073_v41  ;;  %v5293_v41 = vld [vmem:[%s5966_s27 + $0xb0] sm:$0xff]  }
 0x416   : > { %4963 = vmatprep.subr.bf16.mxu0 %v5293_v41 }
 0x417   : > { %v8084_v46 = vpop.eup %5421  ;;  %v3117_v22 = vmul.f32 1.442695, %v3057_v23 }
 0x418   : > { %v8086_v36 = vpop.eup %5423  ;;  %3153 = vadd.xlane.f32.xlu1 %v8084_v46  ;;  %v8089_v53 = vpop.xlane.xlu1 %3025  ;;  %4964 = vmatpush3.bf16.msra.mxu0 %v5293_v41 }
 0x419   : > { %8933 = vst [vmem:[#allocation73_spill] sm:$0xff] %v8086_v36  ;;  %8934 = vst [vmem:[#allocation75_spill] sm:$0xff] %v8089_v53  ;;  %v5426_v17 = vpop.eup %5425  ;;  %5433 = vpow2.f32 %v3117_v22  ;;  %v3059_v25 = vsub.f32 %v7879_v42, %v8089_v53  ;;  %3187 = vadd.xlane.f32.xlu0 %v8086_v36 }
 0x41a   : > { %v3192_v15 = vmul.f32 0.6931472, %v5426_v17  ;;  %5435 = vrcp.f32 %v3128_v11  ;;  %v5295_v17 = vld [vmem:[%s5966_s27 + $0xb8] sm:$0xff]  }
 0x41b   : > { %v8095_v23 = vpop.eup %5427  ;;  %v3121_v38 = vmul.f32 1.442695, %v3059_v25  ;;  %4965 = vmatprep.subr.bf16.mxu0 %v5295_v17 }
 0x41c   : > { %v5430_v22 = vpop.eup %5429  ;;  %v3254_v24 = vadd.f32 %v3192_v15, %v8907_v5  ;;  %3173 = vadd.xlane.f32.xlu1 %v8095_v23  ;;  %v3126_v42 = vpop.xlane.xlu1 %3125  ;;  %4966 = vmatpush3.bf16.msra.mxu0 %v5295_v17 }
 0x41d   : > { %v3196_v62 = vmul.f32 0.6931472, %v5430_v22  ;;  %5437 = vpow2.f32 %v3121_v38 }
 0x41e   : > { %4043 = vst.msk [vmem:[%s8100_s16 + $0x8] sm:$0xff] %vm4041_vm14, %v3254_v24  ;;  %5439 = vlog2.f32 %v3126_v42 }
 0x41f   : > { %v8107_v36 = vpop.eup %5431  ;;  %v3256_v25 = vadd.f32 %v3196_v62, %v7512_v40  ;;  %5441 = vrcp.f32 %v3126_v42 }
 0x420   : > { %5443 = vrcp.f32 %v3132_v61  ;;  %3177 = vadd.xlane.f32.xlu1 %v8107_v36  ;;  %v3130_v5 = vpop.xlane.xlu1 %3129 }
 0x421   : > { %4045 = vst.msk [vmem:[%s8100_s16 + $0x18] sm:$0xff] %vm4041_vm14, %v3256_v25  ;;  %5445 = vlog2.f32 %v3130_v5 }
 0x422   : > { %5447 = vrcp.f32 %v3130_v5 }
 0x423   : > { %v8113_v38 = vpop.eup %5433 }
 0x424   : > { %8935 = vst [vmem:[#allocation30_spill] sm:$0xff] %v8113_v38  ;;  %3181 = vadd.xlane.f32.xlu1 %v8113_v38  ;;  %v5436_v24 = vpop.eup %5435 }
 0x425   : > { %v3318_v42 = vmul.f32 %v5436_v24, %v7860_v16  ;;  %v5284_v16 = vld [vmem:[%s5966_s27 + $0x48] sm:$0xff]  }
 0x427   : > { %v8116_v11 = vpop.eup %5437 }
 0x428   : > { %8936 = vst [vmem:[#allocation25_spill] sm:$0xff] %v8116_v11  ;;  %v5440_v40 = vpop.eup %5439  ;;  %3185 = vadd.xlane.f32.xlu1 %v8116_v11 }
 0x429   : > { %v5442_v61 = vpop.eup %5441  ;;  %v3190_v41 = vmul.f32 0.6931472, %v5440_v40 }
 0x42a   : > { %v5444_v15 = vpop.eup %5443  ;;  %v3317_v22 = vmul.f32 %v5442_v61, %v7882_v55 }
 0x42b   : > { %v5446_v62 = vpop.eup %5445  ;;  %v3253_v17 = vadd.f32 %v3190_v41, %v7441_v6  ;;  %v3320_v38 = vmul.f32 %v5444_v15, %v7871_v26  ;;  %v5286_v6 = vld [vmem:[%s5966_s27 + $0x50] sm:$0xff]  }
 0x42c   : > { %v5448_v25 = vpop.eup %5447  ;;  %v3194_v5 = vmul.f32 0.6931472, %v5446_v62  ;;  %v3349_v53 = vpack.c.bf16 %v3318_v42, %v3317_v22  ;;  %v5294_v41 = vld [vmem:[%s5966_s27 + $0x70] sm:$0xff]  }
 0x42d   : > { %4042 = vst.msk [vmem:[%s8100_s16] sm:$0xff] %vm4041_vm14, %v3253_v17  ;;  %v3319_v40 = vmul.f32 %v5448_v25, %v7886_v7  ;;  %v5288_v7 = vld [vmem:[%s5966_s27 + $0x58] sm:$0xff]  }
 0x42e   : > { %v3255_v11 = vadd.f32 %v3194_v5, %v7476_v32  ;;  %4919 = vmatprep.mubr.bf16.mxu1 %v3349_v53  ;;  %v5290_v53 = vld [vmem:[%s5966_s27 + $0x60] sm:$0xff]   ;;  %v5296_v17 = vld [vmem:[%s5966_s27 + $0x78] sm:$0xff]  }
 0x42f   : > { %v3350_v55 = vpack.c.bf16 %v3320_v38, %v3319_v40  ;;  %v5292_v38 = vld [vmem:[%s5966_s27 + $0x68] sm:$0xff]  }
 0x430   : > { %4044 = vst.msk [vmem:[%s8100_s16 + $0x10] sm:$0xff] %vm4041_vm14, %v3255_v11 }
 0x431   : > { %4920 = vmatmul.mubr.bf16.vlgmr.msra.gmra.mrb[16].mxu1 %v3350_v55  ;;  %v8162_v55 = vld [vmem:[%s5966_s27 + $0xc0] sm:$0xff]  }
 0x432   : > { %4928 = vmatpush3.bf16.msra.mxu1 %v8037_v49 }
 0x433   : > { %4929 = vmatprep.subr.bf16.mxu1 %v5284_v16 }
 0x436   : > { %v8132_v26 = vpop.xlane.xlu0 %3135  ;;  %4930 = vmatpush3.bf16.msra.mxu1 %v5284_v16 }
 0x437   : > { %5449 = vlog2.f32 %v8132_v26  ;;  %4931 = vmatprep.subr.bf16.mxu1 %v5286_v6 }
 0x43a   : > { %v8136_v32 = vpop.xlane.xlu0 %3139  ;;  %4932 = vmatpush3.bf16.msra.mxu1 %v5286_v6 }
 0x43b   : > { %5451 = vlog2.f32 %v8136_v32  ;;  %4933 = vmatprep.subr.bf16.mxu1 %v5288_v7 }
 0x43e   : > { %v8140_v49 = vpop.xlane.xlu0 %3159  ;;  %4934 = vmatpush3.bf16.msra.mxu1 %v5288_v7 }
 0x43f   : > { %5453 = vlog2.f32 %v8140_v49  ;;  %4935 = vmatprep.subr.bf16.mxu1 %v5290_v53 }
 0x441   : > { %v5450_v24 = vpop.eup %5449 }
 0x442   : > { %v3200_v11 = vmul.f32 0.6931472, %v5450_v24  ;;  %v8144_v61 = vpop.xlane.xlu0 %3143  ;;  %4936 = vmatpush3.bf16.msra.mxu1 %v5290_v53 }
 0x443   : > { %5455 = vlog2.f32 %v8144_v61  ;;  %4937 = vmatprep.subr.bf16.mxu1 %v5292_v38 }
 0x444   : > { %v3258_v15 = vadd.f32 %v3200_v11, %v7890_v43 }
 0x445   : > { %v5452_v22 = vpop.eup %5451 }
 0x446   : > { %4047 = vst.msk [vmem:[%s8100_s16 + $0x28] sm:$0xff] %vm4041_vm14, %v3258_v15  ;;  %v3204_v42 = vmul.f32 0.6931472, %v5452_v22  ;;  %v8151_v62 = vpop.xlane.xlu0 %3163  ;;  %4938 = vmatpush3.bf16.msra.mxu1 %v5292_v38 }
 0x447   : > { %5457 = vlog2.f32 %v8151_v62  ;;  %4939 = vmatprep.subr.bf16.mxu1 %v5294_v41 }
 0x448   : > { %v3260_v25 = vadd.f32 %v3204_v42, %v7895_v57 }
 0x449   : > { %v5454_v5 = vpop.eup %5453 }
 0x44a   : > { %4049 = vst.msk [vmem:[%s8100_s16 + $0x38] sm:$0xff] %vm4041_vm14, %v3260_v25  ;;  %v3224_v40 = vmul.f32 0.6931472, %v5454_v5  ;;  %v8158_v43 = vpop.xlane.xlu0 %3147  ;;  %4940 = vmatpush3.bf16.msra.mxu1 %v5294_v41 }
 0x44b   : > { %5459 = vlog2.f32 %v8158_v43  ;;  %4941 = vmatprep.subr.bf16.mxu1 %v5296_v17 }
 0x44c   : > { %v3270_v16 = vadd.f32 %v3224_v40, %v7900_v28 }
 0x44d   : > { %v5456_v6 = vpop.eup %5455 }
 0x44e   : > { %4059 = vst.msk [vmem:[%s8100_s16 + $0x88] sm:$0xff] %vm4041_vm14, %v3270_v16  ;;  %v3208_v57 = vmul.f32 0.6931472, %v5456_v6  ;;  %v8167_v7 = vpop.xlane.xlu0 %3167  ;;  %4942 = vmatpush3.bf16.msra.mxu1 %v5296_v17 }
 0x44f   : > { %5461 = vlog2.f32 %v8167_v7  ;;  %4975 = vmatprep.subr.bf16.mxu1 %v8162_v55 }
 0x450   : > { %v3262_v53 = vadd.f32 %v3208_v57, %v7905_v1 }
 0x451   : > { %v5458_v38 = vpop.eup %5457 }
 0x452   : > { %4051 = vst.msk [vmem:[%s8100_s16 + $0x48] sm:$0xff] %vm4041_vm14, %v3262_v53  ;;  %v3228_v24 = vmul.f32 0.6931472, %v5458_v38  ;;  %v8174_v28 = vpop.xlane.xlu0 %3171 }
 0x453   : > { %5463 = vlog2.f32 %v8174_v28 }
 0x454   : > { %v3272_v11 = vadd.f32 %v3228_v24, %v7912_v58 }
 0x455   : > { %v5460_v41 = vpop.eup %5459 }
 0x456   : > { %4061 = vst.msk [vmem:[%s8100_s16 + $0x98] sm:$0xff] %vm4041_vm14, %v3272_v11  ;;  %v3212_v15 = vmul.f32 0.6931472, %v5460_v41  ;;  %v8180_v22 = vpop.xlane.xlu0 %3151 }
 0x457   : > { %5465 = vlog2.f32 %v8180_v22 }
 0x458   : > { %v3264_v1 = vadd.f32 %v3212_v15, %v7920_v45 }
 0x459   : > { %v5462_v42 = vpop.eup %5461 }
 0x45a   : > { %4053 = vst.msk [vmem:[%s8100_s16 + $0x58] sm:$0xff] %vm4041_vm14, %v3264_v1  ;;  %v3232_v17 = vmul.f32 0.6931472, %v5462_v42  ;;  %v8186_v25 = vpop.xlane.xlu0 %3155 }
 0x45b   : > { %5467 = vlog2.f32 %v8186_v25 }
 0x45c   : > { %v3274_v58 = vadd.f32 %v3232_v17, %v7929_v0 }
 0x45d   : > { %v5464_v5 = vpop.eup %5463 }
 0x45e   : > { %4063 = vst.msk [vmem:[%s8100_s16 + $0xa8] sm:$0xff] %vm4041_vm14, %v3274_v58  ;;  %v3236_v40 = vmul.f32 0.6931472, %v5464_v5  ;;  %v8192_v16 = vpop.xlane.xlu0 %3175 }
 0x45f   : > { %5469 = vlog2.f32 %v8192_v16 }
 0x460   : > { %v3276_v45 = vadd.f32 %v3236_v40, %v7936_v20 }
 0x461   : > { %v5466_v6 = vpop.eup %5465 }
 0x462   : > { %4065 = vst.msk [vmem:[%s8100_s16 + $0xb8] sm:$0xff] %vm4041_vm14, %v3276_v45  ;;  %v3216_v57 = vmul.f32 0.6931472, %v5466_v6  ;;  %v8198_v53 = vpop.xlane.xlu0 %3179 }
 0x463   : > { %5471 = vlog2.f32 %v8198_v53 }
 0x464   : > { %v3266_v0 = vadd.f32 %v3216_v57, %v7943_v37  ;;  %5473 = vrcp.f32 %v8132_v26 }
 0x465   : > { %v5468_v38 = vpop.eup %5467 }
 0x466   : > { %4055 = vst.msk [vmem:[%s8100_s16 + $0x68] sm:$0xff] %vm4041_vm14, %v3266_v0  ;;  %v3220_v24 = vmul.f32 0.6931472, %v5468_v38 }
 0x468   : > { %v3268_v11 = vadd.f32 %v3220_v24, %v7950_v39 }
 0x469   : > { %v5470_v41 = vpop.eup %5469 }
 0x46a   : > { %4057 = vst.msk [vmem:[%s8100_s16 + $0x78] sm:$0xff] %vm4041_vm14, %v3268_v11  ;;  %v3240_v20 = vmul.f32 0.6931472, %v5470_v41 }
 0x46c   : > { %v3278_v15 = vadd.f32 %v3240_v20, %v7957_v63 }
 0x46d   : > { %v5472_v1 = vpop.eup %5471 }
 0x46e   : > { %4067 = vst.msk [vmem:[%s8100_s16 + $0xc8] sm:$0xff] %vm4041_vm14, %v3278_v15  ;;  %v3244_v42 = vmul.f32 0.6931472, %v5472_v1  ;;  %v5474_v63 = vpop.eup %5473 }
 0x46f   : > { %v3322_v26 = vmul.f32 %v5474_v63, %v7910_v9 }
 0x470   : > { %v3280_v17 = vadd.f32 %v3244_v42, %v7964_v12 }
 0x471   : > { %v3134_v37 = vpop.xlane.xlu1 %3133 }
 0x472   : > { %4069 = vst.msk [vmem:[%s8100_s16 + $0xd8] sm:$0xff] %vm4041_vm14, %v3280_v17  ;;  %5475 = vlog2.f32 %v3134_v37 }
 0x473   : > { %5477 = vrcp.f32 %v3134_v37 }
 0x474   : > { %5479 = vrcp.f32 %v8136_v32 }
 0x475   : > { %v3138_v39 = vpop.xlane.xlu1 %3137 }
 0x476   : > { %5481 = vlog2.f32 %v3138_v39 }
 0x477   : > { %5483 = vrcp.f32 %v3138_v39 }
 0x478   : > { %5485 = vrcp.f32 %v8140_v49 }
 0x47c   : > { %v5476_v58 = vpop.eup %5475 }
 0x47d   : > { %v5478_v5 = vpop.eup %5477  ;;  %v3198_v40 = vmul.f32 0.6931472, %v5476_v58 }
 0x47e   : > { %v3321_v12 = vmul.f32 %v5478_v5, %v7988_v31  ;;  %v5480_v45 = vpop.eup %5479 }
 0x47f   : > { %v3257_v6 = vadd.f32 %v3198_v40, %v7979_v10  ;;  %v3324_v11 = vmul.f32 %v5480_v45, %v7918_v14 }
 0x480   : > { %v5482_v57 = vpop.eup %5481  ;;  %v3351_v0 = vpack.c.bf16 %v3322_v26, %v3321_v12 }
 0x481   : > { %v5484_v38 = vpop.eup %5483  ;;  %4046 = vst.msk [vmem:[%s8100_s16 + $0x20] sm:$0xff] %vm4041_vm14, %v3257_v6  ;;  %v3202_v32 = vmul.f32 0.6931472, %v5482_v57 }
 0x482   : > { %4923 = vmatprep.mubr.bf16.mxu1 %v3351_v0  ;;  %v3323_v24 = vmul.f32 %v5484_v38, %v7991_v29  ;;  %v5486_v14 = vpop.eup %5485 }
 0x483   : > { %v3259_v41 = vadd.f32 %v3202_v32, %v7984_v50 }
 0x484   : > { %v3352_v20 = vpack.c.bf16 %v3324_v11, %v3323_v24 }
 0x485   : > { %4048 = vst.msk [vmem:[%s8100_s16 + $0x30] sm:$0xff] %vm4041_vm14, %v3259_v41  ;;  %v5298_v41 = vld [vmem:[%s5966_s27 + $0xc8] sm:$0xff]  }
 0x486   : > { %4924 = vmatmul.mubr.bf16.gmra.mrb[20].mxu1 %v3352_v20 }
 0x489   : > { %v3158_v9 = vpop.xlane.xlu1 %3157 }
 0x48a   : > { %5487 = vlog2.f32 %v3158_v9 }
 0x48b   : > { %5489 = vrcp.f32 %v3158_v9 }
 0x48c   : > { %5491 = vrcp.f32 %v8144_v61  ;;  %v3334_v61 = vmul.f32 %v5486_v14, %v7926_v27 }
 0x48d   : > { %v3142_v10 = vpop.xlane.xlu1 %3141 }
 0x48e   : > { %5493 = vlog2.f32 %v3142_v10 }
 0x48f   : > { %5495 = vrcp.f32 %v3142_v10 }
 0x490   : > { %5497 = vrcp.f32 %v8151_v62 }
 0x491   : > { %v3162_v31 = vpop.xlane.xlu1 %3161 }
 0x492   : > { %5499 = vlog2.f32 %v3162_v31 }
 0x493   : > { %5501 = vrcp.f32 %v3162_v31 }
 0x494   : > { %v5488_v50 = vpop.eup %5487  ;;  %5503 = vrcp.f32 %v8158_v43 }
 0x495   : > { %v5490_v29 = vpop.eup %5489  ;;  %v3222_v49 = vmul.f32 0.6931472, %v5488_v50  ;;  %v3146_v15 = vpop.xlane.xlu1 %3145 }
 0x496   : > { %5505 = vlog2.f32 %v3146_v15  ;;  %v3333_v1 = vmul.f32 %v5490_v29, %v8010_v60  ;;  %v5492_v42 = vpop.eup %5491  ;;  %v5299_v29 = vld [vmem:[%s5966_s27 + $0xd0] sm:$0xff]  }
 0x497   : > { %v3269_v17 = vadd.f32 %v3222_v49, %v7994_v19  ;;  %5507 = vrcp.f32 %v3146_v15  ;;  %v3326_v27 = vmul.f32 %v5492_v42, %v7933_v2 }
 0x498   : > { %v5494_v62 = vpop.eup %5493  ;;  %v3357_v37 = vpack.c.bf16 %v3334_v61, %v3333_v1  ;;  %5509 = vrcp.f32 %v8167_v7 }
 0x499   : > { %v5496_v39 = vpop.eup %5495  ;;  %4058 = vst.msk [vmem:[%s8100_s16 + $0x80] sm:$0xff] %vm4041_vm14, %v3269_v17  ;;  %v3206_v43 = vmul.f32 0.6931472, %v5494_v62  ;;  %v3166_v63 = vpop.xlane.xlu1 %3165 }
 0x49a   : > { %5511 = vlog2.f32 %v3166_v63  ;;  %4967 = vmatprep.mubr.bf16.mxu0 %v3357_v37  ;;  %v3325_v60 = vmul.f32 %v5496_v39, %v8017_v48  ;;  %v5498_v58 = vpop.eup %5497 }
 0x49b   : > { %v3261_v19 = vadd.f32 %v3206_v43, %v7998_v51  ;;  %5513 = vrcp.f32 %v3166_v63  ;;  %v3336_v45 = vmul.f32 %v5498_v58, %v7940_v47  ;;  %v5301_v58 = vld [vmem:[%s5966_s27 + $0xe0] sm:$0xff]  }
 0x49c   : > { %v5500_v5 = vpop.eup %5499  ;;  %v3353_v40 = vpack.c.bf16 %v3326_v27, %v3325_v60  ;;  %5515 = vrcp.f32 %v8174_v28 }
 0x49d   : > { %v5502_v12 = vpop.eup %5501  ;;  %4050 = vst.msk [vmem:[%s8100_s16 + $0x40] sm:$0xff] %vm4041_vm14, %v3261_v19  ;;  %v3226_v7 = vmul.f32 0.6931472, %v5500_v5  ;;  %v3170_v26 = vpop.xlane.xlu1 %3169 }
 0x49e   : > { %v3335_v48 = vmul.f32 %v5502_v12, %v8025_v56  ;;  %5517 = vlog2.f32 %v3170_v26  ;;  %4943 = vmatprep.mubr.bf16.mxu1 %v3353_v40  ;;  %v5504_v2 = vpop.eup %5503  ;;  %v8937_v12 = vld [vmem:[#allocation15_spill] sm:$0xff] }
 0x49f   : > { %v3271_v51 = vadd.f32 %v3226_v7, %v8002_v18  ;;  %5519 = vrcp.f32 %v3170_v26  ;;  %v3328_v47 = vmul.f32 %v5504_v2, %v7947_v13 }
 0x4a0   : > { %v5506_v6 = vpop.eup %5505  ;;  %v3358_v57 = vpack.c.bf16 %v3336_v45, %v3335_v48  ;;  %5521 = vrcp.f32 %v8180_v22  ;;  %v8938_v45 = vld [vmem:[#allocation46_spill] sm:$0xff] }
 0x4a1   : > { %v5508_v0 = vpop.eup %5507  ;;  %4060 = vst.msk [vmem:[%s8100_s16 + $0x90] sm:$0xff] %vm4041_vm14, %v3271_v51  ;;  %v3210_v28 = vmul.f32 0.6931472, %v5506_v6  ;;  %v3150_v38 = vpop.xlane.xlu1 %3149  ;;  %v5302_v51 = vld [vmem:[%s5966_s27 + $0xe8] sm:$0xff]  }
 0x4a2   : > { %v3327_v56 = vmul.f32 %v5508_v0, %v8041_v44  ;;  %5523 = vlog2.f32 %v3150_v38  ;;  %4968 = vmatmul.mubr.bf16.vlgmr.msra.gmra.mrb[16].mxu0 %v3358_v57  ;;  %v8249_v32 = vpop.xlane.xlu0 %3183  ;;  %v5510_v18 = vpop.eup %5509 }
 0x4a3   : > { %v3263_v24 = vadd.f32 %v3210_v28, %v8006_v33  ;;  %5525 = vrcp.f32 %v3150_v38  ;;  %v3338_v10 = vmul.f32 %v5510_v18, %v7954_v52  ;;  %v8941_v18 = vld [vmem:[#allocation35_spill] sm:$0xff] }
 0x4a4   : > { %v5512_v11 = vpop.eup %5511  ;;  %5527 = vlog2.f32 %v8249_v32  ;;  %v3354_v22 = vpack.c.bf16 %v3328_v47, %v3327_v56  ;;  %v8940_v47 = vld [vmem:[#allocation37_spill] sm:$0xff] }
 0x4a5   : > { %v5514_v20 = vpop.eup %5513  ;;  %5529 = vrcp.f32 %v8186_v25  ;;  %4052 = vst.msk [vmem:[%s8100_s16 + $0x50] sm:$0xff] %vm4041_vm14, %v3263_v24  ;;  %v3230_v13 = vmul.f32 0.6931472, %v5512_v11  ;;  %v3154_v44 = vpop.xlane.xlu1 %3153 }
 0x4a6   : > { %5531 = vlog2.f32 %v3154_v44  ;;  %4944 = vmatmul.mubr.bf16.vlgmr.msra.gmra.mrb[24].mxu1 %v3354_v22  ;;  %v8257_v9 = vpop.xlane.xlu0 %3187  ;;  %v3337_v33 = vmul.f32 %v5514_v20, %v8054_v8  ;;  %v5516_v31 = vpop.eup %5515  ;;  %v5303_v22 = vld [vmem:[%s5966_s27 + $0xf0] sm:$0xff]  }
 0x4a7   : > { %v3273_v14 = vadd.f32 %v3230_v13, %v8013_v4  ;;  %5533 = vrcp.f32 %v3154_v44  ;;  %4976 = vmatpush3.bf16.msra.mxu1 %v8162_v55  ;;  %v3340_v55 = vmul.f32 %v5516_v31, %v7961_v30  ;;  %v8942_v13 = vld [vmem:[#allocation71_spill] sm:$0xff] }
 0x4a8   : > { %v5518_v25 = vpop.eup %5517  ;;  %5535 = vlog2.f32 %v8257_v9  ;;  %4977 = vmatprep.subr.bf16.mxu1 %v5298_v41  ;;  %v3359_v50 = vpack.c.bf16 %v3338_v10, %v3337_v33  ;;  %v5304_v33 = vld [vmem:[%s5966_s27 + $0xf8] sm:$0xff]  }
 0x4a9   : > { %v5520_v49 = vpop.eup %5519  ;;  %5537 = vrcp.f32 %v8192_v16  ;;  %4062 = vst.msk [vmem:[%s8100_s16 + $0xa0] sm:$0xff] %vm4041_vm14, %v3273_v14  ;;  %v3234_v52 = vmul.f32 0.6931472, %v5518_v25  ;;  %v3174_v8 = vpop.xlane.xlu1 %3173  ;;  %v5300_v16 = vld [vmem:[%s5966_s27 + $0xd8] sm:$0xff]   ;;  %s4668_s27 = sshll.u32 %s4096_s30, 7 }
 0x4aa   : > { %5539 = vlog2.f32 %v3174_v8  ;;  %4971 = vmatprep.mubr.bf16.mxu0 %v3359_v50  ;;  %v3339_v4 = vmul.f32 %v5520_v49, %v8063_v35  ;;  %v5522_v15 = vpop.eup %5521  ;;  %v8943_v50 = vld [vmem:[#allocation72_spill] sm:$0xff]  ;;  %s8390_s7 = scalar_lea.hbm %s8449_s5, %s4668_s27 }
 0x4ab   : > { %v3275_v1 = vadd.f32 %v3234_v52, %v8020_v59  ;;  %5541 = vrcp.f32 %v3174_v8  ;;  %4978 = vmatpush3.bf16.msra.mxu1 %v5298_v41  ;;  %v3330_v59 = vmul.f32 %v5522_v15, %v7968_v34  ;;  %v8945_v15 = vld [vmem:[#allocation61_spill] sm:$0xff] }
 0x4ac   : > { %v5524_v61 = vpop.eup %5523  ;;  %4979 = vmatprep.subr.bf16.mxu1 %v5299_v29  ;;  %v3360_v42 = vpack.c.bf16 %v3340_v55, %v3339_v4  ;;  %v8944_v4 = vld [vmem:[#allocation30_spill] sm:$0xff] }
 0x4ad   : > { %v5526_v17 = vpop.eup %5525  ;;  %4064 = vst.msk [vmem:[%s8100_s16 + $0xb0] sm:$0xff] %vm4041_vm14, %v3275_v1  ;;  %v3214_v62 = vmul.f32 0.6931472, %v5524_v61  ;;  %v3178_v37 = vpop.xlane.xlu1 %3177  ;;  %v8946_v1 = vld [vmem:[#allocation75_spill] sm:$0xff] }
 0x4ae   : > { %v5528_v39 = vpop.eup %5527  ;;  %5543 = vlog2.f32 %v3178_v37  ;;  %4972 = vmatmul.mubr.bf16.gmra.mrb[20].mxu0 %v3360_v42  ;;  %v3329_v30 = vmul.f32 %v5526_v17, %v8071_v54  ;;  %v8947_v42 = vld [vmem:[#allocation60_spill] sm:$0xff] }
 0x4af   : > { %v5530_v35 = vpop.eup %5529  ;;  %v3265_v43 = vadd.f32 %v3214_v62, %v8028_v3  ;;  %v3248_v63 = vmul.f32 0.6931472, %v5528_v39  ;;  %4980 = vmatpush3.bf16.msra.mxu1 %v5299_v29  ;;  %5545 = vrcp.f32 %v8198_v53  ;;  %v8948_v39 = vld [vmem:[#allocation25_spill] sm:$0xff] }
 0x4b0   : > { %v5532_v60 = vpop.eup %5531  ;;  %4981 = vmatprep.subr.bf16.mxu1 %v5300_v16  ;;  %v3355_v27 = vpack.c.bf16 %v3330_v59, %v3329_v30  ;;  %v3332_v7 = vmul.f32 %v5530_v35, %v8937_v12  ;;  %v8949_v59 = vld [vmem:[#allocation73_spill] sm:$0xff] }
 0x4b1   : > { %v5534_v19 = vpop.eup %5533  ;;  %4054 = vst.msk [vmem:[%s8100_s16 + $0x60] sm:$0xff] %vm4041_vm14, %v3265_v43  ;;  %v3282_v5 = vadd.f32 %v3248_v63, %v8030_v21  ;;  %v3218_v54 = vmul.f32 0.6931472, %v5532_v60  ;;  %v3182_v40 = vpop.xlane.xlu1 %3181 }
 0x4b2   : > { %v5536_v34 = vpop.eup %5535  ;;  %5547 = vlog2.f32 %v3182_v40  ;;  %4947 = vmatprep.mubr.bf16.mxu1 %v3355_v27  ;;  %v3331_v3 = vmul.f32 %v5534_v19, %v8084_v46  ;;  %v8939_v46 = vld [vmem:[#allocation57_spill] sm:$0xff] }
 0x4b3   : > { %v5538_v26 = vpop.eup %5537  ;;  %4071 = vst.msk [vmem:[%s8100_s16 + $0xe8] sm:$0xff] %vm4041_vm14, %v3282_v5  ;;  %v3267_v53 = vadd.f32 %v3218_v54, %v8938_v45  ;;  %v3252_v48 = vmul.f32 0.6931472, %v5536_v34  ;;  %5549 = vrcp.f32 %v3178_v37  ;;  %4982 = vmatpush3.bf16.msra.mxu1 %v5300_v16  ;;  %v8950_v54 = vlaneseq  ;;  %v8951_v34 = vld [vmem:[#allocation9_spill] sm:$0xff] }
 0x4b4   : > { %v5540_v21 = vpop.eup %5539  ;;  %5551 = vrcp.f32 %v3182_v40  ;;  %4983 = vmatprep.subr.bf16.mxu1 %v5301_v58  ;;  %v3356_v2 = vpack.c.bf16 %v3332_v7, %v3331_v3  ;;  %v3342_v56 = vmul.f32 %v5538_v26, %v8940_v47  ;;  %v8952_v3 = vmov 0.0  }
 0x4b5   : > { %v5542_v6 = vpop.eup %5541  ;;  %5553 = vrcp.f32 %v8249_v32  ;;  %4056 = vst.msk [vmem:[%s8100_s16 + $0x70] sm:$0xff] %vm4041_vm14, %v3267_v53  ;;  %v3284_v57 = vadd.f32 %v3252_v48, %v8939_v46  ;;  %v3238_v0 = vmul.f32 0.6931472, %v5540_v21  ;;  %v3186_v28 = vpop.xlane.xlu1 %3185  ;;  %v8318_v40 = vand.u32 127, %v8950_v54 }
 0x4b6   : > { %5555 = vlog2.f32 %v3186_v28  ;;  %4948 = vmatmul.mubr.bf16.gmra.mrb[28].mxu1 %v3356_v2  ;;  %v3341_v38 = vmul.f32 %v5542_v6, %v8095_v23 }
 0x4b7   : > { %4073 = vst.msk [vmem:[%s8100_s16 + $0xf8] sm:$0xff] %vm4041_vm14, %v3284_v57  ;;  %v3277_v24 = vadd.f32 %v3238_v0, %v8941_v18  ;;  %4984 = vmatpush3.bf16.msra.mxu1 %v5301_v58  ;;  %5557 = vrcp.f32 %v3186_v28  ;;  %vm3824_vm15 = vcmp.eq.s32.totalorder %v8951_v34, %v8318_v40 }
 0x4b8   : > { %v5544_v32 = vpop.eup %5543  ;;  %4985 = vmatprep.subr.bf16.mxu1 %v5302_v51  ;;  %v3361_v11 = vpack.c.bf16 %v3342_v56, %v3341_v38  ;;  %5559 = vrcp.f32 %v8257_v9  ;;  %v8323_v12 = vsel %vm3824_vm15, 1.0, %v8952_v3 }
 0x4b9   : > { %4066 = vst.msk [vmem:[%s8100_s16 + $0xc0] sm:$0xff] %vm4041_vm14, %v3277_v24  ;;  %v3242_v41 = vmul.f32 0.6931472, %v5544_v32  ;;  %v5546_v20 = vpop.eup %5545  ;;  %4799 = vmatprep.mubr.msk.f32.mxu0 %vm680_vm0, %v8323_v12 }
 0x4ba   : > { %4991 = vmatprep.mubr.bf16.mxu1 %v3361_v11  ;;  %v3344_v9 = vmul.f32 %v5546_v20, %v8945_v15 }
 0x4bb   : > { %v3279_v23 = vadd.f32 %v3242_v41, %v8942_v13  ;;  %4986 = vmatpush3.bf16.msra.mxu1 %v5302_v51 }
 0x4bc   : > { %v5548_v44 = vpop.eup %5547  ;;  %4987 = vmatprep.subr.bf16.mxu1 %v5303_v22 }
 0x4bd   : > { %v5550_v10 = vpop.eup %5549  ;;  %4068 = vst.msk [vmem:[%s8100_s16 + $0xd0] sm:$0xff] %vm4041_vm14, %v3279_v23  ;;  %v3246_v31 = vmul.f32 0.6931472, %v5548_v44 }
 0x4be   : > { %v5552_v14 = vpop.eup %5551  ;;  %v3343_v52 = vmul.f32 %v5550_v10, %v8107_v36 }
 0x4bf   : > { %v5554_v25 = vpop.eup %5553  ;;  %v3281_v29 = vadd.f32 %v3246_v31, %v8943_v50  ;;  %4988 = vmatpush3.bf16.msra.mxu1 %v5303_v22  ;;  %v3345_v55 = vmul.f32 %v5552_v14, %v8944_v4 }
 0x4c0   : > { %v5556_v49 = vpop.eup %5555  ;;  %4989 = vmatprep.subr.bf16.mxu1 %v5304_v33  ;;  %v3346_v16 = vmul.f32 %v5554_v25, %v8947_v42  ;;  %v3362_v17 = vpack.c.bf16 %v3344_v9, %v3343_v52 }
 0x4c1   : > { %4070 = vst.msk [vmem:[%s8100_s16 + $0xe0] sm:$0xff] %vm4041_vm14, %v3281_v29  ;;  %v3250_v8 = vmul.f32 0.6931472, %v5556_v49  ;;  %v5558_v62 = vpop.eup %5557 }
 0x4c2   : > { %v3363_v37 = vpack.c.bf16 %v3346_v16, %v3345_v55  ;;  %v5560_v36 = vpop.eup %5559  ;;  %v3347_v30 = vmul.f32 %v5558_v62, %v8948_v39  ;;  %v3819_v16 = vadd.s32 8, %v8951_v34 }
 0x4c3   : > { %v3283_v61 = vadd.f32 %v3250_v8, %v8946_v1  ;;  %4990 = vmatpush3.bf16.msra.mxu1 %v5304_v33  ;;  %v3348_v35 = vmul.f32 %v5560_v36, %v8949_v59 }
 0x4c4   : > { %vm3825_vm3 = vcmp.eq.s32.totalorder %v3819_v16, %v8318_v40 }
 0x4c5   : > { %4072 = vst.msk [vmem:[%s8100_s16 + $0xf0] sm:$0xff] %vm4041_vm14, %v3283_v61  ;;  %v3364_v43 = vpack.c.bf16 %v3348_v35, %v3347_v30  ;;  %v4626_v62 = vsel %vm3825_vm3, 1.0, %v8952_v3 }
 0x4c6   : > { %4992 = vmatmul.mubr.bf16.vlgmr.msra.gmra.mrb[32].mxu1 %v3362_v17  ;;  %v3820_v17 = vadd.s32 16, %v8951_v34 }
 0x4c7   : > { %4995 = vmatprep.mubr.bf16.mxu1 %v3363_v37  ;;  %v3821_v37 = vadd.s32 24, %v8951_v34 }
 0x4c8   : > { %vm3826_vm13 = vcmp.eq.s32.totalorder %v3820_v17, %v8318_v40 }
 0x4c9   : > { %v4627_v36 = vsel %vm3826_vm13, 1.0, %v8952_v3  ;;  %vm3827_vm4 = vcmp.eq.s32.totalorder %v3821_v37, %v8318_v40 }
 0x4ca   : > { %v4628_v39 = vsel %vm3827_vm4, 1.0, %v8952_v3 }
 0x4ce   : > { %4996 = vmatmul.mubr.bf16.gmra.mrb[36].mxu1 %v3364_v43 }
 0x504   : > { %v4921_v63 = vpop.f32.mrb[16].mxu1 }
 0x505   : > { %v3447_v60 = vpop.f32.mrb[17].mxu1 }
 0x506   : > { %v4922_v27 = vpop.f32.mrb[18].mxu1 }
 0x507   : > { %v5008_v58 = vpack.c.bf16 %v4922_v27, %v4921_v63  ;;  %v3450_v19 = vpop.f32.mrb[19].mxu1 }
 0x508   : > { %v5002_v5 = vpack.c.bf16 %v3450_v19, %v3447_v60 }
 0x559   : > { %v4925_v7 = vpop.f32.mrb[20].mxu1 }
 0x55a   : > { %v3463_v26 = vpop.f32.mrb[21].mxu1 }
 0x55b   : > { %v4926_v45 = vpop.f32.mrb[22].mxu1 }
 0x55c   : > { %v5020_v53 = vpack.c.bf16 %v4926_v45, %v4925_v7  ;;  %v3466_v48 = vpop.f32.mrb[23].mxu1 }
 0x55d   : > { %v5014_v21 = vpack.c.bf16 %v3466_v48, %v3463_v26 }
 0x575   : > { %v4969_v2 = vpop.f32.mrb[16].mxu0 }
 0x576   : > { %v3673_v51 = vpop.f32.mrb[17].mxu0 }
 0x577   : > { %v4970_v6 = vpop.f32.mrb[18].mxu0 }
 0x578   : > { %v5005_v46 = vpack.c.bf16 %v4970_v6, %v4969_v2  ;;  %v3676_v57 = vpop.f32.mrb[19].mxu0 }
 0x579   : > { %v4999_v28 = vpack.c.bf16 %v3676_v57, %v3673_v51  ;;  %v4945_v38 = vpop.f32.mrb[24].mxu1 }
 0x57a   : > { %v3560_v47 = vpop.f32.mrb[25].mxu1 }
 0x57b   : > { %v4946_v56 = vpop.f32.mrb[26].mxu1  ;;  %5001 = vmatprep.subr.msk.bf16.mxu0 %vm8329_vm1, %v4999_v28 }
 0x57c   : > { %v5032_v18 = vpack.c.bf16 %v4946_v56, %v4945_v38  ;;  %v3563_v24 = vpop.f32.mrb[27].mxu1  ;;  %5004 = vmatpush3.bf16.xpose.msk.msra.mxu0 %vm8329_vm1, %v5002_v5 }
 0x57d   : > { %v5026_v32 = vpack.c.bf16 %v3563_v24, %v3560_v47  ;;  %5007 = vmatprep.subr.msk.bf16.mxu0 %vm8329_vm1, %v5005_v46 }
 0x581   : > { %v4973_v11 = vpop.f32.mrb[20].mxu0 }
 0x582   : > { %v3689_v22 = vpop.f32.mrb[21].mxu0 }
 0x583   : > { %v4974_v41 = vpop.f32.mrb[22].mxu0 }
 0x584   : > { %v5017_v20 = vpack.c.bf16 %v4974_v41, %v4973_v11  ;;  %v3692_v13 = vpop.f32.mrb[23].mxu0  ;;  %5010 = vmatpush3.bf16.xpose.msk.msra.mxu0 %vm8329_vm1, %v5008_v58 }
 0x585   : > { %v5011_v23 = vpack.c.bf16 %v3692_v13, %v3689_v22 }
 0x587   : > { %5013 = vmatprep.subr.msk.bf16.mxu0 %vm8329_vm1, %v5011_v23 }
 0x589   : > { %v4949_v44 = vpop.f32.mrb[28].mxu1 }
 0x58a   : > { %v3576_v33 = vpop.f32.mrb[29].mxu1 }
 0x58b   : > { %v4950_v10 = vpop.f32.mrb[30].mxu1 }
 0x58c   : > { %v5044_v31 = vpack.c.bf16 %v4950_v10, %v4949_v44  ;;  %v3579_v14 = vpop.f32.mrb[31].mxu1  ;;  %5016 = vmatpush3.bf16.xpose.msk.msra.mxu0 %vm8329_vm1, %v5014_v21 }
 0x58d   : > { %v5038_v25 = vpack.c.bf16 %v3579_v14, %v3576_v33  ;;  %5019 = vmatprep.subr.msk.bf16.mxu0 %vm8329_vm1, %v5017_v20 }
 0x594   : > { %5022 = vmatpush3.bf16.xpose.msk.msra.mxu0 %vm8329_vm1, %v5020_v53 }
 0x599   : > { %v4993_v50 = vpop.f32.mrb[32].mxu1 }
 0x59a   : > { %v3786_v29 = vpop.f32.mrb[33].mxu1 }
 0x59b   : > { %v4994_v49 = vpop.f32.mrb[34].mxu1 }
 0x59c   : > { %v5029_v52 = vpack.c.bf16 %v4994_v49, %v4993_v50  ;;  %v3789_v8 = vpop.f32.mrb[35].mxu1 }
 0x59d   : > { %v5023_v4 = vpack.c.bf16 %v3789_v8, %v3786_v29 }
 0x59f   : > { %5025 = vmatprep.subr.msk.bf16.mxu0 %vm8329_vm1, %v5023_v4 }
 0x5a0   : > { %5028 = vmatpush3.bf16.xpose.msk.msra.mxu0 %vm8329_vm1, %v5026_v32 }
 0x5a1   : > { %v4997_v55 = vpop.f32.mrb[36].mxu1  ;;  %5031 = vmatprep.subr.msk.bf16.mxu0 %vm8329_vm1, %v5029_v52 }
 0x5a2   : > { %v3802_v15 = vpop.f32.mrb[37].mxu1 }
 0x5a3   : > { %v4998_v9 = vpop.f32.mrb[38].mxu1 }
 0x5a4   : > { %v5041_v1 = vpack.c.bf16 %v4998_v9, %v4997_v55  ;;  %v3805_v61 = vpop.f32.mrb[39].mxu1 }
 0x5a5   : > { %v5035_v42 = vpack.c.bf16 %v3805_v61, %v3802_v15 }
 0x5a8   : > { %5034 = vmatpush3.bf16.xpose.msk.msra.mxu0 %vm8329_vm1, %v5032_v18 }
 0x5a9   : > { %5037 = vmatprep.subr.msk.bf16.mxu0 %vm8329_vm1, %v5035_v42 }
 0x5b0   : > { %5040 = vmatpush3.bf16.xpose.msk.msra.mxu0 %vm8329_vm1, %v5038_v25 }
 0x5b1   : > { %5043 = vmatprep.subr.msk.bf16.mxu0 %vm8329_vm1, %v5041_v1 }
 0x5b8   : > { %5046 = vmatpush3.bf16.xpose.msk.msra.mxu0 %vm8329_vm1, %v5044_v31 }
 0x5bf   : > { %4800 = vmatmul.mubr.msk.f32.vlgmr.msra.gmra.mrb[24].mxu0 %vm680_vm0, %v8323_v12 }
 0x5c0   : > { %4801 = vmatprep.mubr.msk.f32.mxu0 %vm680_vm0, %v4626_v62 }
 0x5c3   : > { %4802 = vmatmul.mubr.msk.f32.gmra.mrb[26].mxu0 %vm680_vm0, %v4626_v62 }
 0x5c4   : > { %4803 = vmatprep.mubr.msk.f32.mxu0 %vm680_vm0, %v4627_v36 }
 0x5c7   : > { %4804 = vmatmul.mubr.msk.f32.gmra.mrb[28].mxu0 %vm680_vm0, %v4627_v36 }
 0x5c8   : > { %4805 = vmatprep.mubr.msk.f32.mxu0 %vm680_vm0, %v4628_v39 }
 0x5cb   : > { %4806 = vmatmul.mubr.msk.f32.gmra.mrb[30].mxu0 %vm680_vm0, %v4628_v39 }
 0x692   : > { %v4010_v30 = vpop.f32.mrb[24].mxu0 }
 0x693   : > { %4033 = vst [vmem:[%s384_s14] sm:$0xff] %v4010_v30  ;;  %v4012_v59 = vpop.f32.mrb[25].mxu0 }
 0x694   : > { %4034 = vst [vmem:[%s384_s14 + $0x8] sm:$0xff] %v4012_v59 }
 0x696   : > { %v4016_v35 = vpop.f32.mrb[26].mxu0 }
 0x697   : > { %4035 = vst [vmem:[%s384_s14 + $0x10] sm:$0xff] %v4016_v35  ;;  %v4018_v43 = vpop.f32.mrb[27].mxu0 }
 0x698   : > { %4036 = vst [vmem:[%s384_s14 + $0x18] sm:$0xff] %v4018_v43 }
 0x69a   : > { %v4022_v63 = vpop.f32.mrb[28].mxu0 }
 0x69b   : > { %4037 = vst [vmem:[%s384_s14 + $0x20] sm:$0xff] %v4022_v63  ;;  %v4024_v60 = vpop.f32.mrb[29].mxu0 }
 0x69c   : > { %4038 = vst [vmem:[%s384_s14 + $0x28] sm:$0xff] %v4024_v60 }
 0x69e   : > { %v4028_v27 = vpop.f32.mrb[30].mxu0 }
 0x69f   : > { %4039 = vst [vmem:[%s384_s14 + $0x30] sm:$0xff] %v4028_v27  ;;  %v4030_v58 = vpop.f32.mrb[31].mxu0 }
 0x6a0   : > { %4040 = vst [vmem:[%s384_s14 + $0x38] sm:$0xff] %v4030_v58 }
 0x6a1   : > { %5605 = shalt.err (!%p5602_p9)
}
 0x6a2   : > { %s5606_s16 = scalar_lea.hbm %s8390_s7, 1024  ;;  %s5610_s14 = scalar_lea.hbm %s8449_s5, 4096 }
 0x6a3   : > { %p5607_p10 = scmp.ne.s32.totalorder %s8390_s7, %s5606_s16  ;;  %p5611_p13 = scmp.lt.u32.totalorder %s8390_s7, %s8449_s5 }
 0x6a4   : > { %p5612_p0 = scmp.lt.u32.totalorder %s5610_s14, %s5606_s16  ;;  %p5614_p2 = scmp.lt.u32.totalorder %s5606_s16, %s8390_s7 }
 0x6a5   : > { %p5608_p11 = pnand %p5607_p10, %p5784_p3 }
 0x6a6   : > { %p5613_p1 = por %p5612_p0, %p5611_p13 }
 0x6a7   : > { %p5609_p12 = pneg %p5608_p11 }
 0x6a8   : > { %p5615_p4 = por %p5614_p2, %p5613_p1 }
 0x6aa   : > { %p5616_p5 = pnand %p5615_p4, %p5609_p12 }
 0x6ac   : > { %5619 = shalt.err (!%p5616_p5)
}
 0x6ad   : > { %s5696_s30 = smov 256   ;;  %s5697_s27 = smov 16  }
 0x6ae   : > { %5079 = dma.vmem_to_hbm [thread:$0]  (%p5784_p3), %s8385_s26, 1024, %s8390_s7, %s8392_s9, %s5696_s30, %s5696_s30, %s5697_s27  }
 0x6af PF: > { %p5085_p6 = scmp.ge.s32.totalorder %s5686_s28, 2  ;;  %s4117_s24 = sand.u32 1, %s5658_s21  }
 0x6b0   : > { %s4118_s25 = scalar_lea.sflag [#allocation3], %s4117_s24 }
 0x6b1   : > { %p5082_p7 = pnand %p5085_p6, %p5793_p8 }
 0x6b3   : > { %5653 = dma.done.wait (!%p5082_p7), %s4118_s25, 1024  }
 0x6b4   : > { %5655 = vsyncadd (!%p5082_p7), %s4118_s25, 4294966272  ;;  %s20_s28 = sadd.s32 1, %s5686_s28   ;;  %s8955_s24 = sld [smem:[#allocation5_spill]] }
 0x6b5   : > { %p17_p9 = scmp.ge.s32.totalorder %s20_s28, 6   ;;  %s8956_s25 = sld [smem:[#allocation6_spill]] }
 0x6b6   : > { %s8957_s26 = sld [smem:[#allocation7_spill]]  ;;  %s8958_s27 = sld [smem:[#allocation8_spill]] }
 0x6b7   : > { %s8959_s21 = smov %s5662_s22  ;;  %s8960_s22 = smov %s5666_s23 }
 0x6b8   : > { %s8961_s23 = smov %s5802_s15  ;;  %19 = sbr.rel (!%p17_p9) target bundleno = 5 (0x5), region = 99 }
 0x6bf   :  { %4135 = vsyncpa [#allocation3], 1 }
 0x6c0   :  { %4137 = vsyncpa [#allocation3 + $0x1], 1 }

</bundles_post_ra>
